<compile_context>
chip_gen: v7x
topology: tpu7x:2x2x1
jax: 0.10.0
libtpu: 0.0.40
codegen_flags: <defaults>
</compile_context>

<pallas_src>
import math
import functools

import jax
import jax.numpy as jnp
from jax.experimental import pallas as pl
from jax.experimental.pallas import tpu as pltpu


# ------------------------------------------------------------------
# helpers
# ------------------------------------------------------------------

def _layer_norm(x, g, b, eps=1e-5):
    mu = jnp.mean(x, axis=-1, keepdims=True)
    var = jnp.mean((x - mu) ** 2, axis=-1, keepdims=True)
    return (x - mu) * jax.lax.rsqrt(var + eps) * g + b


def _bf16(a):
    return a.astype(jnp.bfloat16)


def sinusoidal_pe(n_position, d_hid):
    pos = jnp.arange(n_position, dtype=jnp.float32)[:, None]
    i = jnp.arange(d_hid)[None, :]
    rates = jnp.power(10000.0, -(2 * (i // 2)).astype(jnp.float32) / d_hid)
    ang = pos * rates
    return jnp.where(i % 2 == 0, jnp.sin(ang), jnp.cos(ang)).astype(jnp.float32)


# ------------------------------------------------------------------
# fused Pallas kernel: entire forward pass (all batch elements, all blocks)
# ------------------------------------------------------------------

def _fused_forward_kernel(x_ref, w_enc_ref, bias_pe_ref,
                          ln1g_ref, ln1b_ref, wqkv_ref, bqkv_ref, wo_ref, bo_ref,
                          ln2g_ref, ln2b_ref, w1_ref, b1_ref, w2_ref, b2_ref,
                          w_dec_ref, b_dec_ref, o_ref, *,
                          num_joints, num_heads, num_blocks):
    x = x_ref[...]                                   # (B, S, N*Dj) f32
    B, S, NDj = x.shape
    N = num_joints
    NE = w_enc_ref.shape[-1]
    E = NE // N
    T = N * S                                        # tokens per batch element (joint-major)
    BT = B * T
    H = num_heads
    Dh = E // H
    scale = 1.0 / math.sqrt(Dh)

    # ---- joint encoder: single block-diagonal matmul, lane-dense (N*E = 128) output ----
    x2d = x.reshape(B * S, NDj)                      # rows (b, s)
    enc = jnp.dot(_bf16(x2d), w_enc_ref[...],
                  preferred_element_type=jnp.float32)             # (B*S, N*E)
    # relayout columns (n, e) -> token rows (b, n, s) via lane slices + sublane concat;
    # all reshapes keep the minor dim and 8-row-aligned sublane tiles.
    h = jnp.concatenate([enc[:, n * E:(n + 1) * E].reshape(B, S, E)
                         for n in range(N)], axis=1)              # (B, T, E)
    h = h + bias_pe_ref[...][None]                   # + per-joint bias + sinusoidal PE
    h = h.reshape(BT, E)                             # token rows (b, n, s)

    # ---- transformer blocks: pre-LN MHSA + GELU MLP ----
    for l in range(num_blocks):
        xn = _layer_norm(h, ln1g_ref[l], ln1b_ref[l])             # (BT, E) f32
        # fused QKV: one lane-dense (E, 3E) matmul
        qkv = jnp.dot(_bf16(xn), wqkv_ref[l],
                      preferred_element_type=jnp.float32) + bqkv_ref[l]   # (BT, 3E)
        qkv = qkv.reshape(B, T, 3 * E)

        ctx_parts = []
        for hh in range(H):
            # 1/sqrt(Dh) applied to the f32 q (not folded into bf16 weights) so the kernel
            # matches the reference's f32-scaled numerics exactly; the multiply is 2 vregs.
            q = qkv[:, :, hh * Dh:(hh + 1) * Dh] * scale                  # (B, T, Dh)
            k = qkv[:, :, E + hh * Dh:E + (hh + 1) * Dh]
            v = qkv[:, :, 2 * E + hh * Dh:2 * E + (hh + 1) * Dh]
            s = jnp.einsum("btd,bsd->bts", _bf16(q), _bf16(k),
                           preferred_element_type=jnp.float32)            # (B, T, T)
            s = s - jnp.max(s, axis=-1, keepdims=True)
            p = jnp.exp(s)
            p = p / jnp.sum(p, axis=-1, keepdims=True)                    # exact softmax
            ctx_parts.append(jnp.einsum("bts,bsd->btd", _bf16(p), _bf16(v),
                                        preferred_element_type=jnp.float32))
        # concat heads -> ONE (E, E) output projection (full-depth contraction)
        ctx = jnp.concatenate(ctx_parts, axis=-1).reshape(BT, E)
        h = h + jnp.dot(_bf16(ctx), wo_ref[l],
                        preferred_element_type=jnp.float32) + bo_ref[l]

        xn2 = _layer_norm(h, ln2g_ref[l], ln2b_ref[l])
        hid = jax.nn.gelu(jnp.dot(_bf16(xn2), w1_ref[l],
                                  preferred_element_type=jnp.float32) + b1_ref[l])  # (BT, F)
        h = h + jnp.dot(_bf16(hid), w2_ref[l],
                        preferred_element_type=jnp.float32) + b2_ref[l]

    # ---- joint decoder: block-diagonal matmul back to (N*Dj), + residual ----
    h3 = h.reshape(B, T, E)
    hcat = jnp.concatenate([h3[:, n * S:(n + 1) * S, :].reshape(B * S, E)
                            for n in range(N)], axis=-1)          # (B*S, N*E), rows (b, s)
    dec = jnp.dot(_bf16(hcat), w_dec_ref[...],
                  preferred_element_type=jnp.float32) + b_dec_ref[...]    # (B*S, N*Dj)
    o_ref[...] = dec.reshape(B, S, NDj) + x


# ------------------------------------------------------------------
# parameter repack (done ONCE, outside the forward)
# ------------------------------------------------------------------

def prepare_params(params, seq_len):
    """Repack PyTorch-layout parameters into kernel layout (bf16 MXU operands, f32 biases)."""
    N, E, Dj = params["W_enc"].shape
    S = seq_len
    blocks = params["blocks"]

    # per-joint encoder bias + temporal sinusoidal PE folded into one (T, E) table,
    # joint-major token order t = n*S + s (valid: attention is fully unmasked).
    pe = sinusoidal_pe(S, E)                                                  # (S, E)
    bias_pe = (params["b_enc"][:, None, :] + pe[None, :, :]).reshape(N * S, E)

    def block_diag(mats):
        rows = sum(m.shape[0] for m in mats)
        cols = sum(m.shape[1] for m in mats)
        out = jnp.zeros((rows, cols), jnp.float32)
        r = c = 0
        for m in mats:
            out = out.at[r:r + m.shape[0], c:c + m.shape[1]].set(m)
            r += m.shape[0]
            c += m.shape[1]
        return out

    w_enc_bd = block_diag([params["W_enc"][n].T for n in range(N)])   # (N*Dj, N*E)
    w_dec_bd = block_diag([params["W_dec"][n].T for n in range(N)])   # (N*E, N*Dj)

    def stack(key):
        return jnp.stack([blk[key] for blk in blocks], axis=0)

    wqkv = jnp.stack([jnp.concatenate([blk["wq"], blk["wk"], blk["wv"]], axis=-1)
                      for blk in blocks], axis=0)                     # (L, E, 3E)
    bqkv = jnp.stack([jnp.concatenate([blk["bq"], blk["bk"], blk["bv"]], axis=-1)
                      for blk in blocks], axis=0)                     # (L, 1, 3E)

    return dict(
        w_enc=w_enc_bd.astype(jnp.bfloat16),                          # (N*Dj, N*E)
        bias_pe=bias_pe,                                              # (T, E) f32
        ln1_g=stack("ln1_g"), ln1_b=stack("ln1_b"),                   # (L, 1, E)
        wqkv=wqkv.astype(jnp.bfloat16), bqkv=bqkv,                    # (L, E, 3E), (L, 1, 3E)
        wo=stack("wo").astype(jnp.bfloat16), bo=stack("bo"),          # (L, E, E), (L, 1, E)
        ln2_g=stack("ln2_g"), ln2_b=stack("ln2_b"),
        w1=stack("w1").astype(jnp.bfloat16), b1=stack("b1"),          # (L, E, F), (L, 1, F)
        w2=stack("w2").astype(jnp.bfloat16), b2=stack("b2"),          # (L, F, E), (L, 1, E)
        w_dec=w_dec_bd.astype(jnp.bfloat16),                          # (N*E, N*Dj)
        b_dec=params["b_dec"].reshape(1, N * Dj),                     # (1, N*Dj) f32
    )


# ------------------------------------------------------------------
# forward wrapper: one pallas_call, whole batch in one grid step
# ------------------------------------------------------------------

def pose_predictor_forward(prep, x, *, num_heads):
    """x: [B, S, N, Dj] -> [B, S, N, Dj]."""
    B, S, N, Dj = x.shape
    L, E = prep["wqkv"].shape[0], prep["wqkv"].shape[1]
    F = prep["w1"].shape[-1]
    T = S * N
    BT = B * T
    H = num_heads
    Dh = E // H

    x_flat = x.reshape(B, S, N * Dj)          # contiguous reshape (no transpose / copy)

    weights = (prep["w_enc"], prep["bias_pe"],
               prep["ln1_g"], prep["ln1_b"], prep["wqkv"], prep["bqkv"],
               prep["wo"], prep["bo"], prep["ln2_g"], prep["ln2_b"],
               prep["w1"], prep["b1"], prep["w2"], prep["b2"],
               prep["w_dec"], prep["b_dec"])

    def full_spec(a):
        nd = a.ndim
        return pl.BlockSpec(a.shape, lambda i, nd=nd: (0,) * nd)

    in_specs = [full_spec(x_flat)] + [full_spec(w) for w in weights]

    flops = 2 * B * S * (N * Dj) * (N * E)            # encoder
    flops += L * (2 * BT * E * 3 * E                  # fused QKV
                  + 2 * 2 * B * H * T * T * Dh        # scores + context
                  + 2 * BT * E * E                    # output projection
                  + 2 * BT * E * F + 2 * BT * F * E)  # MLP
    flops += 2 * B * S * (N * E) * (N * Dj)           # decoder
    transcendentals = L * (B * H * T * T + BT * F)    # softmax exp + gelu tanh
    bytes_accessed = (2 * x_flat.size * 4
                      + sum(int(w.size) * w.dtype.itemsize for w in weights))

    out_flat = pl.pallas_call(
        functools.partial(_fused_forward_kernel,
                          num_joints=N, num_heads=H, num_blocks=L),
        out_shape=jax.ShapeDtypeStruct((B, S, N * Dj), jnp.float32),
        grid=(1,),
        in_specs=in_specs,
        out_specs=pl.BlockSpec((B, S, N * Dj), lambda i: (0, 0, 0)),
        compiler_params=pltpu.CompilerParams(dimension_semantics=("arbitrary",)),
        cost_estimate=pl.CostEstimate(flops=int(flops),
                                      transcendentals=int(transcendentals),
                                      bytes_accessed=int(bytes_accessed)),
    )(x_flat, *weights)

    return out_flat.reshape(B, S, N, Dj)


# ------------------------------------------------------------------
# parameter init (PyTorch-style layout)
# ------------------------------------------------------------------

def init_params(key, num_joints, joint_dim, emb_dim, num_blocks, mlp_ratio=4):
    ks = jax.random.split(key, 2 + num_blocks)

    def dense(k, fan_in, shape):
        return jax.random.normal(k, shape, jnp.float32) / math.sqrt(fan_in)

    params = {
        "W_enc": dense(ks[0], joint_dim, (num_joints, emb_dim, joint_dim)),
        "b_enc": jnp.zeros((num_joints, emb_dim), jnp.float32),
        "W_dec": dense(ks[1], emb_dim, (num_joints, joint_dim, emb_dim)),
        "b_dec": jnp.zeros((num_joints, joint_dim), jnp.float32),
        "blocks": [],
    }
    F = mlp_ratio * emb_dim
    for i in range(num_blocks):
        sk = jax.random.split(ks[2 + i], 6)
        params["blocks"].append(dict(
            ln1_g=jnp.ones((1, emb_dim), jnp.float32),
            ln1_b=jnp.zeros((1, emb_dim), jnp.float32),
            wq=dense(sk[0], emb_dim, (emb_dim, emb_dim)), bq=jnp.zeros((1, emb_dim), jnp.float32),
            wk=dense(sk[1], emb_dim, (emb_dim, emb_dim)), bk=jnp.zeros((1, emb_dim), jnp.float32),
            wv=dense(sk[2], emb_dim, (emb_dim, emb_dim)), bv=jnp.zeros((1, emb_dim), jnp.float32),
            wo=dense(sk[3], emb_dim, (emb_dim, emb_dim)), bo=jnp.zeros((1, emb_dim), jnp.float32),
            ln2_g=jnp.ones((1, emb_dim), jnp.float32),
            ln2_b=jnp.zeros((1, emb_dim), jnp.float32),
            w1=dense(sk[4], emb_dim, (emb_dim, F)), b1=jnp.zeros((1, F), jnp.float32),
            w2=dense(sk[5], F, (F, emb_dim)), b2=jnp.zeros((1, emb_dim), jnp.float32),
        ))
    return params


# ------------------------------------------------------------------
# pure-JAX reference (module semantics; same bf16-operand matmul policy as the kernel)
# ------------------------------------------------------------------

def reference_forward(params, x, num_heads):
    B, S, N, Dj = x.shape
    E = params["W_enc"].shape[1]
    T = S * N
    H = num_heads
    Dh = E // H
    scale = 1.0 / math.sqrt(Dh)
    bf = lambda a: a.astype(jnp.bfloat16)

    def mm(a, b):
        return jnp.matmul(bf(a), bf(b), preferred_element_type=jnp.float32)

    h = jnp.einsum("njk,bsnk->bsnj", bf(params["W_enc"]), bf(x),
                   preferred_element_type=jnp.float32) + params["b_enc"][None, None]
    h = h + sinusoidal_pe(S, E)[None, :, None, :]
    h = h.reshape(B, T, E)
    for p in params["blocks"]:
        xn = _layer_norm(h, p["ln1_g"], p["ln1_b"])
        q = (mm(xn, p["wq"]) + p["bq"]) * scale
        k = mm(xn, p["wk"]) + p["bk"]
        v = mm(xn, p["wv"]) + p["bv"]
        qh = q.reshape(B, T, H, Dh).transpose(0, 2, 1, 3)
        kh = k.reshape(B, T, H, Dh).transpose(0, 2, 1, 3)
        vh = v.reshape(B, T, H, Dh).transpose(0, 2, 1, 3)
        s = jnp.einsum("bhtd,bhsd->bhts", bf(qh), bf(kh), preferred_element_type=jnp.float32)
        a = jax.nn.softmax(s, axis=-1)
        ctx = jnp.einsum("bhts,bhsd->bhtd", bf(a), bf(vh), preferred_element_type=jnp.float32)
        ctx = ctx.transpose(0, 2, 1, 3).reshape(B, T, E)
        h = h + mm(ctx, p["wo"]) + p["bo"]
        xn = _layer_norm(h, p["ln2_g"], p["ln2_b"])
        h = h + mm(jax.nn.gelu(mm(xn, p["w1"]) + p["b1"]), p["w2"]) + p["b2"]
    h = h.reshape(B, S, N, E)
    out = jnp.einsum("njk,bsnk->bsnj", bf(params["W_dec"]), bf(h),
                     preferred_element_type=jnp.float32) + params["b_dec"][None, None]
    return out + x


# ------------------------------------------------------------------
# main
# ------------------------------------------------------------------

if __name__ == "__main__":
    batch, seq_len, num_joints, joint_dim = 2, 8, 4, 6
    emb_dim, num_blocks, num_heads = 32, 2, 4

    key = jax.random.PRNGKey(0)
    k_param, k_x = jax.random.split(key)
    params = init_params(k_param, num_joints, joint_dim, emb_dim, num_blocks)
    x = jax.random.normal(k_x, (batch, seq_len, num_joints, joint_dim), jnp.float32)

    prep = prepare_params(params, seq_len)                 # one-time weight repack
    fwd = jax.jit(functools.partial(pose_predictor_forward, num_heads=num_heads))
    out = jax.block_until_ready(fwd(prep, x))

    assert out.shape == x.shape, f"bad output shape {out.shape}"
    assert bool(jnp.all(jnp.isfinite(out))), "non-finite output"

    ref = jax.block_until_ready(reference_forward(params, x, num_heads))
    max_err = float(jnp.max(jnp.abs(out - ref)))
    assert max_err < 2e-2, f"mismatch vs reference: {max_err}"

    print("KERNEL_OK")
</pallas_src>

<mosaic_0001>
module attributes {stable_mosaic.version = 11 : i64} {
  func.func @_fused_forward_kernel(%arg0: i32, %arg1: memref<2x8x24xf32, #tpu.memory_space<vmem>>, %arg2: memref<24x128xbf16, #tpu.memory_space<vmem>>, %arg3: memref<32x32xf32, #tpu.memory_space<vmem>>, %arg4: memref<2x1x32xf32, #tpu.memory_space<vmem>>, %arg5: memref<2x1x32xf32, #tpu.memory_space<vmem>>, %arg6: memref<2x32x96xbf16, #tpu.memory_space<vmem>>, %arg7: memref<2x1x96xf32, #tpu.memory_space<vmem>>, %arg8: memref<2x32x32xbf16, #tpu.memory_space<vmem>>, %arg9: memref<2x1x32xf32, #tpu.memory_space<vmem>>, %arg10: memref<2x1x32xf32, #tpu.memory_space<vmem>>, %arg11: memref<2x1x32xf32, #tpu.memory_space<vmem>>, %arg12: memref<2x32x128xbf16, #tpu.memory_space<vmem>>, %arg13: memref<2x1x128xf32, #tpu.memory_space<vmem>>, %arg14: memref<2x128x32xbf16, #tpu.memory_space<vmem>>, %arg15: memref<2x1x32xf32, #tpu.memory_space<vmem>>, %arg16: memref<128x24xbf16, #tpu.memory_space<vmem>>, %arg17: memref<1x24xf32, #tpu.memory_space<vmem>>, %arg18: memref<2x8x24xf32, #tpu.memory_space<vmem>>) attributes {dimension_semantics = [#tpu.dimension_semantics<arbitrary>], iteration_bounds = array<i64: 1>, scalar_prefetch = 0 : i64, scratch_operands = 0 : i64, tpu.core_type = #tpu.core_type<tc>, window_params = [{pipeline_mode = #tpu.pipeline_mode<synchronous>, transform_indices = @transform_0, window_bounds = array<i64: 2, 8, 24>}, {pipeline_mode = #tpu.pipeline_mode<synchronous>, transform_indices = @transform_1, window_bounds = array<i64: 24, 128>}, {pipeline_mode = #tpu.pipeline_mode<synchronous>, transform_indices = @transform_2, window_bounds = array<i64: 32, 32>}, {pipeline_mode = #tpu.pipeline_mode<synchronous>, transform_indices = @transform_3, window_bounds = array<i64: 2, 1, 32>}, {pipeline_mode = #tpu.pipeline_mode<synchronous>, transform_indices = @transform_4, window_bounds = array<i64: 2, 1, 32>}, {pipeline_mode = #tpu.pipeline_mode<synchronous>, transform_indices = @transform_5, window_bounds = array<i64: 2, 32, 96>}, {pipeline_mode = #tpu.pipeline_mode<synchronous>, transform_indices = @transform_6, window_bounds = array<i64: 2, 1, 96>}, {pipeline_mode = #tpu.pipeline_mode<synchronous>, transform_indices = @transform_7, window_bounds = array<i64: 2, 32, 32>}, {pipeline_mode = #tpu.pipeline_mode<synchronous>, transform_indices = @transform_8, window_bounds = array<i64: 2, 1, 32>}, {pipeline_mode = #tpu.pipeline_mode<synchronous>, transform_indices = @transform_9, window_bounds = array<i64: 2, 1, 32>}, {pipeline_mode = #tpu.pipeline_mode<synchronous>, transform_indices = @transform_10, window_bounds = array<i64: 2, 1, 32>}, {pipeline_mode = #tpu.pipeline_mode<synchronous>, transform_indices = @transform_11, window_bounds = array<i64: 2, 32, 128>}, {pipeline_mode = #tpu.pipeline_mode<synchronous>, transform_indices = @transform_12, window_bounds = array<i64: 2, 1, 128>}, {pipeline_mode = #tpu.pipeline_mode<synchronous>, transform_indices = @transform_13, window_bounds = array<i64: 2, 128, 32>}, {pipeline_mode = #tpu.pipeline_mode<synchronous>, transform_indices = @transform_14, window_bounds = array<i64: 2, 1, 32>}, {pipeline_mode = #tpu.pipeline_mode<synchronous>, transform_indices = @transform_15, window_bounds = array<i64: 128, 24>}, {pipeline_mode = #tpu.pipeline_mode<synchronous>, transform_indices = @transform_16, window_bounds = array<i64: 1, 24>}, {pipeline_mode = #tpu.pipeline_mode<synchronous>, transform_indices = @transform_17, window_bounds = array<i64: 2, 8, 24>}]} {
    %c0 = arith.constant 0 : index
    %c0_0 = arith.constant 0 : index
    %c0_1 = arith.constant 0 : index
    %0 = vector.load %arg1[%c0, %c0_0, %c0_1] : memref<2x8x24xf32, #tpu.memory_space<vmem>>, vector<2x8x24xf32>
    %1 = vector.shape_cast %0 : vector<2x8x24xf32> to vector<16x24xf32>
    %2 = arith.truncf %1 : vector<16x24xf32> to vector<16x24xbf16>
    %c0_2 = arith.constant 0 : index
    %c0_3 = arith.constant 0 : index
    %3 = vector.load %arg2[%c0_2, %c0_3] : memref<24x128xbf16, #tpu.memory_space<vmem>>, vector<24x128xbf16>
    %cst = arith.constant dense<0.000000e+00> : vector<16x128xf32>
    %4 = tpu.matmul %2, %3, %cst {dimension_numbers = #tpu.dot_dimension_numbers<[1], [0], [0], [1], [0, 0, 1, 1], [], []>} : vector<16x24xbf16>, vector<24x128xbf16>, vector<16x128xf32> -> vector<16x128xf32>
    %5 = vector.extract_strided_slice %4 {offsets = [0, 0], sizes = [16, 32], strides = [1, 1]} : vector<16x128xf32> to vector<16x32xf32>
    %6 = vector.shape_cast %5 : vector<16x32xf32> to vector<2x8x32xf32>
    %7 = vector.extract_strided_slice %4 {offsets = [0, 32], sizes = [16, 32], strides = [1, 1]} : vector<16x128xf32> to vector<16x32xf32>
    %8 = vector.shape_cast %7 : vector<16x32xf32> to vector<2x8x32xf32>
    %9 = vector.extract_strided_slice %4 {offsets = [0, 64], sizes = [16, 32], strides = [1, 1]} : vector<16x128xf32> to vector<16x32xf32>
    %10 = vector.shape_cast %9 : vector<16x32xf32> to vector<2x8x32xf32>
    %11 = vector.extract_strided_slice %4 {offsets = [0, 96], sizes = [16, 32], strides = [1, 1]} : vector<16x128xf32> to vector<16x32xf32>
    %12 = vector.shape_cast %11 : vector<16x32xf32> to vector<2x8x32xf32>
    %13 = tpu.concatenate %6, %8, %10, %12 in 1 : vector<2x8x32xf32>, vector<2x8x32xf32>, vector<2x8x32xf32>, vector<2x8x32xf32> -> vector<2x32x32xf32>
    %c0_4 = arith.constant 0 : index
    %c0_5 = arith.constant 0 : index
    %14 = vector.load %arg3[%c0_4, %c0_5] : memref<32x32xf32, #tpu.memory_space<vmem>>, vector<32x32xf32>
    %15 = vector.shape_cast %14 : vector<32x32xf32> to vector<1x32x32xf32>
    %16 = vector.broadcast %15 : vector<1x32x32xf32> to vector<2x32x32xf32>
    %17 = arith.addf %13, %16 : vector<2x32x32xf32>
    %18 = vector.shape_cast %17 : vector<2x32x32xf32> to vector<64x32xf32>
    %c0_6 = arith.constant 0 : index
    %c0_7 = arith.constant 0 : index
    %c0_8 = arith.constant 0 : index
    %19 = vector.load %arg4[%c0_6, %c0_7, %c0_8] : memref<2x1x32xf32, #tpu.memory_space<vmem>>, vector<1x1x32xf32>
    %20 = vector.shape_cast %19 : vector<1x1x32xf32> to vector<1x32xf32>
    %c0_9 = arith.constant 0 : index
    %c0_10 = arith.constant 0 : index
    %c0_11 = arith.constant 0 : index
    %21 = vector.load %arg5[%c0_9, %c0_10, %c0_11] : memref<2x1x32xf32, #tpu.memory_space<vmem>>, vector<1x1x32xf32>
    %22 = vector.shape_cast %21 : vector<1x1x32xf32> to vector<1x32xf32>
    %cst_12 = arith.constant dense<0.000000e+00> : vector<64xf32>
    %23 = vector.multi_reduction <add>, %18, %cst_12 [1] : vector<64x32xf32> to vector<64xf32>
    %24 = vector.shape_cast %23 : vector<64xf32> to vector<64x1xf32>
    %cst_13 = arith.constant 3.200000e+01 : f32
    %25 = vector.broadcast %cst_13 : f32 to vector<64x1xf32>
    %26 = arith.divf %24, %25 : vector<64x1xf32>
    %27 = vector.broadcast %26 : vector<64x1xf32> to vector<64x32xf32>
    %28 = arith.subf %18, %27 : vector<64x32xf32>
    %29 = arith.mulf %28, %28 : vector<64x32xf32>
    %cst_14 = arith.constant dense<0.000000e+00> : vector<64xf32>
    %30 = vector.multi_reduction <add>, %29, %cst_14 [1] : vector<64x32xf32> to vector<64xf32>
    %31 = vector.shape_cast %30 : vector<64xf32> to vector<64x1xf32>
    %cst_15 = arith.constant 3.200000e+01 : f32
    %32 = vector.broadcast %cst_15 : f32 to vector<64x1xf32>
    %33 = arith.divf %31, %32 : vector<64x1xf32>
    %34 = vector.broadcast %26 : vector<64x1xf32> to vector<64x32xf32>
    %35 = arith.subf %18, %34 : vector<64x32xf32>
    %cst_16 = arith.constant 9.99999974E-6 : f32
    %36 = vector.broadcast %cst_16 : f32 to vector<64x1xf32>
    %37 = arith.addf %33, %36 : vector<64x1xf32>
    %38 = math.rsqrt %37 : vector<64x1xf32>
    %39 = vector.broadcast %38 : vector<64x1xf32> to vector<64x32xf32>
    %40 = arith.mulf %35, %39 : vector<64x32xf32>
    %41 = vector.broadcast %20 : vector<1x32xf32> to vector<64x32xf32>
    %42 = arith.mulf %40, %41 : vector<64x32xf32>
    %43 = vector.broadcast %22 : vector<1x32xf32> to vector<64x32xf32>
    %44 = arith.addf %42, %43 : vector<64x32xf32>
    %45 = arith.truncf %44 : vector<64x32xf32> to vector<64x32xbf16>
    %c0_17 = arith.constant 0 : index
    %c0_18 = arith.constant 0 : index
    %c0_19 = arith.constant 0 : index
    %46 = vector.load %arg6[%c0_17, %c0_18, %c0_19] : memref<2x32x96xbf16, #tpu.memory_space<vmem>>, vector<1x32x96xbf16>
    %47 = vector.shape_cast %46 : vector<1x32x96xbf16> to vector<32x96xbf16>
    %cst_20 = arith.constant dense<0.000000e+00> : vector<64x96xf32>
    %48 = tpu.matmul %45, %47, %cst_20 {dimension_numbers = #tpu.dot_dimension_numbers<[1], [0], [0], [1], [0, 0, 1, 1], [], []>} : vector<64x32xbf16>, vector<32x96xbf16>, vector<64x96xf32> -> vector<64x96xf32>
    %c0_21 = arith.constant 0 : index
    %c0_22 = arith.constant 0 : index
    %c0_23 = arith.constant 0 : index
    %49 = vector.load %arg7[%c0_21, %c0_22, %c0_23] : memref<2x1x96xf32, #tpu.memory_space<vmem>>, vector<1x1x96xf32>
    %50 = vector.shape_cast %49 : vector<1x1x96xf32> to vector<1x96xf32>
    %51 = vector.broadcast %50 : vector<1x96xf32> to vector<64x96xf32>
    %52 = arith.addf %48, %51 : vector<64x96xf32>
    %53 = vector.shape_cast %52 : vector<64x96xf32> to vector<2x32x96xf32>
    %54 = vector.extract_strided_slice %53 {offsets = [0, 0, 0], sizes = [2, 32, 8], strides = [1, 1, 1]} : vector<2x32x96xf32> to vector<2x32x8xf32>
    %cst_24 = arith.constant 0.353553385 : f32
    %55 = vector.broadcast %cst_24 : f32 to vector<2x32x8xf32>
    %56 = arith.mulf %54, %55 : vector<2x32x8xf32>
    %57 = vector.extract_strided_slice %53 {offsets = [0, 0, 32], sizes = [2, 32, 8], strides = [1, 1, 1]} : vector<2x32x96xf32> to vector<2x32x8xf32>
    %58 = vector.extract_strided_slice %53 {offsets = [0, 0, 64], sizes = [2, 32, 8], strides = [1, 1, 1]} : vector<2x32x96xf32> to vector<2x32x8xf32>
    %59 = arith.truncf %56 : vector<2x32x8xf32> to vector<2x32x8xbf16>
    %60 = arith.truncf %57 : vector<2x32x8xf32> to vector<2x32x8xbf16>
    "tpu.trace_start"() <{level = 10 : i32, message = "btd,bsd->bts"}> : () -> ()
    %cst_25 = arith.constant dense<0.000000e+00> : vector<2x32x32xf32>
    %61 = tpu.matmul %59, %60, %cst_25 {dimension_numbers = #tpu.dot_dimension_numbers<[2], [2], [1], [1], [0, 0, 0, 1, 1, 1], [0], [0]>} : vector<2x32x8xbf16>, vector<2x32x8xbf16>, vector<2x32x32xf32> -> vector<2x32x32xf32>
    "tpu.trace_stop"() : () -> ()
    %cst_26 = arith.constant dense<0xFF800000> : vector<2x32xf32>
    %62 = vector.multi_reduction <maximumf>, %61, %cst_26 [2] : vector<2x32x32xf32> to vector<2x32xf32>
    %63 = vector.shape_cast %62 : vector<2x32xf32> to vector<2x32x1xf32>
    %64 = vector.broadcast %63 : vector<2x32x1xf32> to vector<2x32x32xf32>
    %65 = arith.subf %61, %64 : vector<2x32x32xf32>
    %66 = math.exp %65 : vector<2x32x32xf32>
    %cst_27 = arith.constant dense<0.000000e+00> : vector<2x32xf32>
    %67 = vector.multi_reduction <add>, %66, %cst_27 [2] : vector<2x32x32xf32> to vector<2x32xf32>
    %68 = vector.shape_cast %67 : vector<2x32xf32> to vector<2x32x1xf32>
    %69 = vector.broadcast %68 : vector<2x32x1xf32> to vector<2x32x32xf32>
    %70 = arith.divf %66, %69 : vector<2x32x32xf32>
    %71 = arith.truncf %70 : vector<2x32x32xf32> to vector<2x32x32xbf16>
    %72 = arith.truncf %58 : vector<2x32x8xf32> to vector<2x32x8xbf16>
    "tpu.trace_start"() <{level = 10 : i32, message = "bts,bsd->btd"}> : () -> ()
    %cst_28 = arith.constant dense<0.000000e+00> : vector<2x32x8xf32>
    %73 = tpu.matmul %71, %72, %cst_28 {dimension_numbers = #tpu.dot_dimension_numbers<[2], [1], [1], [2], [0, 0, 0, 1, 1, 2], [0], [0]>} : vector<2x32x32xbf16>, vector<2x32x8xbf16>, vector<2x32x8xf32> -> vector<2x32x8xf32>
    "tpu.trace_stop"() : () -> ()
    %74 = vector.extract_strided_slice %53 {offsets = [0, 0, 8], sizes = [2, 32, 8], strides = [1, 1, 1]} : vector<2x32x96xf32> to vector<2x32x8xf32>
    %cst_29 = arith.constant 0.353553385 : f32
    %75 = vector.broadcast %cst_29 : f32 to vector<2x32x8xf32>
    %76 = arith.mulf %74, %75 : vector<2x32x8xf32>
    %77 = vector.extract_strided_slice %53 {offsets = [0, 0, 40], sizes = [2, 32, 8], strides = [1, 1, 1]} : vector<2x32x96xf32> to vector<2x32x8xf32>
    %78 = vector.extract_strided_slice %53 {offsets = [0, 0, 72], sizes = [2, 32, 8], strides = [1, 1, 1]} : vector<2x32x96xf32> to vector<2x32x8xf32>
    %79 = arith.truncf %76 : vector<2x32x8xf32> to vector<2x32x8xbf16>
    %80 = arith.truncf %77 : vector<2x32x8xf32> to vector<2x32x8xbf16>
    "tpu.trace_start"() <{level = 10 : i32, message = "btd,bsd->bts"}> : () -> ()
    %cst_30 = arith.constant dense<0.000000e+00> : vector<2x32x32xf32>
    %81 = tpu.matmul %79, %80, %cst_30 {dimension_numbers = #tpu.dot_dimension_numbers<[2], [2], [1], [1], [0, 0, 0, 1, 1, 1], [0], [0]>} : vector<2x32x8xbf16>, vector<2x32x8xbf16>, vector<2x32x32xf32> -> vector<2x32x32xf32>
    "tpu.trace_stop"() : () -> ()
    %cst_31 = arith.constant dense<0xFF800000> : vector<2x32xf32>
    %82 = vector.multi_reduction <maximumf>, %81, %cst_31 [2] : vector<2x32x32xf32> to vector<2x32xf32>
    %83 = vector.shape_cast %82 : vector<2x32xf32> to vector<2x32x1xf32>
    %84 = vector.broadcast %83 : vector<2x32x1xf32> to vector<2x32x32xf32>
    %85 = arith.subf %81, %84 : vector<2x32x32xf32>
    %86 = math.exp %85 : vector<2x32x32xf32>
    %cst_32 = arith.constant dense<0.000000e+00> : vector<2x32xf32>
    %87 = vector.multi_reduction <add>, %86, %cst_32 [2] : vector<2x32x32xf32> to vector<2x32xf32>
    %88 = vector.shape_cast %87 : vector<2x32xf32> to vector<2x32x1xf32>
    %89 = vector.broadcast %88 : vector<2x32x1xf32> to vector<2x32x32xf32>
    %90 = arith.divf %86, %89 : vector<2x32x32xf32>
    %91 = arith.truncf %90 : vector<2x32x32xf32> to vector<2x32x32xbf16>
    %92 = arith.truncf %78 : vector<2x32x8xf32> to vector<2x32x8xbf16>
    "tpu.trace_start"() <{level = 10 : i32, message = "bts,bsd->btd"}> : () -> ()
    %cst_33 = arith.constant dense<0.000000e+00> : vector<2x32x8xf32>
    %93 = tpu.matmul %91, %92, %cst_33 {dimension_numbers = #tpu.dot_dimension_numbers<[2], [1], [1], [2], [0, 0, 0, 1, 1, 2], [0], [0]>} : vector<2x32x32xbf16>, vector<2x32x8xbf16>, vector<2x32x8xf32> -> vector<2x32x8xf32>
    "tpu.trace_stop"() : () -> ()
    %94 = vector.extract_strided_slice %53 {offsets = [0, 0, 16], sizes = [2, 32, 8], strides = [1, 1, 1]} : vector<2x32x96xf32> to vector<2x32x8xf32>
    %cst_34 = arith.constant 0.353553385 : f32
    %95 = vector.broadcast %cst_34 : f32 to vector<2x32x8xf32>
    %96 = arith.mulf %94, %95 : vector<2x32x8xf32>
    %97 = vector.extract_strided_slice %53 {offsets = [0, 0, 48], sizes = [2, 32, 8], strides = [1, 1, 1]} : vector<2x32x96xf32> to vector<2x32x8xf32>
    %98 = vector.extract_strided_slice %53 {offsets = [0, 0, 80], sizes = [2, 32, 8], strides = [1, 1, 1]} : vector<2x32x96xf32> to vector<2x32x8xf32>
    %99 = arith.truncf %96 : vector<2x32x8xf32> to vector<2x32x8xbf16>
    %100 = arith.truncf %97 : vector<2x32x8xf32> to vector<2x32x8xbf16>
    "tpu.trace_start"() <{level = 10 : i32, message = "btd,bsd->bts"}> : () -> ()
    %cst_35 = arith.constant dense<0.000000e+00> : vector<2x32x32xf32>
    %101 = tpu.matmul %99, %100, %cst_35 {dimension_numbers = #tpu.dot_dimension_numbers<[2], [2], [1], [1], [0, 0, 0, 1, 1, 1], [0], [0]>} : vector<2x32x8xbf16>, vector<2x32x8xbf16>, vector<2x32x32xf32> -> vector<2x32x32xf32>
    "tpu.trace_stop"() : () -> ()
    %cst_36 = arith.constant dense<0xFF800000> : vector<2x32xf32>
    %102 = vector.multi_reduction <maximumf>, %101, %cst_36 [2] : vector<2x32x32xf32> to vector<2x32xf32>
    %103 = vector.shape_cast %102 : vector<2x32xf32> to vector<2x32x1xf32>
    %104 = vector.broadcast %103 : vector<2x32x1xf32> to vector<2x32x32xf32>
    %105 = arith.subf %101, %104 : vector<2x32x32xf32>
    %106 = math.exp %105 : vector<2x32x32xf32>
    %cst_37 = arith.constant dense<0.000000e+00> : vector<2x32xf32>
    %107 = vector.multi_reduction <add>, %106, %cst_37 [2] : vector<2x32x32xf32> to vector<2x32xf32>
    %108 = vector.shape_cast %107 : vector<2x32xf32> to vector<2x32x1xf32>
    %109 = vector.broadcast %108 : vector<2x32x1xf32> to vector<2x32x32xf32>
    %110 = arith.divf %106, %109 : vector<2x32x32xf32>
    %111 = arith.truncf %110 : vector<2x32x32xf32> to vector<2x32x32xbf16>
    %112 = arith.truncf %98 : vector<2x32x8xf32> to vector<2x32x8xbf16>
    "tpu.trace_start"() <{level = 10 : i32, message = "bts,bsd->btd"}> : () -> ()
    %cst_38 = arith.constant dense<0.000000e+00> : vector<2x32x8xf32>
    %113 = tpu.matmul %111, %112, %cst_38 {dimension_numbers = #tpu.dot_dimension_numbers<[2], [1], [1], [2], [0, 0, 0, 1, 1, 2], [0], [0]>} : vector<2x32x32xbf16>, vector<2x32x8xbf16>, vector<2x32x8xf32> -> vector<2x32x8xf32>
    "tpu.trace_stop"() : () -> ()
    %114 = vector.extract_strided_slice %53 {offsets = [0, 0, 24], sizes = [2, 32, 8], strides = [1, 1, 1]} : vector<2x32x96xf32> to vector<2x32x8xf32>
    %cst_39 = arith.constant 0.353553385 : f32
    %115 = vector.broadcast %cst_39 : f32 to vector<2x32x8xf32>
    %116 = arith.mulf %114, %115 : vector<2x32x8xf32>
    %117 = vector.extract_strided_slice %53 {offsets = [0, 0, 56], sizes = [2, 32, 8], strides = [1, 1, 1]} : vector<2x32x96xf32> to vector<2x32x8xf32>
    %118 = vector.extract_strided_slice %53 {offsets = [0, 0, 88], sizes = [2, 32, 8], strides = [1, 1, 1]} : vector<2x32x96xf32> to vector<2x32x8xf32>
    %119 = arith.truncf %116 : vector<2x32x8xf32> to vector<2x32x8xbf16>
    %120 = arith.truncf %117 : vector<2x32x8xf32> to vector<2x32x8xbf16>
    "tpu.trace_start"() <{level = 10 : i32, message = "btd,bsd->bts"}> : () -> ()
    %cst_40 = arith.constant dense<0.000000e+00> : vector<2x32x32xf32>
    %121 = tpu.matmul %119, %120, %cst_40 {dimension_numbers = #tpu.dot_dimension_numbers<[2], [2], [1], [1], [0, 0, 0, 1, 1, 1], [0], [0]>} : vector<2x32x8xbf16>, vector<2x32x8xbf16>, vector<2x32x32xf32> -> vector<2x32x32xf32>
    "tpu.trace_stop"() : () -> ()
    %cst_41 = arith.constant dense<0xFF800000> : vector<2x32xf32>
    %122 = vector.multi_reduction <maximumf>, %121, %cst_41 [2] : vector<2x32x32xf32> to vector<2x32xf32>
    %123 = vector.shape_cast %122 : vector<2x32xf32> to vector<2x32x1xf32>
    %124 = vector.broadcast %123 : vector<2x32x1xf32> to vector<2x32x32xf32>
    %125 = arith.subf %121, %124 : vector<2x32x32xf32>
    %126 = math.exp %125 : vector<2x32x32xf32>
    %cst_42 = arith.constant dense<0.000000e+00> : vector<2x32xf32>
    %127 = vector.multi_reduction <add>, %126, %cst_42 [2] : vector<2x32x32xf32> to vector<2x32xf32>
    %128 = vector.shape_cast %127 : vector<2x32xf32> to vector<2x32x1xf32>
    %129 = vector.broadcast %128 : vector<2x32x1xf32> to vector<2x32x32xf32>
    %130 = arith.divf %126, %129 : vector<2x32x32xf32>
    %131 = arith.truncf %130 : vector<2x32x32xf32> to vector<2x32x32xbf16>
    %132 = arith.truncf %118 : vector<2x32x8xf32> to vector<2x32x8xbf16>
    "tpu.trace_start"() <{level = 10 : i32, message = "bts,bsd->btd"}> : () -> ()
    %cst_43 = arith.constant dense<0.000000e+00> : vector<2x32x8xf32>
    %133 = tpu.matmul %131, %132, %cst_43 {dimension_numbers = #tpu.dot_dimension_numbers<[2], [1], [1], [2], [0, 0, 0, 1, 1, 2], [0], [0]>} : vector<2x32x32xbf16>, vector<2x32x8xbf16>, vector<2x32x8xf32> -> vector<2x32x8xf32>
    "tpu.trace_stop"() : () -> ()
    %134 = tpu.concatenate %73, %93, %113, %133 in 2 : vector<2x32x8xf32>, vector<2x32x8xf32>, vector<2x32x8xf32>, vector<2x32x8xf32> -> vector<2x32x32xf32>
    %135 = vector.shape_cast %134 : vector<2x32x32xf32> to vector<64x32xf32>
    %136 = arith.truncf %135 : vector<64x32xf32> to vector<64x32xbf16>
    %c0_44 = arith.constant 0 : index
    %c0_45 = arith.constant 0 : index
    %c0_46 = arith.constant 0 : index
    %137 = vector.load %arg8[%c0_44, %c0_45, %c0_46] : memref<2x32x32xbf16, #tpu.memory_space<vmem>>, vector<1x32x32xbf16>
    %138 = vector.shape_cast %137 : vector<1x32x32xbf16> to vector<32x32xbf16>
    %cst_47 = arith.constant dense<0.000000e+00> : vector<64x32xf32>
    %139 = tpu.matmul %136, %138, %cst_47 {dimension_numbers = #tpu.dot_dimension_numbers<[1], [0], [0], [1], [0, 0, 1, 1], [], []>} : vector<64x32xbf16>, vector<32x32xbf16>, vector<64x32xf32> -> vector<64x32xf32>
    %140 = arith.addf %18, %139 : vector<64x32xf32>
    %c0_48 = arith.constant 0 : index
    %c0_49 = arith.constant 0 : index
    %c0_50 = arith.constant 0 : index
    %141 = vector.load %arg9[%c0_48, %c0_49, %c0_50] : memref<2x1x32xf32, #tpu.memory_space<vmem>>, vector<1x1x32xf32>
    %142 = vector.shape_cast %141 : vector<1x1x32xf32> to vector<1x32xf32>
    %143 = vector.broadcast %142 : vector<1x32xf32> to vector<64x32xf32>
    %144 = arith.addf %140, %143 : vector<64x32xf32>
    %c0_51 = arith.constant 0 : index
    %c0_52 = arith.constant 0 : index
    %c0_53 = arith.constant 0 : index
    %145 = vector.load %arg10[%c0_51, %c0_52, %c0_53] : memref<2x1x32xf32, #tpu.memory_space<vmem>>, vector<1x1x32xf32>
    %146 = vector.shape_cast %145 : vector<1x1x32xf32> to vector<1x32xf32>
    %c0_54 = arith.constant 0 : index
    %c0_55 = arith.constant 0 : index
    %c0_56 = arith.constant 0 : index
    %147 = vector.load %arg11[%c0_54, %c0_55, %c0_56] : memref<2x1x32xf32, #tpu.memory_space<vmem>>, vector<1x1x32xf32>
    %148 = vector.shape_cast %147 : vector<1x1x32xf32> to vector<1x32xf32>
    %cst_57 = arith.constant dense<0.000000e+00> : vector<64xf32>
    %149 = vector.multi_reduction <add>, %144, %cst_57 [1] : vector<64x32xf32> to vector<64xf32>
    %150 = vector.shape_cast %149 : vector<64xf32> to vector<64x1xf32>
    %cst_58 = arith.constant 3.200000e+01 : f32
    %151 = vector.broadcast %cst_58 : f32 to vector<64x1xf32>
    %152 = arith.divf %150, %151 : vector<64x1xf32>
    %153 = vector.broadcast %152 : vector<64x1xf32> to vector<64x32xf32>
    %154 = arith.subf %144, %153 : vector<64x32xf32>
    %155 = arith.mulf %154, %154 : vector<64x32xf32>
    %cst_59 = arith.constant dense<0.000000e+00> : vector<64xf32>
    %156 = vector.multi_reduction <add>, %155, %cst_59 [1] : vector<64x32xf32> to vector<64xf32>
    %157 = vector.shape_cast %156 : vector<64xf32> to vector<64x1xf32>
    %cst_60 = arith.constant 3.200000e+01 : f32
    %158 = vector.broadcast %cst_60 : f32 to vector<64x1xf32>
    %159 = arith.divf %157, %158 : vector<64x1xf32>
    %160 = vector.broadcast %152 : vector<64x1xf32> to vector<64x32xf32>
    %161 = arith.subf %144, %160 : vector<64x32xf32>
    %cst_61 = arith.constant 9.99999974E-6 : f32
    %162 = vector.broadcast %cst_61 : f32 to vector<64x1xf32>
    %163 = arith.addf %159, %162 : vector<64x1xf32>
    %164 = math.rsqrt %163 : vector<64x1xf32>
    %165 = vector.broadcast %164 : vector<64x1xf32> to vector<64x32xf32>
    %166 = arith.mulf %161, %165 : vector<64x32xf32>
    %167 = vector.broadcast %146 : vector<1x32xf32> to vector<64x32xf32>
    %168 = arith.mulf %166, %167 : vector<64x32xf32>
    %169 = vector.broadcast %148 : vector<1x32xf32> to vector<64x32xf32>
    %170 = arith.addf %168, %169 : vector<64x32xf32>
    %171 = arith.truncf %170 : vector<64x32xf32> to vector<64x32xbf16>
    %c0_62 = arith.constant 0 : index
    %c0_63 = arith.constant 0 : index
    %c0_64 = arith.constant 0 : index
    %172 = vector.load %arg12[%c0_62, %c0_63, %c0_64] : memref<2x32x128xbf16, #tpu.memory_space<vmem>>, vector<1x32x128xbf16>
    %173 = vector.shape_cast %172 : vector<1x32x128xbf16> to vector<32x128xbf16>
    %cst_65 = arith.constant dense<0.000000e+00> : vector<64x128xf32>
    %174 = tpu.matmul %171, %173, %cst_65 {dimension_numbers = #tpu.dot_dimension_numbers<[1], [0], [0], [1], [0, 0, 1, 1], [], []>} : vector<64x32xbf16>, vector<32x128xbf16>, vector<64x128xf32> -> vector<64x128xf32>
    %c0_66 = arith.constant 0 : index
    %c0_67 = arith.constant 0 : index
    %c0_68 = arith.constant 0 : index
    %175 = vector.load %arg13[%c0_66, %c0_67, %c0_68] : memref<2x1x128xf32, #tpu.memory_space<vmem>>, vector<1x1x128xf32>
    %176 = vector.shape_cast %175 : vector<1x1x128xf32> to vector<1x128xf32>
    %177 = vector.broadcast %176 : vector<1x128xf32> to vector<64x128xf32>
    %178 = arith.addf %174, %177 : vector<64x128xf32>
    %179 = arith.mulf %178, %178 : vector<64x128xf32>
    %180 = arith.mulf %178, %179 : vector<64x128xf32>
    %cst_69 = arith.constant 4.471500e-02 : f32
    %181 = vector.broadcast %cst_69 : f32 to vector<64x128xf32>
    %182 = arith.mulf %181, %180 : vector<64x128xf32>
    %183 = arith.addf %178, %182 : vector<64x128xf32>
    %cst_70 = arith.constant 0.797884583 : f32
    %184 = vector.broadcast %cst_70 : f32 to vector<64x128xf32>
    %185 = arith.mulf %184, %183 : vector<64x128xf32>
    %186 = math.tanh %185 : vector<64x128xf32>
    %cst_71 = arith.constant 1.000000e+00 : f32
    %187 = vector.broadcast %cst_71 : f32 to vector<64x128xf32>
    %188 = arith.addf %187, %186 : vector<64x128xf32>
    %cst_72 = arith.constant 5.000000e-01 : f32
    %189 = vector.broadcast %cst_72 : f32 to vector<64x128xf32>
    %190 = arith.mulf %189, %188 : vector<64x128xf32>
    %191 = arith.mulf %178, %190 : vector<64x128xf32>
    %192 = arith.truncf %191 : vector<64x128xf32> to vector<64x128xbf16>
    %c0_73 = arith.constant 0 : index
    %c0_74 = arith.constant 0 : index
    %c0_75 = arith.constant 0 : index
    %193 = vector.load %arg14[%c0_73, %c0_74, %c0_75] : memref<2x128x32xbf16, #tpu.memory_space<vmem>>, vector<1x128x32xbf16>
    %194 = vector.shape_cast %193 : vector<1x128x32xbf16> to vector<128x32xbf16>
    %cst_76 = arith.constant dense<0.000000e+00> : vector<64x32xf32>
    %195 = tpu.matmul %192, %194, %cst_76 {dimension_numbers = #tpu.dot_dimension_numbers<[1], [0], [0], [1], [0, 0, 1, 1], [], []>} : vector<64x128xbf16>, vector<128x32xbf16>, vector<64x32xf32> -> vector<64x32xf32>
    %196 = arith.addf %144, %195 : vector<64x32xf32>
    %c0_77 = arith.constant 0 : index
    %c0_78 = arith.constant 0 : index
    %c0_79 = arith.constant 0 : index
    %197 = vector.load %arg15[%c0_77, %c0_78, %c0_79] : memref<2x1x32xf32, #tpu.memory_space<vmem>>, vector<1x1x32xf32>
    %198 = vector.shape_cast %197 : vector<1x1x32xf32> to vector<1x32xf32>
    %199 = vector.broadcast %198 : vector<1x32xf32> to vector<64x32xf32>
    %200 = arith.addf %196, %199 : vector<64x32xf32>
    %c1 = arith.constant 1 : index
    %c0_80 = arith.constant 0 : index
    %c0_81 = arith.constant 0 : index
    %201 = vector.load %arg4[%c1, %c0_80, %c0_81] : memref<2x1x32xf32, #tpu.memory_space<vmem>>, vector<1x1x32xf32>
    %202 = vector.shape_cast %201 : vector<1x1x32xf32> to vector<1x32xf32>
    %c1_82 = arith.constant 1 : index
    %c0_83 = arith.constant 0 : index
    %c0_84 = arith.constant 0 : index
    %203 = vector.load %arg5[%c1_82, %c0_83, %c0_84] : memref<2x1x32xf32, #tpu.memory_space<vmem>>, vector<1x1x32xf32>
    %204 = vector.shape_cast %203 : vector<1x1x32xf32> to vector<1x32xf32>
    %cst_85 = arith.constant dense<0.000000e+00> : vector<64xf32>
    %205 = vector.multi_reduction <add>, %200, %cst_85 [1] : vector<64x32xf32> to vector<64xf32>
    %206 = vector.shape_cast %205 : vector<64xf32> to vector<64x1xf32>
    %cst_86 = arith.constant 3.200000e+01 : f32
    %207 = vector.broadcast %cst_86 : f32 to vector<64x1xf32>
    %208 = arith.divf %206, %207 : vector<64x1xf32>
    %209 = vector.broadcast %208 : vector<64x1xf32> to vector<64x32xf32>
    %210 = arith.subf %200, %209 : vector<64x32xf32>
    %211 = arith.mulf %210, %210 : vector<64x32xf32>
    %cst_87 = arith.constant dense<0.000000e+00> : vector<64xf32>
    %212 = vector.multi_reduction <add>, %211, %cst_87 [1] : vector<64x32xf32> to vector<64xf32>
    %213 = vector.shape_cast %212 : vector<64xf32> to vector<64x1xf32>
    %cst_88 = arith.constant 3.200000e+01 : f32
    %214 = vector.broadcast %cst_88 : f32 to vector<64x1xf32>
    %215 = arith.divf %213, %214 : vector<64x1xf32>
    %216 = vector.broadcast %208 : vector<64x1xf32> to vector<64x32xf32>
    %217 = arith.subf %200, %216 : vector<64x32xf32>
    %cst_89 = arith.constant 9.99999974E-6 : f32
    %218 = vector.broadcast %cst_89 : f32 to vector<64x1xf32>
    %219 = arith.addf %215, %218 : vector<64x1xf32>
    %220 = math.rsqrt %219 : vector<64x1xf32>
    %221 = vector.broadcast %220 : vector<64x1xf32> to vector<64x32xf32>
    %222 = arith.mulf %217, %221 : vector<64x32xf32>
    %223 = vector.broadcast %202 : vector<1x32xf32> to vector<64x32xf32>
    %224 = arith.mulf %222, %223 : vector<64x32xf32>
    %225 = vector.broadcast %204 : vector<1x32xf32> to vector<64x32xf32>
    %226 = arith.addf %224, %225 : vector<64x32xf32>
    %227 = arith.truncf %226 : vector<64x32xf32> to vector<64x32xbf16>
    %c1_90 = arith.constant 1 : index
    %c0_91 = arith.constant 0 : index
    %c0_92 = arith.constant 0 : index
    %228 = vector.load %arg6[%c1_90, %c0_91, %c0_92] : memref<2x32x96xbf16, #tpu.memory_space<vmem>>, vector<1x32x96xbf16>
    %229 = vector.shape_cast %228 : vector<1x32x96xbf16> to vector<32x96xbf16>
    %cst_93 = arith.constant dense<0.000000e+00> : vector<64x96xf32>
    %230 = tpu.matmul %227, %229, %cst_93 {dimension_numbers = #tpu.dot_dimension_numbers<[1], [0], [0], [1], [0, 0, 1, 1], [], []>} : vector<64x32xbf16>, vector<32x96xbf16>, vector<64x96xf32> -> vector<64x96xf32>
    %c1_94 = arith.constant 1 : index
    %c0_95 = arith.constant 0 : index
    %c0_96 = arith.constant 0 : index
    %231 = vector.load %arg7[%c1_94, %c0_95, %c0_96] : memref<2x1x96xf32, #tpu.memory_space<vmem>>, vector<1x1x96xf32>
    %232 = vector.shape_cast %231 : vector<1x1x96xf32> to vector<1x96xf32>
    %233 = vector.broadcast %232 : vector<1x96xf32> to vector<64x96xf32>
    %234 = arith.addf %230, %233 : vector<64x96xf32>
    %235 = vector.shape_cast %234 : vector<64x96xf32> to vector<2x32x96xf32>
    %236 = vector.extract_strided_slice %235 {offsets = [0, 0, 0], sizes = [2, 32, 8], strides = [1, 1, 1]} : vector<2x32x96xf32> to vector<2x32x8xf32>
    %cst_97 = arith.constant 0.353553385 : f32
    %237 = vector.broadcast %cst_97 : f32 to vector<2x32x8xf32>
    %238 = arith.mulf %236, %237 : vector<2x32x8xf32>
    %239 = vector.extract_strided_slice %235 {offsets = [0, 0, 32], sizes = [2, 32, 8], strides = [1, 1, 1]} : vector<2x32x96xf32> to vector<2x32x8xf32>
    %240 = vector.extract_strided_slice %235 {offsets = [0, 0, 64], sizes = [2, 32, 8], strides = [1, 1, 1]} : vector<2x32x96xf32> to vector<2x32x8xf32>
    %241 = arith.truncf %238 : vector<2x32x8xf32> to vector<2x32x8xbf16>
    %242 = arith.truncf %239 : vector<2x32x8xf32> to vector<2x32x8xbf16>
    "tpu.trace_start"() <{level = 10 : i32, message = "btd,bsd->bts"}> : () -> ()
    %cst_98 = arith.constant dense<0.000000e+00> : vector<2x32x32xf32>
    %243 = tpu.matmul %241, %242, %cst_98 {dimension_numbers = #tpu.dot_dimension_numbers<[2], [2], [1], [1], [0, 0, 0, 1, 1, 1], [0], [0]>} : vector<2x32x8xbf16>, vector<2x32x8xbf16>, vector<2x32x32xf32> -> vector<2x32x32xf32>
    "tpu.trace_stop"() : () -> ()
    %cst_99 = arith.constant dense<0xFF800000> : vector<2x32xf32>
    %244 = vector.multi_reduction <maximumf>, %243, %cst_99 [2] : vector<2x32x32xf32> to vector<2x32xf32>
    %245 = vector.shape_cast %244 : vector<2x32xf32> to vector<2x32x1xf32>
    %246 = vector.broadcast %245 : vector<2x32x1xf32> to vector<2x32x32xf32>
    %247 = arith.subf %243, %246 : vector<2x32x32xf32>
    %248 = math.exp %247 : vector<2x32x32xf32>
    %cst_100 = arith.constant dense<0.000000e+00> : vector<2x32xf32>
    %249 = vector.multi_reduction <add>, %248, %cst_100 [2] : vector<2x32x32xf32> to vector<2x32xf32>
    %250 = vector.shape_cast %249 : vector<2x32xf32> to vector<2x32x1xf32>
    %251 = vector.broadcast %250 : vector<2x32x1xf32> to vector<2x32x32xf32>
    %252 = arith.divf %248, %251 : vector<2x32x32xf32>
    %253 = arith.truncf %252 : vector<2x32x32xf32> to vector<2x32x32xbf16>
    %254 = arith.truncf %240 : vector<2x32x8xf32> to vector<2x32x8xbf16>
    "tpu.trace_start"() <{level = 10 : i32, message = "bts,bsd->btd"}> : () -> ()
    %cst_101 = arith.constant dense<0.000000e+00> : vector<2x32x8xf32>
    %255 = tpu.matmul %253, %254, %cst_101 {dimension_numbers = #tpu.dot_dimension_numbers<[2], [1], [1], [2], [0, 0, 0, 1, 1, 2], [0], [0]>} : vector<2x32x32xbf16>, vector<2x32x8xbf16>, vector<2x32x8xf32> -> vector<2x32x8xf32>
    "tpu.trace_stop"() : () -> ()
    %256 = vector.extract_strided_slice %235 {offsets = [0, 0, 8], sizes = [2, 32, 8], strides = [1, 1, 1]} : vector<2x32x96xf32> to vector<2x32x8xf32>
    %cst_102 = arith.constant 0.353553385 : f32
    %257 = vector.broadcast %cst_102 : f32 to vector<2x32x8xf32>
    %258 = arith.mulf %256, %257 : vector<2x32x8xf32>
    %259 = vector.extract_strided_slice %235 {offsets = [0, 0, 40], sizes = [2, 32, 8], strides = [1, 1, 1]} : vector<2x32x96xf32> to vector<2x32x8xf32>
    %260 = vector.extract_strided_slice %235 {offsets = [0, 0, 72], sizes = [2, 32, 8], strides = [1, 1, 1]} : vector<2x32x96xf32> to vector<2x32x8xf32>
    %261 = arith.truncf %258 : vector<2x32x8xf32> to vector<2x32x8xbf16>
    %262 = arith.truncf %259 : vector<2x32x8xf32> to vector<2x32x8xbf16>
    "tpu.trace_start"() <{level = 10 : i32, message = "btd,bsd->bts"}> : () -> ()
    %cst_103 = arith.constant dense<0.000000e+00> : vector<2x32x32xf32>
    %263 = tpu.matmul %261, %262, %cst_103 {dimension_numbers = #tpu.dot_dimension_numbers<[2], [2], [1], [1], [0, 0, 0, 1, 1, 1], [0], [0]>} : vector<2x32x8xbf16>, vector<2x32x8xbf16>, vector<2x32x32xf32> -> vector<2x32x32xf32>
    "tpu.trace_stop"() : () -> ()
    %cst_104 = arith.constant dense<0xFF800000> : vector<2x32xf32>
    %264 = vector.multi_reduction <maximumf>, %263, %cst_104 [2] : vector<2x32x32xf32> to vector<2x32xf32>
    %265 = vector.shape_cast %264 : vector<2x32xf32> to vector<2x32x1xf32>
    %266 = vector.broadcast %265 : vector<2x32x1xf32> to vector<2x32x32xf32>
    %267 = arith.subf %263, %266 : vector<2x32x32xf32>
    %268 = math.exp %267 : vector<2x32x32xf32>
    %cst_105 = arith.constant dense<0.000000e+00> : vector<2x32xf32>
    %269 = vector.multi_reduction <add>, %268, %cst_105 [2] : vector<2x32x32xf32> to vector<2x32xf32>
    %270 = vector.shape_cast %269 : vector<2x32xf32> to vector<2x32x1xf32>
    %271 = vector.broadcast %270 : vector<2x32x1xf32> to vector<2x32x32xf32>
    %272 = arith.divf %268, %271 : vector<2x32x32xf32>
    %273 = arith.truncf %272 : vector<2x32x32xf32> to vector<2x32x32xbf16>
    %274 = arith.truncf %260 : vector<2x32x8xf32> to vector<2x32x8xbf16>
    "tpu.trace_start"() <{level = 10 : i32, message = "bts,bsd->btd"}> : () -> ()
    %cst_106 = arith.constant dense<0.000000e+00> : vector<2x32x8xf32>
    %275 = tpu.matmul %273, %274, %cst_106 {dimension_numbers = #tpu.dot_dimension_numbers<[2], [1], [1], [2], [0, 0, 0, 1, 1, 2], [0], [0]>} : vector<2x32x32xbf16>, vector<2x32x8xbf16>, vector<2x32x8xf32> -> vector<2x32x8xf32>
    "tpu.trace_stop"() : () -> ()
    %276 = vector.extract_strided_slice %235 {offsets = [0, 0, 16], sizes = [2, 32, 8], strides = [1, 1, 1]} : vector<2x32x96xf32> to vector<2x32x8xf32>
    %cst_107 = arith.constant 0.353553385 : f32
    %277 = vector.broadcast %cst_107 : f32 to vector<2x32x8xf32>
    %278 = arith.mulf %276, %277 : vector<2x32x8xf32>
    %279 = vector.extract_strided_slice %235 {offsets = [0, 0, 48], sizes = [2, 32, 8], strides = [1, 1, 1]} : vector<2x32x96xf32> to vector<2x32x8xf32>
    %280 = vector.extract_strided_slice %235 {offsets = [0, 0, 80], sizes = [2, 32, 8], strides = [1, 1, 1]} : vector<2x32x96xf32> to vector<2x32x8xf32>
    %281 = arith.truncf %278 : vector<2x32x8xf32> to vector<2x32x8xbf16>
    %282 = arith.truncf %279 : vector<2x32x8xf32> to vector<2x32x8xbf16>
    "tpu.trace_start"() <{level = 10 : i32, message = "btd,bsd->bts"}> : () -> ()
    %cst_108 = arith.constant dense<0.000000e+00> : vector<2x32x32xf32>
    %283 = tpu.matmul %281, %282, %cst_108 {dimension_numbers = #tpu.dot_dimension_numbers<[2], [2], [1], [1], [0, 0, 0, 1, 1, 1], [0], [0]>} : vector<2x32x8xbf16>, vector<2x32x8xbf16>, vector<2x32x32xf32> -> vector<2x32x32xf32>
    "tpu.trace_stop"() : () -> ()
    %cst_109 = arith.constant dense<0xFF800000> : vector<2x32xf32>
    %284 = vector.multi_reduction <maximumf>, %283, %cst_109 [2] : vector<2x32x32xf32> to vector<2x32xf32>
    %285 = vector.shape_cast %284 : vector<2x32xf32> to vector<2x32x1xf32>
    %286 = vector.broadcast %285 : vector<2x32x1xf32> to vector<2x32x32xf32>
    %287 = arith.subf %283, %286 : vector<2x32x32xf32>
    %288 = math.exp %287 : vector<2x32x32xf32>
    %cst_110 = arith.constant dense<0.000000e+00> : vector<2x32xf32>
    %289 = vector.multi_reduction <add>, %288, %cst_110 [2] : vector<2x32x32xf32> to vector<2x32xf32>
    %290 = vector.shape_cast %289 : vector<2x32xf32> to vector<2x32x1xf32>
    %291 = vector.broadcast %290 : vector<2x32x1xf32> to vector<2x32x32xf32>
    %292 = arith.divf %288, %291 : vector<2x32x32xf32>
    %293 = arith.truncf %292 : vector<2x32x32xf32> to vector<2x32x32xbf16>
    %294 = arith.truncf %280 : vector<2x32x8xf32> to vector<2x32x8xbf16>
    "tpu.trace_start"() <{level = 10 : i32, message = "bts,bsd->btd"}> : () -> ()
    %cst_111 = arith.constant dense<0.000000e+00> : vector<2x32x8xf32>
    %295 = tpu.matmul %293, %294, %cst_111 {dimension_numbers = #tpu.dot_dimension_numbers<[2], [1], [1], [2], [0, 0, 0, 1, 1, 2], [0], [0]>} : vector<2x32x32xbf16>, vector<2x32x8xbf16>, vector<2x32x8xf32> -> vector<2x32x8xf32>
    "tpu.trace_stop"() : () -> ()
    %296 = vector.extract_strided_slice %235 {offsets = [0, 0, 24], sizes = [2, 32, 8], strides = [1, 1, 1]} : vector<2x32x96xf32> to vector<2x32x8xf32>
    %cst_112 = arith.constant 0.353553385 : f32
    %297 = vector.broadcast %cst_112 : f32 to vector<2x32x8xf32>
    %298 = arith.mulf %296, %297 : vector<2x32x8xf32>
    %299 = vector.extract_strided_slice %235 {offsets = [0, 0, 56], sizes = [2, 32, 8], strides = [1, 1, 1]} : vector<2x32x96xf32> to vector<2x32x8xf32>
    %300 = vector.extract_strided_slice %235 {offsets = [0, 0, 88], sizes = [2, 32, 8], strides = [1, 1, 1]} : vector<2x32x96xf32> to vector<2x32x8xf32>
    %301 = arith.truncf %298 : vector<2x32x8xf32> to vector<2x32x8xbf16>
    %302 = arith.truncf %299 : vector<2x32x8xf32> to vector<2x32x8xbf16>
    "tpu.trace_start"() <{level = 10 : i32, message = "btd,bsd->bts"}> : () -> ()
    %cst_113 = arith.constant dense<0.000000e+00> : vector<2x32x32xf32>
    %303 = tpu.matmul %301, %302, %cst_113 {dimension_numbers = #tpu.dot_dimension_numbers<[2], [2], [1], [1], [0, 0, 0, 1, 1, 1], [0], [0]>} : vector<2x32x8xbf16>, vector<2x32x8xbf16>, vector<2x32x32xf32> -> vector<2x32x32xf32>
    "tpu.trace_stop"() : () -> ()
    %cst_114 = arith.constant dense<0xFF800000> : vector<2x32xf32>
    %304 = vector.multi_reduction <maximumf>, %303, %cst_114 [2] : vector<2x32x32xf32> to vector<2x32xf32>
    %305 = vector.shape_cast %304 : vector<2x32xf32> to vector<2x32x1xf32>
    %306 = vector.broadcast %305 : vector<2x32x1xf32> to vector<2x32x32xf32>
    %307 = arith.subf %303, %306 : vector<2x32x32xf32>
    %308 = math.exp %307 : vector<2x32x32xf32>
    %cst_115 = arith.constant dense<0.000000e+00> : vector<2x32xf32>
    %309 = vector.multi_reduction <add>, %308, %cst_115 [2] : vector<2x32x32xf32> to vector<2x32xf32>
    %310 = vector.shape_cast %309 : vector<2x32xf32> to vector<2x32x1xf32>
    %311 = vector.broadcast %310 : vector<2x32x1xf32> to vector<2x32x32xf32>
    %312 = arith.divf %308, %311 : vector<2x32x32xf32>
    %313 = arith.truncf %312 : vector<2x32x32xf32> to vector<2x32x32xbf16>
    %314 = arith.truncf %300 : vector<2x32x8xf32> to vector<2x32x8xbf16>
    "tpu.trace_start"() <{level = 10 : i32, message = "bts,bsd->btd"}> : () -> ()
    %cst_116 = arith.constant dense<0.000000e+00> : vector<2x32x8xf32>
    %315 = tpu.matmul %313, %314, %cst_116 {dimension_numbers = #tpu.dot_dimension_numbers<[2], [1], [1], [2], [0, 0, 0, 1, 1, 2], [0], [0]>} : vector<2x32x32xbf16>, vector<2x32x8xbf16>, vector<2x32x8xf32> -> vector<2x32x8xf32>
    "tpu.trace_stop"() : () -> ()
    %316 = tpu.concatenate %255, %275, %295, %315 in 2 : vector<2x32x8xf32>, vector<2x32x8xf32>, vector<2x32x8xf32>, vector<2x32x8xf32> -> vector<2x32x32xf32>
    %317 = vector.shape_cast %316 : vector<2x32x32xf32> to vector<64x32xf32>
    %318 = arith.truncf %317 : vector<64x32xf32> to vector<64x32xbf16>
    %c1_117 = arith.constant 1 : index
    %c0_118 = arith.constant 0 : index
    %c0_119 = arith.constant 0 : index
    %319 = vector.load %arg8[%c1_117, %c0_118, %c0_119] : memref<2x32x32xbf16, #tpu.memory_space<vmem>>, vector<1x32x32xbf16>
    %320 = vector.shape_cast %319 : vector<1x32x32xbf16> to vector<32x32xbf16>
    %cst_120 = arith.constant dense<0.000000e+00> : vector<64x32xf32>
    %321 = tpu.matmul %318, %320, %cst_120 {dimension_numbers = #tpu.dot_dimension_numbers<[1], [0], [0], [1], [0, 0, 1, 1], [], []>} : vector<64x32xbf16>, vector<32x32xbf16>, vector<64x32xf32> -> vector<64x32xf32>
    %322 = arith.addf %200, %321 : vector<64x32xf32>
    %c1_121 = arith.constant 1 : index
    %c0_122 = arith.constant 0 : index
    %c0_123 = arith.constant 0 : index
    %323 = vector.load %arg9[%c1_121, %c0_122, %c0_123] : memref<2x1x32xf32, #tpu.memory_space<vmem>>, vector<1x1x32xf32>
    %324 = vector.shape_cast %323 : vector<1x1x32xf32> to vector<1x32xf32>
    %325 = vector.broadcast %324 : vector<1x32xf32> to vector<64x32xf32>
    %326 = arith.addf %322, %325 : vector<64x32xf32>
    %c1_124 = arith.constant 1 : index
    %c0_125 = arith.constant 0 : index
    %c0_126 = arith.constant 0 : index
    %327 = vector.load %arg10[%c1_124, %c0_125, %c0_126] : memref<2x1x32xf32, #tpu.memory_space<vmem>>, vector<1x1x32xf32>
    %328 = vector.shape_cast %327 : vector<1x1x32xf32> to vector<1x32xf32>
    %c1_127 = arith.constant 1 : index
    %c0_128 = arith.constant 0 : index
    %c0_129 = arith.constant 0 : index
    %329 = vector.load %arg11[%c1_127, %c0_128, %c0_129] : memref<2x1x32xf32, #tpu.memory_space<vmem>>, vector<1x1x32xf32>
    %330 = vector.shape_cast %329 : vector<1x1x32xf32> to vector<1x32xf32>
    %cst_130 = arith.constant dense<0.000000e+00> : vector<64xf32>
    %331 = vector.multi_reduction <add>, %326, %cst_130 [1] : vector<64x32xf32> to vector<64xf32>
    %332 = vector.shape_cast %331 : vector<64xf32> to vector<64x1xf32>
    %cst_131 = arith.constant 3.200000e+01 : f32
    %333 = vector.broadcast %cst_131 : f32 to vector<64x1xf32>
    %334 = arith.divf %332, %333 : vector<64x1xf32>
    %335 = vector.broadcast %334 : vector<64x1xf32> to vector<64x32xf32>
    %336 = arith.subf %326, %335 : vector<64x32xf32>
    %337 = arith.mulf %336, %336 : vector<64x32xf32>
    %cst_132 = arith.constant dense<0.000000e+00> : vector<64xf32>
    %338 = vector.multi_reduction <add>, %337, %cst_132 [1] : vector<64x32xf32> to vector<64xf32>
    %339 = vector.shape_cast %338 : vector<64xf32> to vector<64x1xf32>
    %cst_133 = arith.constant 3.200000e+01 : f32
    %340 = vector.broadcast %cst_133 : f32 to vector<64x1xf32>
    %341 = arith.divf %339, %340 : vector<64x1xf32>
    %342 = vector.broadcast %334 : vector<64x1xf32> to vector<64x32xf32>
    %343 = arith.subf %326, %342 : vector<64x32xf32>
    %cst_134 = arith.constant 9.99999974E-6 : f32
    %344 = vector.broadcast %cst_134 : f32 to vector<64x1xf32>
    %345 = arith.addf %341, %344 : vector<64x1xf32>
    %346 = math.rsqrt %345 : vector<64x1xf32>
    %347 = vector.broadcast %346 : vector<64x1xf32> to vector<64x32xf32>
    %348 = arith.mulf %343, %347 : vector<64x32xf32>
    %349 = vector.broadcast %328 : vector<1x32xf32> to vector<64x32xf32>
    %350 = arith.mulf %348, %349 : vector<64x32xf32>
    %351 = vector.broadcast %330 : vector<1x32xf32> to vector<64x32xf32>
    %352 = arith.addf %350, %351 : vector<64x32xf32>
    %353 = arith.truncf %352 : vector<64x32xf32> to vector<64x32xbf16>
    %c1_135 = arith.constant 1 : index
    %c0_136 = arith.constant 0 : index
    %c0_137 = arith.constant 0 : index
    %354 = vector.load %arg12[%c1_135, %c0_136, %c0_137] : memref<2x32x128xbf16, #tpu.memory_space<vmem>>, vector<1x32x128xbf16>
    %355 = vector.shape_cast %354 : vector<1x32x128xbf16> to vector<32x128xbf16>
    %cst_138 = arith.constant dense<0.000000e+00> : vector<64x128xf32>
    %356 = tpu.matmul %353, %355, %cst_138 {dimension_numbers = #tpu.dot_dimension_numbers<[1], [0], [0], [1], [0, 0, 1, 1], [], []>} : vector<64x32xbf16>, vector<32x128xbf16>, vector<64x128xf32> -> vector<64x128xf32>
    %c1_139 = arith.constant 1 : index
    %c0_140 = arith.constant 0 : index
    %c0_141 = arith.constant 0 : index
    %357 = vector.load %arg13[%c1_139, %c0_140, %c0_141] : memref<2x1x128xf32, #tpu.memory_space<vmem>>, vector<1x1x128xf32>
    %358 = vector.shape_cast %357 : vector<1x1x128xf32> to vector<1x128xf32>
    %359 = vector.broadcast %358 : vector<1x128xf32> to vector<64x128xf32>
    %360 = arith.addf %356, %359 : vector<64x128xf32>
    %361 = arith.mulf %360, %360 : vector<64x128xf32>
    %362 = arith.mulf %360, %361 : vector<64x128xf32>
    %cst_142 = arith.constant 4.471500e-02 : f32
    %363 = vector.broadcast %cst_142 : f32 to vector<64x128xf32>
    %364 = arith.mulf %363, %362 : vector<64x128xf32>
    %365 = arith.addf %360, %364 : vector<64x128xf32>
    %cst_143 = arith.constant 0.797884583 : f32
    %366 = vector.broadcast %cst_143 : f32 to vector<64x128xf32>
    %367 = arith.mulf %366, %365 : vector<64x128xf32>
    %368 = math.tanh %367 : vector<64x128xf32>
    %cst_144 = arith.constant 1.000000e+00 : f32
    %369 = vector.broadcast %cst_144 : f32 to vector<64x128xf32>
    %370 = arith.addf %369, %368 : vector<64x128xf32>
    %cst_145 = arith.constant 5.000000e-01 : f32
    %371 = vector.broadcast %cst_145 : f32 to vector<64x128xf32>
    %372 = arith.mulf %371, %370 : vector<64x128xf32>
    %373 = arith.mulf %360, %372 : vector<64x128xf32>
    %374 = arith.truncf %373 : vector<64x128xf32> to vector<64x128xbf16>
    %c1_146 = arith.constant 1 : index
    %c0_147 = arith.constant 0 : index
    %c0_148 = arith.constant 0 : index
    %375 = vector.load %arg14[%c1_146, %c0_147, %c0_148] : memref<2x128x32xbf16, #tpu.memory_space<vmem>>, vector<1x128x32xbf16>
    %376 = vector.shape_cast %375 : vector<1x128x32xbf16> to vector<128x32xbf16>
    %cst_149 = arith.constant dense<0.000000e+00> : vector<64x32xf32>
    %377 = tpu.matmul %374, %376, %cst_149 {dimension_numbers = #tpu.dot_dimension_numbers<[1], [0], [0], [1], [0, 0, 1, 1], [], []>} : vector<64x128xbf16>, vector<128x32xbf16>, vector<64x32xf32> -> vector<64x32xf32>
    %378 = arith.addf %326, %377 : vector<64x32xf32>
    %c1_150 = arith.constant 1 : index
    %c0_151 = arith.constant 0 : index
    %c0_152 = arith.constant 0 : index
    %379 = vector.load %arg15[%c1_150, %c0_151, %c0_152] : memref<2x1x32xf32, #tpu.memory_space<vmem>>, vector<1x1x32xf32>
    %380 = vector.shape_cast %379 : vector<1x1x32xf32> to vector<1x32xf32>
    %381 = vector.broadcast %380 : vector<1x32xf32> to vector<64x32xf32>
    %382 = arith.addf %378, %381 : vector<64x32xf32>
    %383 = vector.shape_cast %382 : vector<64x32xf32> to vector<2x32x32xf32>
    %384 = vector.extract_strided_slice %383 {offsets = [0, 0, 0], sizes = [2, 8, 32], strides = [1, 1, 1]} : vector<2x32x32xf32> to vector<2x8x32xf32>
    %385 = vector.shape_cast %384 : vector<2x8x32xf32> to vector<16x32xf32>
    %386 = vector.extract_strided_slice %383 {offsets = [0, 8, 0], sizes = [2, 8, 32], strides = [1, 1, 1]} : vector<2x32x32xf32> to vector<2x8x32xf32>
    %387 = vector.shape_cast %386 : vector<2x8x32xf32> to vector<16x32xf32>
    %388 = vector.extract_strided_slice %383 {offsets = [0, 16, 0], sizes = [2, 8, 32], strides = [1, 1, 1]} : vector<2x32x32xf32> to vector<2x8x32xf32>
    %389 = vector.shape_cast %388 : vector<2x8x32xf32> to vector<16x32xf32>
    %390 = vector.extract_strided_slice %383 {offsets = [0, 24, 0], sizes = [2, 8, 32], strides = [1, 1, 1]} : vector<2x32x32xf32> to vector<2x8x32xf32>
    %391 = vector.shape_cast %390 : vector<2x8x32xf32> to vector<16x32xf32>
    %392 = tpu.concatenate %385, %387, %389, %391 in 1 : vector<16x32xf32>, vector<16x32xf32>, vector<16x32xf32>, vector<16x32xf32> -> vector<16x128xf32>
    %393 = arith.truncf %392 : vector<16x128xf32> to vector<16x128xbf16>
    %c0_153 = arith.constant 0 : index
    %c0_154 = arith.constant 0 : index
    %394 = vector.load %arg16[%c0_153, %c0_154] : memref<128x24xbf16, #tpu.memory_space<vmem>>, vector<128x24xbf16>
    %cst_155 = arith.constant dense<0.000000e+00> : vector<16x24xf32>
    %395 = tpu.matmul %393, %394, %cst_155 {dimension_numbers = #tpu.dot_dimension_numbers<[1], [0], [0], [1], [0, 0, 1, 1], [], []>} : vector<16x128xbf16>, vector<128x24xbf16>, vector<16x24xf32> -> vector<16x24xf32>
    %c0_156 = arith.constant 0 : index
    %c0_157 = arith.constant 0 : index
    %396 = vector.load %arg17[%c0_156, %c0_157] : memref<1x24xf32, #tpu.memory_space<vmem>>, vector<1x24xf32>
    %397 = vector.broadcast %396 : vector<1x24xf32> to vector<16x24xf32>
    %398 = arith.addf %395, %397 : vector<16x24xf32>
    %399 = vector.shape_cast %398 : vector<16x24xf32> to vector<2x8x24xf32>
    %400 = arith.addf %399, %0 : vector<2x8x24xf32>
    %c0_158 = arith.constant 0 : index
    %c0_159 = arith.constant 0 : index
    %c0_160 = arith.constant 0 : index
    %401 = vector.load %arg18[%c0_158, %c0_159, %c0_160] : memref<2x8x24xf32, #tpu.memory_space<vmem>>, vector<2x8x24xf32>
    tpu.vector_store %arg18[%c0_158, %c0_159, %c0_160], %400 {strides = array<i32>} : memref<2x8x24xf32, #tpu.memory_space<vmem>>, vector<2x8x24xf32>,
    return
  }
  func.func @transform_0(%arg0: i32) -> (i32, i32, i32) {
    %c0_i32 = arith.constant 0 : i32
    %c0_i32_0 = arith.constant 0 : i32
    %c0_i32_1 = arith.constant 0 : i32
    %c0_i32_2 = arith.constant 0 : i32
    return %c0_i32, %c0_i32_0, %c0_i32_1 : i32, i32, i32
  }
  func.func @transform_1(%arg0: i32) -> (i32, i32) {
    %c0_i32 = arith.constant 0 : i32
    %c0_i32_0 = arith.constant 0 : i32
    %c0_i32_1 = arith.constant 0 : i32
    return %c0_i32, %c0_i32_0 : i32, i32
  }
  func.func @transform_2(%arg0: i32) -> (i32, i32) {
    %c0_i32 = arith.constant 0 : i32
    %c0_i32_0 = arith.constant 0 : i32
    %c0_i32_1 = arith.constant 0 : i32
    return %c0_i32, %c0_i32_0 : i32, i32
  }
  func.func @transform_3(%arg0: i32) -> (i32, i32, i32) {
    %c0_i32 = arith.constant 0 : i32
    %c0_i32_0 = arith.constant 0 : i32
    %c0_i32_1 = arith.constant 0 : i32
    %c0_i32_2 = arith.constant 0 : i32
    return %c0_i32, %c0_i32_0, %c0_i32_1 : i32, i32, i32
  }
  func.func @transform_4(%arg0: i32) -> (i32, i32, i32) {
    %c0_i32 = arith.constant 0 : i32
    %c0_i32_0 = arith.constant 0 : i32
    %c0_i32_1 = arith.constant 0 : i32
    %c0_i32_2 = arith.constant 0 : i32
    return %c0_i32, %c0_i32_0, %c0_i32_1 : i32, i32, i32
  }
  func.func @transform_5(%arg0: i32) -> (i32, i32, i32) {
    %c0_i32 = arith.constant 0 : i32
    %c0_i32_0 = arith.constant 0 : i32
    %c0_i32_1 = arith.constant 0 : i32
    %c0_i32_2 = arith.constant 0 : i32
    return %c0_i32, %c0_i32_0, %c0_i32_1 : i32, i32, i32
  }
  func.func @transform_6(%arg0: i32) -> (i32, i32, i32) {
    %c0_i32 = arith.constant 0 : i32
    %c0_i32_0 = arith.constant 0 : i32
    %c0_i32_1 = arith.constant 0 : i32
    %c0_i32_2 = arith.constant 0 : i32
    return %c0_i32, %c0_i32_0, %c0_i32_1 : i32, i32, i32
  }
  func.func @transform_7(%arg0: i32) -> (i32, i32, i32) {
    %c0_i32 = arith.constant 0 : i32
    %c0_i32_0 = arith.constant 0 : i32
    %c0_i32_1 = arith.constant 0 : i32
    %c0_i32_2 = arith.constant 0 : i32
    return %c0_i32, %c0_i32_0, %c0_i32_1 : i32, i32, i32
  }
  func.func @transform_8(%arg0: i32) -> (i32, i32, i32) {
    %c0_i32 = arith.constant 0 : i32
    %c0_i32_0 = arith.constant 0 : i32
    %c0_i32_1 = arith.constant 0 : i32
    %c0_i32_2 = arith.constant 0 : i32
    return %c0_i32, %c0_i32_0, %c0_i32_1 : i32, i32, i32
  }
  func.func @transform_9(%arg0: i32) -> (i32, i32, i32) {
    %c0_i32 = arith.constant 0 : i32
    %c0_i32_0 = arith.constant 0 : i32
    %c0_i32_1 = arith.constant 0 : i32
    %c0_i32_2 = arith.constant 0 : i32
    return %c0_i32, %c0_i32_0, %c0_i32_1 : i32, i32, i32
  }
  func.func @transform_10(%arg0: i32) -> (i32, i32, i32) {
    %c0_i32 = arith.constant 0 : i32
    %c0_i32_0 = arith.constant 0 : i32
    %c0_i32_1 = arith.constant 0 : i32
    %c0_i32_2 = arith.constant 0 : i32
    return %c0_i32, %c0_i32_0, %c0_i32_1 : i32, i32, i32
  }
  func.func @transform_11(%arg0: i32) -> (i32, i32, i32) {
    %c0_i32 = arith.constant 0 : i32
    %c0_i32_0 = arith.constant 0 : i32
    %c0_i32_1 = arith.constant 0 : i32
    %c0_i32_2 = arith.constant 0 : i32
    return %c0_i32, %c0_i32_0, %c0_i32_1 : i32, i32, i32
  }
  func.func @transform_12(%arg0: i32) -> (i32, i32, i32) {
    %c0_i32 = arith.constant 0 : i32
    %c0_i32_0 = arith.constant 0 : i32
    %c0_i32_1 = arith.constant 0 : i32
    %c0_i32_2 = arith.constant 0 : i32
    return %c0_i32, %c0_i32_0, %c0_i32_1 : i32, i32, i32
  }
  func.func @transform_13(%arg0: i32) -> (i32, i32, i32) {
    %c0_i32 = arith.constant 0 : i32
    %c0_i32_0 = arith.constant 0 : i32
    %c0_i32_1 = arith.constant 0 : i32
    %c0_i32_2 = arith.constant 0 : i32
    return %c0_i32, %c0_i32_0, %c0_i32_1 : i32, i32, i32
  }
  func.func @transform_14(%arg0: i32) -> (i32, i32, i32) {
    %c0_i32 = arith.constant 0 : i32
    %c0_i32_0 = arith.constant 0 : i32
    %c0_i32_1 = arith.constant 0 : i32
    %c0_i32_2 = arith.constant 0 : i32
    return %c0_i32, %c0_i32_0, %c0_i32_1 : i32, i32, i32
  }
  func.func @transform_15(%arg0: i32) -> (i32, i32) {
    %c0_i32 = arith.constant 0 : i32
    %c0_i32_0 = arith.constant 0 : i32
    %c0_i32_1 = arith.constant 0 : i32
    return %c0_i32, %c0_i32_0 : i32, i32
  }
  func.func @transform_16(%arg0: i32) -> (i32, i32) {
    %c0_i32 = arith.constant 0 : i32
    %c0_i32_0 = arith.constant 0 : i32
    %c0_i32_1 = arith.constant 0 : i32
    return %c0_i32, %c0_i32_0 : i32, i32
  }
  func.func @transform_17(%arg0: i32) -> (i32, i32, i32) {
    %c0_i32 = arith.constant 0 : i32
    %c0_i32_0 = arith.constant 0 : i32
    %c0_i32_1 = arith.constant 0 : i32
    %c0_i32_2 = arith.constant 0 : i32
    return %c0_i32, %c0_i32_0, %c0_i32_1 : i32, i32, i32
  }
}

</mosaic_0001>

<bundles_post_ra>
// kernel: pose_predictor_forward.1
= control target key start
LH: loop header
LB: loop body
LE: loop exit
PB: predicated region body
PF: predicated region fallthrough
CT: control target
= control target key end

     0   :  { %v8173_v0 = vmov 0.0   ;;  %vm76_vm0 = vcmask 1043456   ;;  %vm6419_vm1 = vmmov 0   ;;  %vm72_vm2 = vcmask 195584   ;;  %s6421_s20 = smov 96   ;;  %s6422_s23 = smov 64   ;;  %s8153_s1 = inlined_call_operand.vmem [shape: bf16[24,128], index: 1, kind: input, shape index: {}]   ;;  %s8154_s0 = inlined_call_operand.vmem [shape: f32[2,8,24], index: 0, kind: input, shape index: {}]   ;;  %s8155_s2 = inlined_call_operand.vmem [shape: f32[32,32], index: 2, kind: input, shape index: {}]   ;;  %s8156_s5 = inlined_call_operand.vmem [shape: bf16[2,32,96], index: 5, kind: input, shape index: {}]   ;;  %s8157_s3 = inlined_call_operand.vmem [shape: f32[2,1,32], index: 3, kind: input, shape index: {}]   ;;  %s8158_s4 = inlined_call_operand.vmem [shape: f32[2,1,32], index: 4, kind: input, shape index: {}]   ;;  %s8159_s6 = inlined_call_operand.vmem [shape: f32[2,1,96], index: 6, kind: input, shape index: {}]   ;;  %s8160_s7 = inlined_call_operand.vmem [shape: bf16[2,32,32], index: 7, kind: input, shape index: {}]   ;;  %s8161_s8 = inlined_call_operand.vmem [shape: f32[2,1,32], index: 8, kind: input, shape index: {}]   ;;  %s8162_s11 = inlined_call_operand.vmem [shape: bf16[2,32,128], index: 11, kind: input, shape index: {}]   ;;  %s8163_s9 = inlined_call_operand.vmem [shape: f32[2,1,32], index: 9, kind: input, shape index: {}]   ;;  %s8164_s10 = inlined_call_operand.vmem [shape: f32[2,1,32], index: 10, kind: input, shape index: {}]   ;;  %s8165_s13 = inlined_call_operand.vmem [shape: bf16[2,128,32], index: 13, kind: input, shape index: {}]   ;;  %s8166_s12 = inlined_call_operand.vmem [shape: f32[2,1,128], index: 12, kind: input, shape index: {}]   ;;  %s8167_s14 = inlined_call_operand.vmem [shape: f32[2,1,32], index: 14, kind: input, shape index: {}]   ;;  %s8168_s15 = inlined_call_operand.vmem [shape: bf16[128,24], index: 15, kind: input, shape index: {}]   ;;  %s8169_s16 = inlined_call_operand.vmem [shape: f32[1,24], index: 16, kind: input, shape index: {}]   ;;  %s8170_s17 = inlined_call_operand.vmem [shape: f32[2,8,24], index: 17, kind: output, shape index: {}]  }
   0x1   :  { %8190 = sst [smem:[#allocation2_spill]] %s8153_s1  ;;  %5438 = vmatprep.subr.bf16.mxu0 %v8173_v0  ;;  %5442 = vmatprep.mubr.msk.bf16.mxu0 %vm6419_vm1, %v8173_v0  ;;  %v141_v10 = vld [vmem:[%s8155_s2] sm:$0xff]  ;;  %vm155_vm3 = vcmask 261120   ;;  %v142_v15 = vld [vmem:[%s8155_s2 + $0x8] sm:$0xff]  ;;  %v143_v19 = vld [vmem:[%s8155_s2 + $0x10] sm:$0xff]  ;;  %vm415_vm4 = vcmask 64512  }
   0x2   :  { %8191 = sst [smem:[#allocation3_spill]] %s8154_s0  ;;  %s8192_s26 = sld [smem:[#allocation2_spill]]  ;;  %v144_v21 = vld [vmem:[%s8155_s2 + $0x18] sm:$0xff]  ;;  %vm1922_vm5 = vcmask 130048   ;;  %vm4931_vm6 = vcmask 523264   ;;  %vm4934_vm7 = vcmask 785408  }
   0x3   :  { %s8193_s30 = sld [smem:[#allocation3_spill]]  ;;  %s8175_s0 = smov 32  }
   0x4   :  { %s6423_s28 = smov 88   ;;  %s6424_s29 = smov 120  }
   0x5   :  { %s6425_s2 = smov 56   ;;  %s6426_s1 = smov 80  }
   0x6   :  { %s6427_s18 = smov 112   ;;  %s8188_s19 = smov 48  }
   0x7   :  { %s8180_s21 = smov 72   ;;  %s8178_s22 = smov 104  }
   0x8   :  { %v6026_v1 = vld [vmem:[%s8192_s26] sm:$0xff]   ;;  %v6027_v2 = vld [vmem:[%s8192_s26 + $0x8] ss:$0 sps:$4 sm:$0xff]   ;;  %s8176_s24 = smov 40   ;;  %s8186_s25 = smov 8  }
   0x9   :  { %5439 = vmatpush3.bf16.msra.mxu0 %v6026_v1  ;;  %v57_v3 = vld [vmem:[%s8193_s30] sm:$0xff]  ;;  %v58_v4 = vld [vmem:[%s8193_s30 + $0x8] sm:$0xff]  ;;  %v78_v5 = vsel %vm76_vm0, %v6027_v2, 0  ;;  %s8184_s26 = smov 16  }
   0xa   :  { %5440 = vmatprep.subr.bf16.mxu0 %v8173_v0  ;;  %v59_v6 = vpack.c.bf16 %v58_v4, %v57_v3 }
   0xd   :  { %5441 = vmatpush3.bf16.msra.mxu0 %v78_v5 }
  0x10   :  { %5443 = vmatmul.mubr.msk.bf16.vlgmr.msra.gmra.mrb[0].mxu0 %vm72_vm2, %v59_v6 }
  0xe3   :  { %v114_v7 = vpop.f32.mrb[0].mxu0 }
  0xe4   :  { %135 = vrot.lane.b32.xlu1 %v114_v7, %s8175_s0  ;;  %123 = vrot.lane.b32.xlu0 %v114_v7, %s6421_s20  ;;  %v5444_v8 = vpop.f32.mrb[1].mxu0  ;;  %v6553_v13 = vadd.f32 %v141_v10, %v114_v7 }
  0xe5   :  { %v117_v9 = vpop.f32.mrb[2].mxu0 }
  0xe6   :  { %v5445_v11 = vpop.f32.mrb[3].mxu0  ;;  %v6547_v12 = vadd.f32 %v141_v10, %v117_v9  ;;  %v156_v14 = vsel %vm155_vm3, %v6553_v13, 0.0 }
  0xe8   :  { %129 = vrot.lane.b32.xlu0 %v114_v7, %s6422_s23  ;;  %125 = vrot.lane.b32.xlu1 %v117_v9, %s6421_s20  ;;  %v168_v27 = vsel %vm155_vm3, %v6547_v12, 0.0 }
  0xec   :  { %131 = vrot.lane.b32.xlu0 %v117_v9, %s6422_s23  ;;  %137 = vrot.lane.b32.xlu1 %v117_v9, %s8175_s0 }
 0x10b   :  { %157 = vadd.xlane.f32.xlu0 %v156_v14 }
 0x156   :  { %v136_v16 = vpop.permute.xlu1 %135  ;;  %v124_v17 = vpop.permute.xlu0 %123 }
 0x157   :  { %v6560_v18 = vadd.f32 %v142_v15, %v124_v17  ;;  %v6572_v25 = vadd.f32 %v144_v21, %v136_v16  ;;  %v6028_v16 = vld [vmem:[%s8156_s5] sm:$0xff]   ;;  %v6029_v17 = vld [vmem:[%s8156_s5 + $0x8] sm:$0xff]  }
 0x158   :  { %5446 = vmatprep.subr.bf16.mxu1 %v6028_v16 }
 0x159   :  { %v159_v20 = vsel %vm155_vm3, %v6560_v18, 0.0  ;;  %v165_v31 = vsel %vm155_vm3, %v6572_v25, 0.0  ;;  %5447 = vmatpush3.bf16.msra.mxu1 %v6028_v16 }
 0x15a   :  { %v130_v22 = vpop.permute.xlu0 %129  ;;  %160 = vadd.xlane.f32.xlu1 %v159_v20  ;;  %v126_v24 = vpop.permute.xlu1 %125  ;;  %5448 = vmatprep.subr.bf16.mxu1 %v6029_v17 }
 0x15b   :  { %v6570_v23 = vadd.f32 %v143_v19, %v130_v22  ;;  %v6580_v30 = vadd.f32 %v142_v15, %v126_v24 }
 0x15d   :  { %v162_v26 = vsel %vm155_vm3, %v6570_v23, 0.0  ;;  %v171_v35 = vsel %vm155_vm3, %v6580_v30, 0.0  ;;  %5449 = vmatpush3.bf16.msra.mxu1 %v6029_v17 }
 0x15e   :  { %163 = vadd.xlane.f32.xlu0 %v162_v26  ;;  %v132_v28 = vpop.permute.xlu0 %131  ;;  %169 = vadd.xlane.f32.xlu1 %v168_v27  ;;  %v138_v33 = vpop.permute.xlu1 %137 }
 0x15f   :  { %v6578_v29 = vadd.f32 %v143_v19, %v132_v28  ;;  %v6586_v34 = vadd.f32 %v144_v21, %v138_v33 }
 0x161   :  { %v174_v32 = vsel %vm155_vm3, %v6578_v29, 0.0  ;;  %v177_v36 = vsel %vm155_vm3, %v6586_v34, 0.0 }
 0x162   :  { %166 = vadd.xlane.f32.xlu0 %v165_v31  ;;  %175 = vadd.xlane.f32.xlu1 %v174_v32 }
 0x166   :  { %172 = vadd.xlane.f32.xlu0 %v171_v35 }
 0x16a   :  { %178 = vadd.xlane.f32.xlu0 %v177_v36 }
 0x198   :  { %v158_v37 = vpop.xlane.xlu0 %157 }
 0x199   :  { %v181_v38 = vmul.f32 0.03125, %v158_v37 }
 0x19b   :  { %v6593_v39 = vsub.f32 %v6553_v13, %v181_v38 }
 0x19d   :  { %v197_v40 = vmul.f32 %v6593_v39, %v6593_v39 }
 0x19f   :  { %v205_v41 = vsel %vm155_vm3, %v197_v40, 0.0 }
 0x1a0   :  { %206 = vadd.xlane.f32.xlu1 %v205_v41 }
 0x1e7   :  { %v161_v42 = vpop.xlane.xlu1 %160 }
 0x1e8   :  { %v182_v43 = vmul.f32 0.03125, %v161_v42 }
 0x1ea   :  { %v6599_v44 = vsub.f32 %v6560_v18, %v182_v43 }
 0x1eb   :  { %v164_v45 = vpop.xlane.xlu0 %163  ;;  %v170_v46 = vpop.xlane.xlu1 %169 }
 0x1ec   :  { %v183_v47 = vmul.f32 0.03125, %v164_v45  ;;  %v185_v48 = vmul.f32 0.03125, %v170_v46  ;;  %v198_v49 = vmul.f32 %v6599_v44, %v6599_v44 }
 0x1ee   :  { %v6604_v50 = vsub.f32 %v6570_v23, %v183_v47  ;;  %v6607_v51 = vsub.f32 %v6547_v12, %v185_v48  ;;  %v208_v52 = vsel %vm155_vm3, %v198_v49, 0.0  ;;  %v5061_v47 = vld [vmem:[%s8157_s3] ss:$0 sm:$0xff] }
 0x1ef   :  { %v167_v53 = vpop.xlane.xlu0 %166  ;;  %209 = vadd.xlane.f32.xlu0 %v208_v52  ;;  %v176_v54 = vpop.xlane.xlu1 %175 }
 0x1f0   :  { %v184_v55 = vmul.f32 0.03125, %v167_v53  ;;  %v187_v56 = vmul.f32 0.03125, %v176_v54  ;;  %v199_v57 = vmul.f32 %v6604_v50, %v6604_v50  ;;  %v201_v61 = vmul.f32 %v6607_v51, %v6607_v51 }
 0x1f2   :  { %v6613_v58 = vsub.f32 %v6572_v25, %v184_v55  ;;  %v6616_v59 = vsub.f32 %v6578_v29, %v187_v56  ;;  %v211_v60 = vsel %vm155_vm3, %v199_v57, 0.0  ;;  %v217_v4 = vsel %vm155_vm3, %v201_v61, 0.0 }
 0x1f3   :  { %v173_v62 = vpop.xlane.xlu0 %172  ;;  %212 = vadd.xlane.f32.xlu1 %v211_v60 }
 0x1f4   :  { %v186_v63 = vmul.f32 0.03125, %v173_v62  ;;  %v200_v1 = vmul.f32 %v6613_v58, %v6613_v58  ;;  %v203_v5 = vmul.f32 %v6616_v59, %v6616_v59 }
 0x1f6   :  { %v6624_v2 = vsub.f32 %v6580_v30, %v186_v63  ;;  %v214_v3 = vsel %vm155_vm3, %v200_v1, 0.0  ;;  %v223_v11 = vsel %vm155_vm3, %v203_v5, 0.0 }
 0x1f7   :  { %v179_v6 = vpop.xlane.xlu0 %178  ;;  %215 = vadd.xlane.f32.xlu0 %v214_v3  ;;  %218 = vadd.xlane.f32.xlu1 %v217_v4 }
 0x1f8   :  { %v188_v7 = vmul.f32 0.03125, %v179_v6  ;;  %v202_v8 = vmul.f32 %v6624_v2, %v6624_v2 }
 0x1fa   :  { %v6633_v9 = vsub.f32 %v6586_v34, %v188_v7  ;;  %v220_v10 = vsel %vm155_vm3, %v202_v8, 0.0 }
 0x1fb   :  { %221 = vadd.xlane.f32.xlu0 %v220_v10  ;;  %224 = vadd.xlane.f32.xlu1 %v223_v11 }
 0x1fc   :  { %v204_v14 = vmul.f32 %v6633_v9, %v6633_v9 }
 0x1fe   :  { %v226_v15 = vsel %vm155_vm3, %v204_v14, 0.0 }
 0x1ff   :  { %227 = vadd.xlane.f32.xlu0 %v226_v15 }
 0x22d   :  { %v207_v19 = vpop.xlane.xlu1 %206 }
 0x22e   :  { %v229_v20 = vmul.f32 0.03125, %v207_v19 }
 0x230   :  { %v237_v21 = vadd.f32 1e-05, %v229_v20 }
 0x232   :  { %6064 = vrsqrt.f32 %v237_v21 }
 0x23c   :  { %v6065_v35 = vpop.eup %6064 }
 0x23d   :  { %v253_v43 = vmul.f32 %v6065_v35, %v6593_v39  ;;  %v5062_v39 = vld [vmem:[%s8158_s4] ss:$0 sm:$0xff] }
 0x23f   :  { %v267_v55 = vmul.f32 %v5061_v47, %v253_v43 }
 0x241   :  { %v281_v62 = vadd.f32 %v5062_v39, %v267_v55 }
 0x27c   :  { %v210_v22 = vpop.xlane.xlu0 %209 }
 0x27d   :  { %v230_v24 = vmul.f32 0.03125, %v210_v22 }
 0x27f   :  { %v238_v26 = vadd.f32 1e-05, %v230_v24 }
 0x280   :  { %v213_v27 = vpop.xlane.xlu1 %212 }
 0x281   :  { %6066 = vrsqrt.f32 %v238_v26  ;;  %v231_v28 = vmul.f32 0.03125, %v213_v27 }
 0x283   :  { %v239_v31 = vadd.f32 1e-05, %v231_v28 }
 0x284   :  { %v216_v32 = vpop.xlane.xlu0 %215  ;;  %v219_v33 = vpop.xlane.xlu1 %218 }
 0x285   :  { %6068 = vrsqrt.f32 %v239_v31  ;;  %v232_v36 = vmul.f32 0.03125, %v216_v32  ;;  %v233_v37 = vmul.f32 0.03125, %v219_v33 }
 0x287   :  { %v240_v38 = vadd.f32 1e-05, %v232_v36  ;;  %v241_v40 = vadd.f32 1e-05, %v233_v37 }
 0x288   :  { %v222_v41 = vpop.xlane.xlu0 %221  ;;  %v225_v42 = vpop.xlane.xlu1 %224 }
 0x289   :  { %6070 = vrsqrt.f32 %v240_v38  ;;  %v234_v45 = vmul.f32 0.03125, %v222_v41  ;;  %v235_v46 = vmul.f32 0.03125, %v225_v42 }
 0x28a   :  { %6072 = vrsqrt.f32 %v241_v40 }
 0x28b   :  { %v6067_v48 = vpop.eup %6066  ;;  %v242_v49 = vadd.f32 1e-05, %v234_v45  ;;  %v243_v52 = vadd.f32 1e-05, %v235_v46 }
 0x28c   :  { %v228_v53 = vpop.xlane.xlu0 %227  ;;  %v254_v54 = vmul.f32 %v6067_v48, %v6599_v44 }
 0x28d   :  { %6074 = vrsqrt.f32 %v242_v49  ;;  %v236_v56 = vmul.f32 0.03125, %v228_v53 }
 0x28e   :  { %6076 = vrsqrt.f32 %v243_v52  ;;  %v268_v57 = vmul.f32 %v5061_v47, %v254_v54 }
 0x28f   :  { %v6069_v60 = vpop.eup %6068  ;;  %v244_v61 = vadd.f32 1e-05, %v236_v56 }
 0x290   :  { %v282_v63 = vadd.f32 %v5062_v39, %v268_v57  ;;  %v255_v1 = vmul.f32 %v6069_v60, %v6604_v50 }
 0x291   :  { %6078 = vrsqrt.f32 %v244_v61 }
 0x292   :  { %v289_v3 = vpack.c.bf16 %v282_v63, %v281_v62  ;;  %v269_v6 = vmul.f32 %v5061_v47, %v255_v1 }
 0x293   :  { %v6071_v4 = vpop.eup %6070 }
 0x294   :  { %v6073_v5 = vpop.eup %6072  ;;  %5450 = vmatprep.mubr.msk.bf16.mxu1 %vm155_vm3, %v289_v3  ;;  %v256_v44 = vmul.f32 %v6071_v4, %v6613_v58  ;;  %v283_v14 = vadd.f32 %v5062_v39, %v269_v6 }
 0x295   :  { %v257_v7 = vmul.f32 %v6073_v5, %v6607_v51 }
 0x296   :  { %v270_v8 = vmul.f32 %v5061_v47, %v256_v44 }
 0x297   :  { %v6075_v10 = vpop.eup %6074  ;;  %v271_v17 = vmul.f32 %v5061_v47, %v257_v7 }
 0x298   :  { %v6077_v11 = vpop.eup %6076  ;;  %v284_v15 = vadd.f32 %v5062_v39, %v270_v8  ;;  %v258_v16 = vmul.f32 %v6075_v10, %v6624_v2 }
 0x299   :  { %v259_v50 = vmul.f32 %v6077_v11, %v6616_v59  ;;  %v285_v22 = vadd.f32 %v5062_v39, %v271_v17  ;;  %v5063_v59 = vld [vmem:[%s8159_s6] ss:$0 sm:$0xff] }
 0x29a   :  { %v290_v19 = vpack.c.bf16 %v284_v15, %v283_v14  ;;  %v272_v20 = vmul.f32 %v5061_v47, %v258_v16 }
 0x29b   :  { %v6079_v21 = vpop.eup %6078  ;;  %v273_v51 = vmul.f32 %v5061_v47, %v259_v50 }
 0x29c   :  { %5451 = vmatmul.mubr.msk.bf16.vlgmr.msra.gmra.mrb[0].mxu1 %vm155_vm3, %v290_v19  ;;  %v286_v58 = vadd.f32 %v5062_v39, %v272_v20  ;;  %v260_v24 = vmul.f32 %v6079_v21, %v6633_v9 }
 0x29d   :  { %v287_v28 = vadd.f32 %v5062_v39, %v273_v51 }
 0x29e   :  { %v291_v26 = vpack.c.bf16 %v286_v58, %v285_v22  ;;  %v274_v27 = vmul.f32 %v5061_v47, %v260_v24 }
 0x2a0   :  { %5454 = vmatprep.mubr.msk.bf16.mxu1 %vm155_vm3, %v291_v26  ;;  %v288_v31 = vadd.f32 %v5062_v39, %v274_v27 }
 0x2a2   :  { %v292_v2 = vpack.c.bf16 %v288_v31, %v287_v28 }
 0x2a4   :  { %5455 = vmatmul.mubr.msk.bf16.gmra.mrb[4].mxu1 %vm155_vm3, %v292_v2 }
 0x36f   :  { %v5452_v32 = vpop.f32.mrb[0].mxu1 }
 0x370   :  { %v371_v33 = vadd.f32 %v5452_v32, %v5063_v59  ;;  %v362_v35 = vpop.f32.mrb[1].mxu1 }
 0x371   :  { %v363_v36 = vadd.f32 %v5063_v59, %v362_v35  ;;  %v5453_v37 = vpop.f32.mrb[2].mxu1 }
 0x372   :  { %v374_v9 = vadd.f32 %v5453_v37, %v5063_v59  ;;  %v365_v38 = vpop.f32.mrb[3].mxu1  ;;  %v395_v41 = vmul.f32 0.35355338, %v371_v33 }
 0x373   :  { %v366_v40 = vadd.f32 %v5063_v59, %v365_v38  ;;  %v393_v45 = vmul.f32 0.35355338, %v363_v36 }
 0x374   :  { %v396_v42 = vmul.f32 0.35355338, %v374_v9  ;;  %v6667_v43 = vpack.c.bf16 %v374_v9, %v371_v33 }
 0x375   :  { %v394_v46 = vmul.f32 0.35355338, %v366_v40  ;;  %v6669_v47 = vpack.c.bf16 %v366_v40, %v363_v36 }
 0x376   :  { %v6671_v48 = vpack.c.bf16 %v396_v42, %v395_v41  ;;  %413 = vrot.lane.b32.xlu0 %v6667_v43, %s6421_s20 }
 0x377   :  { %v6675_v49 = vpack.c.bf16 %v394_v46, %v393_v45  ;;  %411 = vrot.lane.b32.xlu1 %v6669_v47, %s6421_s20  ;;  %v5456_v52 = vpop.f32.mrb[4].mxu1 }
 0x378   :  { %v387_v53 = vadd.f32 %v5456_v52, %v5063_v59  ;;  %v378_v54 = vpop.f32.mrb[5].mxu1 }
 0x379   :  { %v379_v55 = vadd.f32 %v5063_v59, %v378_v54  ;;  %v5457_v56 = vpop.f32.mrb[6].mxu1  ;;  %5462 = vmatprep.mubr.msk.bf16.mxu0 %vm415_vm4, %v6675_v49 }
 0x37a   :  { %v390_v39 = vadd.f32 %v5457_v56, %v5063_v59  ;;  %v381_v57 = vpop.f32.mrb[7].mxu1  ;;  %v399_v61 = vmul.f32 0.35355338, %v387_v53 }
 0x37b   :  { %v382_v60 = vadd.f32 %v5063_v59, %v381_v57  ;;  %v397_v1 = vmul.f32 0.35355338, %v379_v55 }
 0x37c   :  { %v400_v62 = vmul.f32 0.35355338, %v390_v39  ;;  %v6681_v63 = vpack.c.bf16 %v390_v39, %v387_v53 }
 0x37d   :  { %v398_v3 = vmul.f32 0.35355338, %v382_v60  ;;  %v6683_v4 = vpack.c.bf16 %v382_v60, %v379_v55 }
 0x37e   :  { %v6685_v5 = vpack.c.bf16 %v400_v62, %v399_v61 }
 0x37f   :  { %v6687_v44 = vpack.c.bf16 %v398_v3, %v397_v1  ;;  %479 = vrot.lane.b32.xlu1 %v6683_v4, %s6421_s20 }
 0x381   :  { %5470 = vmatprep.mubr.msk.bf16.mxu1 %vm415_vm4, %v6687_v44 }
 0x383   :  { %481 = vrot.lane.b32.xlu1 %v6681_v63, %s6421_s20 }
 0x387   :  { %636 = vrot.lane.b32.xlu1 %v6669_v47, %s6422_s23 }
 0x3e8   :  { %v414_v8 = vpop.permute.xlu0 %413 }
 0x3e9   :  { %v412_v6 = vpop.permute.xlu1 %411  ;;  %v426_v11 = vsel %vm415_vm4, %v414_v8, 0 }
 0x3ea   :  { %5842 = vmatprep.subr.msk.bf16.mxu0 %vm415_vm4, %v412_v6  ;;  %v423_v7 = vsel %vm415_vm4, %v412_v6, 0 }
 0x3eb   :  { %5459 = vmatpush3.bf16.xpose.msra.mxu0 %v423_v7 }
 0x3ec   :  { %5843 = vmatprep.subr.msk.bf16.mxu0 %vm415_vm4, %v414_v8 }
 0x3f1   :  { %v480_v10 = vpop.permute.xlu1 %479 }
 0x3f2   :  { %5844 = vmatprep.subr.msk.bf16.mxu1 %vm415_vm4, %v480_v10  ;;  %v490_v14 = vsel %vm415_vm4, %v480_v10, 0 }
 0x3f3   :  { %5461 = vmatpush3.bf16.xpose.msra.mxu0 %v426_v11  ;;  %5467 = vmatpush3.bf16.xpose.msra.mxu1 %v490_v14 }
 0x3f5   :  { %v482_v15 = vpop.permute.xlu1 %481 }
 0x3f6   :  { %5845 = vmatprep.subr.msk.bf16.mxu1 %vm415_vm4, %v482_v15  ;;  %v493_v17 = vsel %vm415_vm4, %v482_v15, 0 }
 0x3f9   :  { %v637_v16 = vpop.permute.xlu1 %636 }
 0x3fa   :  { %5463 = vmatmul.mubr.msk.bf16.vlgmr.msra.gmra.mrb[4].mxu0 %vm415_vm4, %v6671_v48  ;;  %5474 = vmatprep.subr.bf16.mxu0 %v637_v16 }
 0x3fb   :  { %5469 = vmatpush3.bf16.xpose.msra.mxu1 %v493_v17  ;;  %5475 = vmatpush3.bf16.msra.mxu0 %v637_v16 }
 0x402   :  { %5471 = vmatmul.mubr.msk.bf16.vlgmr.msra.gmra.mrb[8].mxu1 %vm415_vm4, %v6685_v5 }
 0x4cd   :  { %v5464_v50 = vpop.f32.mrb[4].mxu0 }
 0x4ce   :  { %v462_v19 = vpop.f32.mrb[5].mxu0  ;;  %v550_v20 = vsel %vm155_vm3, %v5464_v50, -inf }
 0x4cf   :  { %551 = vmax.xlane.f32.xlu0 %v550_v20  ;;  %v5465_v21 = vpop.f32.mrb[6].mxu0  ;;  %v544_v24 = vsel %vm155_vm3, %v462_v19, -inf }
 0x4d0   :  { %v465_v22 = vpop.f32.mrb[7].mxu0  ;;  %v553_v27 = vsel %vm155_vm3, %v5465_v21, -inf }
 0x4d1   :  { %v547_v58 = vsel %vm155_vm3, %v465_v22, -inf }
 0x4d2   :  { %548 = vmax.xlane.f32.xlu1 %v547_v58 }
 0x4d3   :  { %545 = vmax.xlane.f32.xlu0 %v544_v24 }
 0x4d5   :  { %v5472_v51 = vpop.f32.mrb[8].mxu1 }
 0x4d6   :  { %v6712_v26 = vpop.f32.mrb[9].mxu1  ;;  %v562_v28 = vsel %vm155_vm3, %v5472_v51, -inf }
 0x4d7   :  { %v5473_v31 = vpop.f32.mrb[10].mxu1  ;;  %554 = vmax.xlane.f32.xlu0 %v553_v27  ;;  %563 = vmax.xlane.f32.xlu1 %v562_v28  ;;  %v556_v32 = vsel %vm155_vm3, %v6712_v26, -inf }
 0x4d8   :  { %v6716_v2 = vpop.f32.mrb[11].mxu1  ;;  %v565_v59 = vsel %vm155_vm3, %v5473_v31, -inf }
 0x4d9   :  { %v559_v33 = vsel %vm155_vm3, %v6716_v2, -inf }
 0x4db   :  { %566 = vmax.xlane.f32.xlu0 %v565_v59  ;;  %557 = vmax.xlane.f32.xlu1 %v556_v32 }
 0x4df   :  { %560 = vmax.xlane.f32.xlu0 %v559_v33 }
 0x4ec   :  { %697 = vrot.lane.b32.xlu1 %v6683_v4, %s6422_s23 }
 0x4f0   :  { %764 = vrot.lane.b32.xlu1 %v6669_v47, %s6423_s28 }
 0x4f5   :  { %638 = vrot.lane.b32.xlu0 %v6667_v43, %s6422_s23 }
 0x55c   :  { %v552_v35 = vpop.xlane.xlu0 %551 }
 0x55d   :  { %v570_v36 = vsub.f32 %v5464_v50, %v552_v35 }
 0x55f   :  { %v580_v37 = vmul.f32 1.442695, %v570_v36  ;;  %v549_v9 = vpop.xlane.xlu1 %548 }
 0x560   :  { %v546_v38 = vpop.xlane.xlu0 %545  ;;  %v569_v41 = vsub.f32 %v465_v22, %v549_v9 }
 0x561   :  { %6080 = vpow2.f32 %v580_v37  ;;  %v568_v40 = vsub.f32 %v462_v19, %v546_v38 }
 0x562   :  { %v578_v53 = vmul.f32 1.442695, %v569_v41 }
 0x563   :  { %v576_v42 = vmul.f32 1.442695, %v568_v40 }
 0x564   :  { %v555_v45 = vpop.xlane.xlu0 %554  ;;  %v564_v46 = vpop.xlane.xlu1 %563 }
 0x565   :  { %6082 = vpow2.f32 %v576_v42  ;;  %v571_v52 = vsub.f32 %v5465_v21, %v555_v45  ;;  %v574_v14 = vsub.f32 %v5472_v51, %v564_v46 }
 0x567   :  { %v582_v54 = vmul.f32 1.442695, %v571_v52  ;;  %v588_v15 = vmul.f32 1.442695, %v574_v14 }
 0x568   :  { %v567_v55 = vpop.xlane.xlu0 %566  ;;  %v558_v56 = vpop.xlane.xlu1 %557 }
 0x569   :  { %6084 = vpow2.f32 %v582_v54  ;;  %v572_v16 = vsub.f32 %v6712_v26, %v558_v56  ;;  %v575_v17 = vsub.f32 %v5473_v31, %v567_v55 }
 0x56a   :  { %6086 = vpow2.f32 %v578_v53 }
 0x56b   :  { %v6729_v39 = vpop.eup %6080  ;;  %6088 = vpow2.f32 %v588_v15  ;;  %v584_v50 = vmul.f32 1.442695, %v572_v16  ;;  %v590_v19 = vmul.f32 1.442695, %v575_v17 }
 0x56c   :  { %v561_v57 = vpop.xlane.xlu0 %560  ;;  %v698_v60 = vpop.permute.xlu1 %697  ;;  %v598_v61 = vsel %vm155_vm3, %v6729_v39, 0.0 }
 0x56d   :  { %599 = vadd.xlane.f32.xlu1 %v598_v61  ;;  %5482 = vmatprep.subr.bf16.mxu1 %v698_v60  ;;  %6090 = vpow2.f32 %v584_v50  ;;  %v573_v20 = vsub.f32 %v6716_v2, %v561_v57 }
 0x56e   :  { %5483 = vmatpush3.bf16.msra.mxu1 %v698_v60  ;;  %6092 = vpow2.f32 %v590_v19 }
 0x56f   :  { %v6733_v62 = vpop.eup %6082  ;;  %v586_v21 = vmul.f32 1.442695, %v573_v20 }
 0x570   :  { %v639_v1 = vpop.permute.xlu0 %638  ;;  %v592_v3 = vsel %vm155_vm3, %v6733_v62, 0.0  ;;  %v6737_v6 = vpop.permute.xlu1 %764 }
 0x571   :  { %5476 = vmatprep.subr.bf16.mxu0 %v639_v1  ;;  %593 = vadd.xlane.f32.xlu1 %v592_v3  ;;  %6094 = vpow2.f32 %v586_v21  ;;  %v775_v53 = vsel %vm415_vm4, %v6737_v6, 0 }
 0x572   :  { %5477 = vmatpush3.bf16.msra.mxu0 %v639_v1 }
 0x573   :  { %v6085_v7 = vpop.eup %6084  ;;  %5846 = vmatprep.subr.msk.bf16.mxu0 %vm415_vm4, %v6737_v6 }
 0x574   :  { %v601_v8 = vsel %vm155_vm3, %v6085_v7, 0.0  ;;  %v6087_v10 = vpop.eup %6086 }
 0x575   :  { %602 = vadd.xlane.f32.xlu0 %v601_v8  ;;  %v595_v11 = vsel %vm155_vm3, %v6087_v10, 0.0  ;;  %v6749_v22 = vpop.eup %6088 }
 0x576   :  { %v610_v58 = vsel %vm155_vm3, %v6749_v22, 0.0 }
 0x577   :  { %v6753_v24 = vpop.eup %6090 }
 0x578   :  { %v604_v51 = vsel %vm155_vm3, %v6753_v24, 0.0  ;;  %v6757_v26 = vpop.eup %6092 }
 0x579   :  { %596 = vadd.xlane.f32.xlu0 %v595_v11  ;;  %v613_v27 = vsel %vm155_vm3, %v6757_v26, 0.0 }
 0x57b   :  { %v6761_v28 = vpop.eup %6094 }
 0x57c   :  { %v607_v31 = vsel %vm155_vm3, %v6761_v28, 0.0 }
 0x582   :  { %766 = vrot.lane.b32.xlu1 %v6667_v43, %s6423_s28 }
 0x58f   :  { %699 = vrot.lane.b32.xlu0 %v6681_v63, %s6422_s23 }
 0x5a6   :  { %611 = vadd.xlane.f32.xlu1 %v610_v58 }
 0x5aa   :  { %605 = vadd.xlane.f32.xlu1 %v604_v51 }
 0x5ae   :  { %614 = vadd.xlane.f32.xlu0 %v613_v27 }
 0x5b2   :  { %608 = vadd.xlane.f32.xlu0 %v607_v31 }
 0x5bb   :  { %760 = vrot.lane.b32.xlu1 %v6675_v49, %s6424_s29 }
 0x5bf   :  { %837 = vrot.lane.b32.xlu1 %v6681_v63, %s6423_s28 }
 0x5c3   :  { %833 = vrot.lane.b32.xlu1 %v6685_v5, %s6424_s29 }
 0x5c7   :  { %992 = vrot.lane.b32.xlu1 %v6669_v47, %s6425_s2 }
 0x5c8   :  { %835 = vrot.lane.b32.xlu0 %v6683_v4, %s6423_s28 }
 0x5cc   :  { %762 = vrot.lane.b32.xlu0 %v6671_v48, %s6424_s29 }
 0x5d0   :  { %831 = vrot.lane.b32.xlu0 %v6687_v44, %s6424_s29 }
 0x5fa   :  { %v600_v2 = vpop.xlane.xlu1 %599 }
 0x5fe   :  { %v594_v59 = vpop.xlane.xlu1 %593 }
 0x602   :  { %v603_v32 = vpop.xlane.xlu0 %602  ;;  %v767_v54 = vpop.permute.xlu1 %766 }
 0x603   :  { %6096 = vrcp.f32 %v603_v32  ;;  %v778_v55 = vsel %vm415_vm4, %v767_v54, 0 }
 0x604   :  { %6098 = vrcp.f32 %v594_v59 }
 0x605   :  { %6100 = vrcp.f32 %v600_v2 }
 0x606   :  { %v597_v33 = vpop.xlane.xlu0 %596 }
 0x607   :  { %6102 = vrcp.f32 %v597_v33 }
 0x60a   :  { %v700_v35 = vpop.permute.xlu0 %699 }
 0x60b   :  { %5484 = vmatprep.subr.bf16.mxu1 %v700_v35 }
 0x60c   :  { %5485 = vmatpush3.bf16.msra.mxu1 %v700_v35 }
 0x60d   :  { %v6097_v36 = vpop.eup %6096 }
 0x60e   :  { %v6099_v37 = vpop.eup %6098  ;;  %v623_v40 = vmul.f32 %v6097_v36, %v6085_v7 }
 0x60f   :  { %v6101_v9 = vpop.eup %6100  ;;  %v617_v41 = vmul.f32 %v6099_v37, %v6733_v62 }
 0x610   :  { %v621_v45 = vmul.f32 %v6101_v9, %v6729_v39 }
 0x611   :  { %v6103_v38 = vpop.eup %6102 }
 0x612   :  { %v619_v42 = vmul.f32 %v6103_v38, %v6087_v10  ;;  %v633_v52 = vpack.c.bf16 %v623_v40, %v621_v45 }
 0x614   :  { %v632_v46 = vpack.c.bf16 %v619_v42, %v617_v41 }
 0x616   :  { %5478 = vmatprep.mubr.msk.bf16.mxu0 %vm155_vm3, %v632_v46 }
 0x617   :  { %5479 = vmatmul.mubr.msk.bf16.vlgmr.msra.gmra.mrb[8].mxu0 %vm155_vm3, %v633_v52 }
 0x618   :  { %5491 = vmatpush3.bf16.xpose.msra.mxu0 %v775_v53 }
 0x619   :  { %5847 = vmatprep.subr.msk.bf16.mxu0 %vm415_vm4, %v767_v54 }
 0x620   :  { %5493 = vmatpush3.bf16.xpose.msra.mxu0 %v778_v55 }
 0x633   :  { %v612_v56 = vpop.xlane.xlu1 %611 }
 0x637   :  { %v606_v57 = vpop.xlane.xlu1 %605 }
 0x63b   :  { %v615_v60 = vpop.xlane.xlu0 %614  ;;  %v761_v39 = vpop.permute.xlu1 %760 }
 0x63c   :  { %5494 = vmatprep.mubr.msk.bf16.mxu0 %vm415_vm4, %v761_v39  ;;  %6104 = vrcp.f32 %v615_v60 }
 0x63d   :  { %6106 = vrcp.f32 %v606_v57 }
 0x63e   :  { %6108 = vrcp.f32 %v612_v56 }
 0x63f   :  { %v609_v61 = vpop.xlane.xlu0 %608  ;;  %v838_v62 = vpop.permute.xlu1 %837 }
 0x640   :  { %6110 = vrcp.f32 %v609_v61 }
 0x643   :  { %v836_v1 = vpop.permute.xlu0 %835  ;;  %v834_v3 = vpop.permute.xlu1 %833 }
 0x644   :  { %5848 = vmatprep.subr.msk.bf16.mxu1 %vm415_vm4, %v836_v1  ;;  %v846_v58 = vsel %vm415_vm4, %v836_v1, 0 }
 0x646   :  { %v6105_v6 = vpop.eup %6104 }
 0x647   :  { %v763_v7 = vpop.permute.xlu0 %762  ;;  %v993_v8 = vpop.permute.xlu1 %992  ;;  %v631_v15 = vmul.f32 %v6105_v6, %v6757_v26 }
 0x648   :  { %v6107_v10 = vpop.eup %6106  ;;  %5495 = vmatmul.mubr.msk.bf16.vlgmr.msra.gmra.mrb[12].mxu0 %vm415_vm4, %v763_v7  ;;  %5506 = vmatprep.subr.bf16.mxu0 %v993_v8 }
 0x649   :  { %v6109_v11 = vpop.eup %6108  ;;  %5507 = vmatpush3.bf16.msra.mxu0 %v993_v8  ;;  %v625_v16 = vmul.f32 %v6107_v10, %v6753_v24  ;;  %v849_v24 = vsel %vm415_vm4, %v838_v62, 0 }
 0x64a   :  { %v6111_v14 = vpop.eup %6110  ;;  %v629_v50 = vmul.f32 %v6109_v11, %v6749_v22 }
 0x64b   :  { %v627_v17 = vmul.f32 %v6111_v14, %v6761_v28  ;;  %v832_v21 = vpop.permute.xlu0 %831 }
 0x64c   :  { %v635_v20 = vpack.c.bf16 %v631_v15, %v629_v50 }
 0x64d   :  { %v634_v19 = vpack.c.bf16 %v627_v17, %v625_v16 }
 0x64f   :  { %5486 = vmatprep.mubr.msk.bf16.mxu1 %vm155_vm3, %v634_v19 }
 0x650   :  { %5487 = vmatmul.mubr.msk.bf16.vlgmr.msra.gmra.mrb[12].mxu1 %vm155_vm3, %v635_v20 }
 0x651   :  { %5499 = vmatpush3.bf16.xpose.msra.mxu1 %v846_v58  ;;  %5502 = vmatprep.mubr.msk.bf16.mxu1 %vm415_vm4, %v832_v21 }
 0x652   :  { %5849 = vmatprep.subr.msk.bf16.mxu1 %vm415_vm4, %v838_v62 }
 0x659   :  { %5501 = vmatpush3.bf16.xpose.msra.mxu1 %v849_v24 }
 0x660   :  { %5503 = vmatmul.mubr.msk.bf16.vlgmr.msra.gmra.mrb[16].mxu1 %vm415_vm4, %v834_v3 }
 0x6ea   :  { %v6801_v22 = vpop.f32.mrb[8].mxu0 }
 0x6eb   :  { %v6803_v51 = vpop.f32.mrb[9].mxu0 }
 0x6ec   :  { %v6805_v26 = vpop.f32.mrb[10].mxu0 }
 0x6ed   :  { %v6807_v27 = vpop.f32.mrb[11].mxu0 }
 0x71b   :  { %v5496_v28 = vpop.f32.mrb[12].mxu0 }
 0x71c   :  { %v814_v31 = vpop.f32.mrb[13].mxu0  ;;  %v906_v2 = vsel %vm155_vm3, %v5496_v28, -inf }
 0x71d   :  { %907 = vmax.xlane.f32.xlu0 %v906_v2  ;;  %v5497_v59 = vpop.f32.mrb[14].mxu0  ;;  %v900_v35 = vsel %vm155_vm3, %v814_v31, -inf }
 0x71e   :  { %v817_v32 = vpop.f32.mrb[15].mxu0  ;;  %v909_v9 = vsel %vm155_vm3, %v5497_v59, -inf }
 0x71f   :  { %v903_v33 = vsel %vm155_vm3, %v817_v32, -inf }
 0x720   :  { %904 = vmax.xlane.f32.xlu1 %v903_v33 }
 0x721   :  { %901 = vmax.xlane.f32.xlu0 %v900_v35 }
 0x723   :  { %v6812_v36 = vpop.f32.mrb[12].mxu1 }
 0x724   :  { %v6814_v37 = vpop.f32.mrb[13].mxu1 }
 0x725   :  { %v6817_v38 = vpop.f32.mrb[14].mxu1  ;;  %910 = vmax.xlane.f32.xlu0 %v909_v9 }
 0x726   :  { %v6819_v40 = vpop.f32.mrb[15].mxu1 }
 0x733   :  { %v5504_v41 = vpop.f32.mrb[16].mxu1 }
 0x734   :  { %v885_v42 = vpop.f32.mrb[17].mxu1  ;;  %v918_v45 = vsel %vm155_vm3, %v5504_v41, -inf }
 0x735   :  { %919 = vmax.xlane.f32.xlu1 %v918_v45  ;;  %v5505_v46 = vpop.f32.mrb[18].mxu1  ;;  %v912_v54 = vsel %vm155_vm3, %v885_v42, -inf }
 0x736   :  { %v6822_v52 = vpop.f32.mrb[19].mxu1  ;;  %v921_v53 = vsel %vm155_vm3, %v5505_v46, -inf }
 0x737   :  { %922 = vmax.xlane.f32.xlu0 %v921_v53  ;;  %v915_v55 = vsel %vm155_vm3, %v6822_v52, -inf }
 0x739   :  { %913 = vmax.xlane.f32.xlu1 %v912_v54 }
 0x73b   :  { %916 = vmax.xlane.f32.xlu0 %v915_v55 }
 0x74a   :  { %1053 = vrot.lane.b32.xlu1 %v6683_v4, %s6425_s2 }
 0x74e   :  { %1118 = vrot.lane.b32.xlu1 %v6669_v47, %s6426_s1 }
 0x751   :  { %994 = vrot.lane.b32.xlu0 %v6667_v43, %s6425_s2 }
 0x7aa   :  { %v908_v56 = vpop.xlane.xlu0 %907 }
 0x7ab   :  { %v926_v57 = vsub.f32 %v5496_v28, %v908_v56 }
 0x7ad   :  { %v936_v60 = vmul.f32 1.442695, %v926_v57  ;;  %v905_v39 = vpop.xlane.xlu1 %904 }
 0x7ae   :  { %v902_v61 = vpop.xlane.xlu0 %901  ;;  %v925_v1 = vsub.f32 %v817_v32, %v905_v39 }
 0x7af   :  { %6112 = vpow2.f32 %v936_v60  ;;  %v924_v62 = vsub.f32 %v814_v31, %v902_v61 }
 0x7b0   :  { %v934_v8 = vmul.f32 1.442695, %v925_v1 }
 0x7b1   :  { %v932_v3 = vmul.f32 1.442695, %v924_v62 }
 0x7b2   :  { %v911_v6 = vpop.xlane.xlu0 %910 }
 0x7b3   :  { %6114 = vpow2.f32 %v932_v3  ;;  %v927_v7 = vsub.f32 %v5497_v59, %v911_v6 }
 0x7b5   :  { %v938_v10 = vmul.f32 1.442695, %v927_v7 }
 0x7b7   :  { %6116 = vpow2.f32 %v938_v10 }
 0x7b8   :  { %6118 = vpow2.f32 %v934_v8 }
 0x7b9   :  { %v6834_v11 = vpop.eup %6112 }
 0x7ba   :  { %v954_v14 = vsel %vm155_vm3, %v6834_v11, 0.0 }
 0x7bb   :  { %955 = vadd.xlane.f32.xlu1 %v954_v14 }
 0x7bd   :  { %v6838_v15 = vpop.eup %6114 }
 0x7be   :  { %v948_v16 = vsel %vm155_vm3, %v6838_v15, 0.0 }
 0x7bf   :  { %949 = vadd.xlane.f32.xlu1 %v948_v16 }
 0x7c1   :  { %v6842_v17 = vpop.eup %6116 }
 0x7c2   :  { %v920_v50 = vpop.xlane.xlu1 %919  ;;  %v957_v19 = vsel %vm155_vm3, %v6842_v17, 0.0  ;;  %v6846_v20 = vpop.eup %6118 }
 0x7c3   :  { %958 = vadd.xlane.f32.xlu0 %v957_v19  ;;  %v951_v24 = vsel %vm155_vm3, %v6846_v20, 0.0  ;;  %v930_v32 = vsub.f32 %v5504_v41, %v920_v50 }
 0x7c4   :  { %v923_v21 = vpop.xlane.xlu0 %922 }
 0x7c5   :  { %v944_v33 = vmul.f32 1.442695, %v930_v32  ;;  %v931_v9 = vsub.f32 %v5505_v46, %v923_v21 }
 0x7c6   :  { %v914_v58 = vpop.xlane.xlu1 %913 }
 0x7c7   :  { %952 = vadd.xlane.f32.xlu0 %v951_v24  ;;  %v928_v35 = vsub.f32 %v885_v42, %v914_v58  ;;  %6120 = vpow2.f32 %v944_v33  ;;  %v946_v53 = vmul.f32 1.442695, %v931_v9 }
 0x7c8   :  { %v917_v28 = vpop.xlane.xlu0 %916 }
 0x7c9   :  { %v940_v45 = vmul.f32 1.442695, %v928_v35  ;;  %v929_v54 = vsub.f32 %v6822_v52, %v917_v28 }
 0x7ca   :  { %v1054_v31 = vpop.permute.xlu1 %1053 }
 0x7cb   :  { %5514 = vmatprep.subr.bf16.mxu1 %v1054_v31  ;;  %6122 = vpow2.f32 %v940_v45  ;;  %v942_v55 = vmul.f32 1.442695, %v929_v54 }
 0x7cc   :  { %v995_v2 = vpop.permute.xlu0 %994  ;;  %5515 = vmatpush3.bf16.msra.mxu1 %v1054_v31  ;;  %6124 = vpow2.f32 %v946_v53 }
 0x7cd   :  { %5508 = vmatprep.subr.bf16.mxu0 %v995_v2  ;;  %6126 = vpow2.f32 %v942_v55 }
 0x7ce   :  { %5509 = vmatpush3.bf16.msra.mxu0 %v995_v2  ;;  %v1119_v59 = vpop.permute.xlu1 %1118 }
 0x7cf   :  { %5850 = vmatprep.subr.msk.bf16.mxu0 %vm415_vm4, %v1119_v59  ;;  %v1129_v28 = vsel %vm415_vm4, %v1119_v59, 0 }
 0x7d0   :  { %1120 = vrot.lane.b32.xlu1 %v6667_v43, %s6426_s1 }
 0x7d1   :  { %v6856_v56 = vpop.eup %6120 }
 0x7d2   :  { %v966_v57 = vsel %vm155_vm3, %v6856_v56, 0.0 }
 0x7d5   :  { %v6860_v60 = vpop.eup %6122 }
 0x7d6   :  { %v960_v41 = vsel %vm155_vm3, %v6860_v60, 0.0  ;;  %v6864_v42 = vpop.eup %6124 }
 0x7d7   :  { %v969_v46 = vsel %vm155_vm3, %v6864_v42, 0.0  ;;  %v6868_v52 = vpop.eup %6126 }
 0x7d8   :  { %v963_v39 = vsel %vm155_vm3, %v6868_v52, 0.0 }
 0x7dd   :  { %1055 = vrot.lane.b32.xlu0 %v6681_v63, %s6425_s2 }
 0x7f4   :  { %967 = vadd.xlane.f32.xlu1 %v966_v57 }
 0x7f8   :  { %961 = vadd.xlane.f32.xlu1 %v960_v41 }
 0x7fc   :  { %970 = vadd.xlane.f32.xlu0 %v969_v46 }
 0x800   :  { %964 = vadd.xlane.f32.xlu0 %v963_v39 }
 0x809   :  { %1114 = vrot.lane.b32.xlu1 %v6675_v49, %s6427_s18 }
 0x80d   :  { %1189 = vrot.lane.b32.xlu1 %v6681_v63, %s6426_s1 }
 0x811   :  { %1185 = vrot.lane.b32.xlu1 %v6685_v5, %s6427_s18 }
 0x815   :  { %1344 = vrot.lane.b32.xlu1 %v6669_v47, %s8188_s19 }
 0x816   :  { %1187 = vrot.lane.b32.xlu0 %v6683_v4, %s6426_s1 }
 0x81a   :  { %1116 = vrot.lane.b32.xlu0 %v6671_v48, %s6427_s18 }
 0x81e   :  { %1183 = vrot.lane.b32.xlu0 %v6687_v44, %s6427_s18 }
 0x848   :  { %v956_v61 = vpop.xlane.xlu1 %955 }
 0x84c   :  { %v950_v62 = vpop.xlane.xlu1 %949 }
 0x850   :  { %v959_v1 = vpop.xlane.xlu0 %958  ;;  %v1121_v31 = vpop.permute.xlu1 %1120 }
 0x851   :  { %6128 = vrcp.f32 %v959_v1 }
 0x852   :  { %6130 = vrcp.f32 %v950_v62 }
 0x853   :  { %6132 = vrcp.f32 %v956_v61 }
 0x854   :  { %v953_v3 = vpop.xlane.xlu0 %952 }
 0x855   :  { %6134 = vrcp.f32 %v953_v3 }
 0x858   :  { %v1056_v6 = vpop.permute.xlu0 %1055 }
 0x859   :  { %5516 = vmatprep.subr.bf16.mxu1 %v1056_v6 }
 0x85a   :  { %5517 = vmatpush3.bf16.msra.mxu1 %v1056_v6 }
 0x85b   :  { %v6129_v7 = vpop.eup %6128 }
 0x85c   :  { %v6131_v8 = vpop.eup %6130  ;;  %v979_v16 = vmul.f32 %v6129_v7, %v6842_v17  ;;  %v1132_v17 = vsel %vm415_vm4, %v1121_v31, 0 }
 0x85d   :  { %v6133_v10 = vpop.eup %6132  ;;  %v973_v50 = vmul.f32 %v6131_v8, %v6838_v15 }
 0x85e   :  { %v977_v21 = vmul.f32 %v6133_v10, %v6834_v11 }
 0x85f   :  { %v6135_v14 = vpop.eup %6134 }
 0x860   :  { %v975_v19 = vmul.f32 %v6135_v14, %v6846_v20  ;;  %v989_v24 = vpack.c.bf16 %v979_v16, %v977_v21 }
 0x862   :  { %v988_v58 = vpack.c.bf16 %v975_v19, %v973_v50 }
 0x864   :  { %5510 = vmatprep.mubr.msk.bf16.mxu0 %vm155_vm3, %v988_v58 }
 0x865   :  { %5511 = vmatmul.mubr.msk.bf16.vlgmr.msra.gmra.mrb[16].mxu0 %vm155_vm3, %v989_v24 }
 0x866   :  { %5523 = vmatpush3.bf16.xpose.msra.mxu0 %v1129_v28 }
 0x867   :  { %5851 = vmatprep.subr.msk.bf16.mxu0 %vm415_vm4, %v1121_v31 }
 0x86e   :  { %5525 = vmatpush3.bf16.xpose.msra.mxu0 %v1132_v17 }
 0x881   :  { %v968_v15 = vpop.xlane.xlu1 %967 }
 0x885   :  { %v962_v2 = vpop.xlane.xlu1 %961 }
 0x889   :  { %v971_v20 = vpop.xlane.xlu0 %970  ;;  %v1115_v32 = vpop.permute.xlu1 %1114 }
 0x88a   :  { %5526 = vmatprep.mubr.msk.bf16.mxu0 %vm415_vm4, %v1115_v32  ;;  %6136 = vrcp.f32 %v971_v20 }
 0x88b   :  { %6138 = vrcp.f32 %v962_v2 }
 0x88c   :  { %6140 = vrcp.f32 %v968_v15 }
 0x88d   :  { %v965_v11 = vpop.xlane.xlu0 %964  ;;  %v1190_v33 = vpop.permute.xlu1 %1189 }
 0x88e   :  { %6142 = vrcp.f32 %v965_v11 }
 0x891   :  { %v1188_v59 = vpop.permute.xlu0 %1187  ;;  %v1186_v35 = vpop.permute.xlu1 %1185 }
 0x892   :  { %5852 = vmatprep.subr.msk.bf16.mxu1 %vm415_vm4, %v1188_v59  ;;  %v1198_v6 = vsel %vm415_vm4, %v1188_v59, 0 }
 0x894   :  { %v6137_v9 = vpop.eup %6136 }
 0x895   :  { %v1117_v45 = vpop.permute.xlu0 %1116  ;;  %v1345_v53 = vpop.permute.xlu1 %1344  ;;  %v987_v41 = vmul.f32 %v6137_v9, %v6864_v42 }
 0x896   :  { %v6139_v54 = vpop.eup %6138  ;;  %5527 = vmatmul.mubr.msk.bf16.vlgmr.msra.gmra.mrb[20].mxu0 %vm415_vm4, %v1117_v45  ;;  %5538 = vmatprep.subr.bf16.mxu0 %v1345_v53 }
 0x897   :  { %v6141_v55 = vpop.eup %6140  ;;  %5539 = vmatpush3.bf16.msra.mxu0 %v1345_v53  ;;  %v981_v46 = vmul.f32 %v6139_v54, %v6860_v60  ;;  %v1201_v60 = vsel %vm415_vm4, %v1190_v33, 0 }
 0x898   :  { %v6143_v57 = vpop.eup %6142  ;;  %v985_v61 = vmul.f32 %v6141_v55, %v6856_v56 }
 0x899   :  { %v983_v39 = vmul.f32 %v6143_v57, %v6868_v52  ;;  %v1184_v3 = vpop.permute.xlu0 %1183 }
 0x89a   :  { %v991_v1 = vpack.c.bf16 %v987_v41, %v985_v61 }
 0x89b   :  { %v990_v62 = vpack.c.bf16 %v983_v39, %v981_v46 }
 0x89d   :  { %5518 = vmatprep.mubr.msk.bf16.mxu1 %vm155_vm3, %v990_v62 }
 0x89e   :  { %5519 = vmatmul.mubr.msk.bf16.vlgmr.msra.gmra.mrb[20].mxu1 %vm155_vm3, %v991_v1 }
 0x89f   :  { %5531 = vmatpush3.bf16.xpose.msra.mxu1 %v1198_v6  ;;  %5534 = vmatprep.mubr.msk.bf16.mxu1 %vm415_vm4, %v1184_v3 }
 0x8a0   :  { %5853 = vmatprep.subr.msk.bf16.mxu1 %vm415_vm4, %v1190_v33 }
 0x8a7   :  { %5533 = vmatpush3.bf16.xpose.msra.mxu1 %v1201_v60 }
 0x8ae   :  { %5535 = vmatmul.mubr.msk.bf16.vlgmr.msra.gmra.mrb[24].mxu1 %vm415_vm4, %v1186_v35 }
 0x938   :  { %v6909_v56 = vpop.f32.mrb[16].mxu0 }
 0x939   :  { %v6911_v42 = vpop.f32.mrb[17].mxu0 }
 0x93a   :  { %v6913_v52 = vpop.f32.mrb[18].mxu0 }
 0x93b   :  { %v5896_v7 = vpack.i.bf16 %v6913_v52, %v6909_v56  ;;  %v6917_v8 = vpop.f32.mrb[19].mxu0 }
 0x93c   :  { %v5891_v10 = vpack.i.bf16 %v6917_v8, %v6911_v42 }
 0x969   :  { %v5528_v14 = vpop.f32.mrb[20].mxu0 }
 0x96a   :  { %v1168_v16 = vpop.f32.mrb[21].mxu0  ;;  %v1258_v50 = vsel %vm155_vm3, %v5528_v14, -inf }
 0x96b   :  { %1259 = vmax.xlane.f32.xlu0 %v1258_v50  ;;  %v5529_v19 = vpop.f32.mrb[22].mxu0  ;;  %v1252_v24 = vsel %vm155_vm3, %v1168_v16, -inf }
 0x96c   :  { %v1171_v21 = vpop.f32.mrb[23].mxu0  ;;  %v1261_v17 = vsel %vm155_vm3, %v5529_v19, -inf }
 0x96d   :  { %v1255_v58 = vsel %vm155_vm3, %v1171_v21, -inf }
 0x96e   :  { %1256 = vmax.xlane.f32.xlu1 %v1255_v58 }
 0x96f   :  { %1253 = vmax.xlane.f32.xlu0 %v1252_v24 }
 0x971   :  { %v6924_v28 = vpop.f32.mrb[20].mxu1 }
 0x972   :  { %v6926_v31 = vpop.f32.mrb[21].mxu1 }
 0x973   :  { %v6929_v15 = vpop.f32.mrb[22].mxu1  ;;  %1262 = vmax.xlane.f32.xlu0 %v1261_v17 }
 0x974   :  { %v5926_v2 = vpack.i.bf16 %v6929_v15, %v6924_v28  ;;  %v6933_v20 = vpop.f32.mrb[23].mxu1 }
 0x981   :  { %v5536_v11 = vpop.f32.mrb[24].mxu1 }
 0x982   :  { %v1237_v33 = vpop.f32.mrb[25].mxu1  ;;  %v1270_v59 = vsel %vm155_vm3, %v5536_v11, -inf }
 0x983   :  { %1271 = vmax.xlane.f32.xlu1 %v1270_v59  ;;  %v5537_v35 = vpop.f32.mrb[26].mxu1  ;;  %v1264_v53 = vsel %vm155_vm3, %v1237_v33, -inf }
 0x984   :  { %v6938_v9 = vpop.f32.mrb[27].mxu1  ;;  %v1273_v45 = vsel %vm155_vm3, %v5537_v35, -inf }
 0x985   :  { %1274 = vmax.xlane.f32.xlu0 %v1273_v45  ;;  %v1267_v54 = vsel %vm155_vm3, %v6938_v9, -inf }
 0x987   :  { %1265 = vmax.xlane.f32.xlu1 %v1264_v53 }
 0x989   :  { %1268 = vmax.xlane.f32.xlu0 %v1267_v54 }
 0x998   :  { %1405 = vrot.lane.b32.xlu1 %v6683_v4, %s8188_s19 }
 0x99c   :  { %1470 = vrot.lane.b32.xlu1 %v6669_v47, %s8180_s21 }
 0x99f   :  { %1346 = vrot.lane.b32.xlu0 %v6667_v43, %s8188_s19 }
 0x9f8   :  { %v1260_v55 = vpop.xlane.xlu0 %1259 }
 0x9f9   :  { %v1278_v57 = vsub.f32 %v5528_v14, %v1260_v55 }
 0x9fb   :  { %v1288_v41 = vmul.f32 1.442695, %v1278_v57  ;;  %v1257_v46 = vpop.xlane.xlu1 %1256 }
 0x9fc   :  { %v1254_v39 = vpop.xlane.xlu0 %1253  ;;  %v1277_v62 = vsub.f32 %v1171_v21, %v1257_v46 }
 0x9fd   :  { %6144 = vpow2.f32 %v1288_v41  ;;  %v1276_v61 = vsub.f32 %v1168_v16, %v1254_v39 }
 0x9fe   :  { %v1286_v60 = vmul.f32 1.442695, %v1277_v62 }
 0x9ff   :  { %v1284_v1 = vmul.f32 1.442695, %v1276_v61 }
 0xa00   :  { %v1263_v3 = vpop.xlane.xlu0 %1262 }
 0xa01   :  { %6146 = vpow2.f32 %v1284_v1  ;;  %v1279_v6 = vsub.f32 %v5529_v19, %v1263_v3 }
 0xa03   :  { %v1290_v50 = vmul.f32 1.442695, %v1279_v6 }
 0xa05   :  { %6148 = vpow2.f32 %v1290_v50 }
 0xa06   :  { %6150 = vpow2.f32 %v1286_v60 }
 0xa07   :  { %v6950_v58 = vpop.eup %6144 }
 0xa08   :  { %v1306_v24 = vsel %vm155_vm3, %v6950_v58, 0.0 }
 0xa09   :  { %1307 = vadd.xlane.f32.xlu1 %v1306_v24 }
 0xa0b   :  { %v6954_v14 = vpop.eup %6146 }
 0xa0c   :  { %v1300_v16 = vsel %vm155_vm3, %v6954_v14, 0.0 }
 0xa0d   :  { %1301 = vadd.xlane.f32.xlu1 %v1300_v16 }
 0xa0f   :  { %v6958_v21 = vpop.eup %6148 }
 0xa10   :  { %v1272_v17 = vpop.xlane.xlu1 %1271  ;;  %v1309_v19 = vsel %vm155_vm3, %v6958_v21, 0.0  ;;  %v6962_v59 = vpop.eup %6150 }
 0xa11   :  { %1310 = vadd.xlane.f32.xlu0 %v1309_v19  ;;  %v1303_v54 = vsel %vm155_vm3, %v6962_v59, 0.0  ;;  %v1282_v39 = vsub.f32 %v5536_v11, %v1272_v17 }
 0xa12   :  { %v1275_v45 = vpop.xlane.xlu0 %1274 }
 0xa13   :  { %v1296_v61 = vmul.f32 1.442695, %v1282_v39  ;;  %v1283_v1 = vsub.f32 %v5537_v35, %v1275_v45 }
 0xa14   :  { %v1266_v53 = vpop.xlane.xlu1 %1265 }
 0xa15   :  { %1304 = vadd.xlane.f32.xlu0 %v1303_v54  ;;  %v1280_v62 = vsub.f32 %v1237_v33, %v1266_v53  ;;  %6152 = vpow2.f32 %v1296_v61  ;;  %v1298_v6 = vmul.f32 1.442695, %v1283_v1 }
 0xa16   :  { %v1269_v55 = vpop.xlane.xlu0 %1268 }
 0xa17   :  { %v1292_v3 = vmul.f32 1.442695, %v1280_v62  ;;  %v1281_v60 = vsub.f32 %v6938_v9, %v1269_v55 }
 0xa18   :  { %v1406_v57 = vpop.permute.xlu1 %1405 }
 0xa19   :  { %5546 = vmatprep.subr.bf16.mxu1 %v1406_v57  ;;  %6154 = vpow2.f32 %v1292_v3  ;;  %v1294_v50 = vmul.f32 1.442695, %v1281_v60 }
 0xa1a   :  { %v1347_v41 = vpop.permute.xlu0 %1346  ;;  %5547 = vmatpush3.bf16.msra.mxu1 %v1406_v57  ;;  %6156 = vpow2.f32 %v1298_v6 }
 0xa1b   :  { %5540 = vmatprep.subr.bf16.mxu0 %v1347_v41  ;;  %6158 = vpow2.f32 %v1294_v50 }
 0xa1c   :  { %5541 = vmatpush3.bf16.msra.mxu0 %v1347_v41  ;;  %v1471_v46 = vpop.permute.xlu1 %1470 }
 0xa1d   :  { %5854 = vmatprep.subr.msk.bf16.mxu0 %vm415_vm4, %v1471_v46  ;;  %v1481_v6 = vsel %vm415_vm4, %v1471_v46, 0 }
 0xa1e   :  { %1472 = vrot.lane.b32.xlu1 %v6667_v43, %s8180_s21 }
 0xa1f   :  { %v6972_v24 = vpop.eup %6152 }
 0xa20   :  { %v1318_v16 = vsel %vm155_vm3, %v6972_v24, 0.0 }
 0xa23   :  { %v6976_v19 = vpop.eup %6154 }
 0xa24   :  { %v1312_v11 = vsel %vm155_vm3, %v6976_v19, 0.0  ;;  %v6157_v33 = vpop.eup %6156 }
 0xa25   :  { %v1321_v35 = vsel %vm155_vm3, %v6157_v33, 0.0  ;;  %v6159_v17 = vpop.eup %6158 }
 0xa26   :  { %v1315_v9 = vsel %vm155_vm3, %v6159_v17, 0.0 }
 0xa2b   :  { %1407 = vrot.lane.b32.xlu0 %v6681_v63, %s8188_s19 }
 0xa42   :  { %1319 = vadd.xlane.f32.xlu1 %v1318_v16 }
 0xa46   :  { %1313 = vadd.xlane.f32.xlu1 %v1312_v11 }
 0xa4a   :  { %1322 = vadd.xlane.f32.xlu0 %v1321_v35 }
 0xa4e   :  { %1316 = vadd.xlane.f32.xlu0 %v1315_v9 }
 0xa57   :  { %1466 = vrot.lane.b32.xlu1 %v6675_v49, %s8178_s22 }
 0xa5b   :  { %1541 = vrot.lane.b32.xlu1 %v6681_v63, %s8180_s21 }
 0xa5f   :  { %1537 = vrot.lane.b32.xlu1 %v6685_v5, %s8178_s22 }
 0xa64   :  { %1539 = vrot.lane.b32.xlu0 %v6683_v4, %s8180_s21  ;;  %s8182_s21 = smov 24  }
 0xa68   :  { %1468 = vrot.lane.b32.xlu0 %v6671_v48, %s8178_s22 }
 0xa6c   :  { %1535 = vrot.lane.b32.xlu0 %v6687_v44, %s8178_s22 }
 0xa96   :  { %v1308_v45 = vpop.xlane.xlu1 %1307 }
 0xa9a   :  { %v1302_v53 = vpop.xlane.xlu1 %1301 }
 0xa9e   :  { %v1311_v54 = vpop.xlane.xlu0 %1310  ;;  %v1473_v60 = vpop.permute.xlu1 %1472 }
 0xa9f   :  { %6160 = vrcp.f32 %v1311_v54 }
 0xaa0   :  { %6162 = vrcp.f32 %v1302_v53 }
 0xaa1   :  { %6164 = vrcp.f32 %v1308_v45 }
 0xaa2   :  { %v1305_v49 = vpop.xlane.xlu0 %1304 }
 0xaa3   :  { %6166 = vrcp.f32 %v1305_v49 }
 0xaa6   :  { %v1408_v55 = vpop.permute.xlu0 %1407 }
 0xaa7   :  { %5548 = vmatprep.subr.bf16.mxu1 %v1408_v55 }
 0xaa8   :  { %5549 = vmatpush3.bf16.msra.mxu1 %v1408_v55 }
 0xaa9   :  { %v6161_v5 = vpop.eup %6160 }
 0xaaa   :  { %v6163_v57 = vpop.eup %6162  ;;  %v1331_v48 = vmul.f32 %v6161_v5, %v6958_v21  ;;  %v1484_v21 = vsel %vm415_vm4, %v1473_v60, 0 }
 0xaab   :  { %v6165_v41 = vpop.eup %6164  ;;  %v1325_v61 = vmul.f32 %v6163_v57, %v6954_v14 }
 0xaac   :  { %v1329_v62 = vmul.f32 %v6165_v41, %v6950_v58 }
 0xaad   :  { %v6167_v39 = vpop.eup %6166 }
 0xaae   :  { %v1327_v44 = vmul.f32 %v6167_v39, %v6962_v59  ;;  %v1341_v3 = vpack.c.bf16 %v1331_v48, %v1329_v62 }
 0xab0   :  { %v1340_v1 = vpack.c.bf16 %v1327_v44, %v1325_v61 }
 0xab2   :  { %5542 = vmatprep.mubr.msk.bf16.mxu0 %vm155_vm3, %v1340_v1 }
 0xab3   :  { %5543 = vmatmul.mubr.msk.bf16.vlgmr.msra.gmra.mrb[24].mxu0 %vm155_vm3, %v1341_v3 }
 0xab4   :  { %5555 = vmatpush3.bf16.xpose.msra.mxu0 %v1481_v6 }
 0xab5   :  { %5855 = vmatprep.subr.msk.bf16.mxu0 %vm415_vm4, %v1473_v60 }
 0xabc   :  { %5557 = vmatpush3.bf16.xpose.msra.mxu0 %v1484_v21 }
 0xacf   :  { %v1320_v14 = vpop.xlane.xlu1 %1319 }
 0xad3   :  { %v1314_v50 = vpop.xlane.xlu1 %1313 }
 0xad7   :  { %v1323_v59 = vpop.xlane.xlu0 %1322  ;;  %v1467_v16 = vpop.permute.xlu1 %1466 }
 0xad8   :  { %5558 = vmatprep.mubr.msk.bf16.mxu0 %vm415_vm4, %v1467_v16  ;;  %6168 = vrcp.f32 %v1323_v59 }
 0xad9   :  { %6170 = vrcp.f32 %v1314_v50 }
 0xada   :  { %6172 = vrcp.f32 %v1320_v14 }
 0xadb   :  { %v1317_v58 = vpop.xlane.xlu0 %1316  ;;  %v1542_v61 = vpop.permute.xlu1 %1541 }
 0xadc   :  { %6174 = vrcp.f32 %v1317_v58 }
 0xadf   :  { %v1540_v11 = vpop.permute.xlu0 %1539 }
 0xae0   :  { %5856 = vmatprep.subr.msk.bf16.mxu1 %vm415_vm4, %v1540_v11  ;;  %v1550_v48 = vsel %vm415_vm4, %v1540_v11, 0 }
 0xae2   :  { %v6169_v46 = vpop.eup %6168 }
 0xae3   :  { %v1469_v35 = vpop.permute.xlu0 %1468  ;;  %v6171_v9 = vpop.eup %6170  ;;  %v1339_v54 = vmul.f32 %v6169_v46, %v6157_v33 }
 0xae4   :  { %5559 = vmatmul.mubr.msk.bf16.vlgmr.msra.gmra.mrb[28].mxu0 %vm415_vm4, %v1469_v35  ;;  %v6173_v45 = vpop.eup %6172  ;;  %v1333_v49 = vmul.f32 %v6171_v9, %v6976_v19  ;;  %v1553_v19 = vsel %vm415_vm4, %v1542_v61, 0  ;;  %v1538_v33 = vpop.permute.xlu1 %1537 }
 0xae5   :  { %v1337_v5 = vmul.f32 %v6173_v45, %v6972_v24 }
 0xae6   :  { %v6175_v53 = vpop.eup %6174 }
 0xae7   :  { %v1335_v55 = vmul.f32 %v6175_v53, %v6159_v17  ;;  %v1343_v41 = vpack.c.bf16 %v1339_v54, %v1337_v5  ;;  %v1536_v39 = vpop.permute.xlu0 %1535 }
 0xae9   :  { %v1342_v57 = vpack.c.bf16 %v1335_v55, %v1333_v49 }
 0xaeb   :  { %5550 = vmatprep.mubr.msk.bf16.mxu1 %vm155_vm3, %v1342_v57 }
 0xaec   :  { %5551 = vmatmul.mubr.msk.bf16.vlgmr.msra.gmra.mrb[28].mxu1 %vm155_vm3, %v1343_v41 }
 0xaed   :  { %5563 = vmatpush3.bf16.xpose.msra.mxu1 %v1550_v48  ;;  %5566 = vmatprep.mubr.msk.bf16.mxu1 %vm415_vm4, %v1536_v39 }
 0xaee   :  { %5857 = vmatprep.subr.msk.bf16.mxu1 %vm415_vm4, %v1542_v61 }
 0xaf5   :  { %5565 = vmatpush3.bf16.xpose.msra.mxu1 %v1553_v19 }
 0xafc   :  { %5567 = vmatmul.mubr.msk.bf16.vlgmr.msra.gmra.mrb[32].mxu1 %vm415_vm4, %v1538_v33 }
 0xb86   :  { %v7015_v24 = vpop.f32.mrb[24].mxu0 }
 0xb87   :  { %v7017_v17 = vpop.f32.mrb[25].mxu0 }
 0xb88   :  { %v7019_v44 = vpop.f32.mrb[26].mxu0 }
 0xb89   :  { %v5906_v62 = vpack.i.bf16 %v7019_v44, %v7015_v24  ;;  %v7023_v1 = vpop.f32.mrb[27].mxu0 }
 0xb8a   :  { %v5901_v3 = vpack.i.bf16 %v7023_v1, %v7017_v17 }
 0xbb7   :  { %v5560_v6 = vpop.f32.mrb[28].mxu0 }
 0xbb8   :  { %v1520_v60 = vpop.f32.mrb[29].mxu0  ;;  %v1610_v16 = vsel %vm155_vm3, %v5560_v6, -inf }
 0xbb9   :  { %v5561_v21 = vpop.f32.mrb[30].mxu0  ;;  %v1604_v14 = vsel %vm155_vm3, %v1520_v60, -inf }
 0xbba   :  { %1605 = vmax.xlane.f32.xlu0 %v1604_v14  ;;  %v1523_v50 = vpop.f32.mrb[31].mxu0  ;;  %v1613_v35 = vsel %vm155_vm3, %v5561_v21, -inf }
 0xbbb   :  { %v1607_v59 = vsel %vm155_vm3, %v1523_v50, -inf }
 0xbbc   :  { %1608 = vmax.xlane.f32.xlu1 %v1607_v59 }
 0xbbe   :  { %1611 = vmax.xlane.f32.xlu0 %v1610_v16 }
 0xbbf   :  { %v7030_v58 = vpop.f32.mrb[28].mxu1 }
 0xbc0   :  { %v7032_v11 = vpop.f32.mrb[29].mxu1 }
 0xbc1   :  { %v7034_v46 = vpop.f32.mrb[30].mxu1 }
 0xbc2   :  { %v7039_v45 = vpop.f32.mrb[31].mxu1  ;;  %1614 = vmax.xlane.f32.xlu0 %v1613_v35 }
 0xbc3   :  { %v8196_v28 = vpack.i.bf16 %v7039_v45, %v7032_v11 }
 0xbcf   :  { %v5568_v54 = vpop.f32.mrb[32].mxu1 }
 0xbd0   :  { %v1589_v49 = vpop.f32.mrb[33].mxu1  ;;  %v1622_v39 = vsel %vm155_vm3, %v5568_v54, -inf }
 0xbd1   :  { %v5569_v55 = vpop.f32.mrb[34].mxu1  ;;  %v1616_v5 = vsel %vm155_vm3, %v1589_v49, -inf }
 0xbd2   :  { %1617 = vmax.xlane.f32.xlu1 %v1616_v5  ;;  %v1592_v57 = vpop.f32.mrb[35].mxu1  ;;  %v1625_v48 = vsel %vm155_vm3, %v5569_v55, -inf }
 0xbd3   :  { %v1619_v41 = vsel %vm155_vm3, %v1592_v57, -inf }
 0xbd4   :  { %1620 = vmax.xlane.f32.xlu0 %v1619_v41 }
 0xbd6   :  { %1623 = vmax.xlane.f32.xlu1 %v1622_v39 }
 0xbd8   :  { %1626 = vmax.xlane.f32.xlu0 %v1625_v48 }
 0xbe7   :  { %1696 = vrot.lane.b32.xlu1 %v6669_v47, %s8176_s24 }
 0xc47   :  { %v1606_v61 = vpop.xlane.xlu0 %1605 }
 0xc48   :  { %v1628_v19 = vsub.f32 %v1520_v60, %v1606_v61 }
 0xc49   :  { %v1609_v33 = vpop.xlane.xlu1 %1608 }
 0xc4a   :  { %v1636_v16 = vmul.f32 1.442695, %v1628_v19  ;;  %v1629_v35 = vsub.f32 %v1523_v50, %v1609_v33 }
 0xc4b   :  { %v1612_v14 = vpop.xlane.xlu0 %1611 }
 0xc4c   :  { %v1630_v59 = vsub.f32 %v5560_v6, %v1612_v14  ;;  %v1638_v39 = vmul.f32 1.442695, %v1629_v35 }
 0xc4e   :  { %v1640_v5 = vmul.f32 1.442695, %v1630_v59 }
 0xc4f   :  { %v1615_v0 = vpop.xlane.xlu0 %1614 }
 0xc50   :  { %6176 = vpow2.f32 %v1640_v5  ;;  %v1631_v41 = vsub.f32 %v5561_v21, %v1615_v0 }
 0xc51   :  { %6178 = vpow2.f32 %v1636_v16 }
 0xc52   :  { %v1642_v53 = vmul.f32 1.442695, %v1631_v41 }
 0xc54   :  { %6180 = vpow2.f32 %v1642_v53 }
 0xc55   :  { %6182 = vpow2.f32 %v1638_v39 }
 0xc5a   :  { %v7049_v48 = vpop.eup %6176 }
 0xc5b   :  { %v1658_v47 = vsel %vm155_vm3, %v7049_v48, 0.0  ;;  %v6179_v60 = vpop.eup %6178 }
 0xc5c   :  { %1659 = vadd.xlane.f32.xlu1 %v1658_v47  ;;  %v1652_v50 = vsel %vm155_vm3, %v6179_v60, 0.0 }
 0xc5e   :  { %v7053_v61 = vpop.eup %6180 }
 0xc5f   :  { %v1618_v6 = vpop.xlane.xlu1 %1617  ;;  %v1661_v0 = vsel %vm155_vm3, %v7053_v61, 0.0  ;;  %v6183_v21 = vpop.eup %6182 }
 0xc60   :  { %1653 = vadd.xlane.f32.xlu1 %v1652_v50  ;;  %1662 = vadd.xlane.f32.xlu0 %v1661_v0  ;;  %v1632_v53 = vsub.f32 %v1589_v49, %v1618_v6  ;;  %v1655_v14 = vsel %vm155_vm3, %v6183_v21, 0.0 }
 0xc61   :  { %v1621_v19 = vpop.xlane.xlu0 %1620 }
 0xc62   :  { %v1633_v59 = vsub.f32 %v1592_v57, %v1621_v19  ;;  %v1644_v35 = vmul.f32 1.442695, %v1632_v53 }
 0xc63   :  { %v1624_v33 = vpop.xlane.xlu1 %1623 }
 0xc64   :  { %v1634_v16 = vsub.f32 %v5568_v54, %v1624_v33  ;;  %1656 = vadd.xlane.f32.xlu0 %v1655_v14  ;;  %v1646_v9 = vmul.f32 1.442695, %v1633_v59 }
 0xc65   :  { %v1627_v5 = vpop.xlane.xlu0 %1626 }
 0xc66   :  { %v1648_v41 = vmul.f32 1.442695, %v1634_v16  ;;  %v1635_v39 = vsub.f32 %v5569_v55, %v1627_v5 }
 0xc67   :  { %v1697_v47 = vpop.permute.xlu1 %1696 }
 0xc68   :  { %6184 = vpow2.f32 %v1648_v41  ;;  %v1650_v32 = vmul.f32 1.442695, %v1635_v39  ;;  %5570 = vmatprep.subr.bf16.mxu0 %v1697_v47 }
 0xc69   :  { %6186 = vpow2.f32 %v1644_v35  ;;  %5571 = vmatpush3.bf16.msra.mxu0 %v1697_v47 }
 0xc6a   :  { %6188 = vpow2.f32 %v1650_v32 }
 0xc6b   :  { %6190 = vpow2.f32 %v1646_v9 }
 0xc72   :  { %v7059_v49 = vpop.eup %6184 }
 0xc73   :  { %v6187_v6 = vpop.eup %6186  ;;  %v1670_v54 = vsel %vm155_vm3, %v7059_v49, 0.0 }
 0xc74   :  { %v6189_v57 = vpop.eup %6188  ;;  %1671 = vadd.xlane.f32.xlu1 %v1670_v54  ;;  %v1664_v0 = vsel %vm155_vm3, %v6187_v6, 0.0 }
 0xc75   :  { %v1673_v50 = vsel %vm155_vm3, %v6189_v57, 0.0  ;;  %v6191_v55 = vpop.eup %6190 }
 0xc76   :  { %1674 = vadd.xlane.f32.xlu0 %v1673_v50  ;;  %v1667_v53 = vsel %vm155_vm3, %v6191_v55, 0.0 }
 0xc78   :  { %1665 = vadd.xlane.f32.xlu1 %v1664_v0 }
 0xc7a   :  { %1668 = vadd.xlane.f32.xlu0 %v1667_v53 }
 0xc89   :  { %1757 = vrot.lane.b32.xlu1 %v6683_v4, %s8176_s24 }
 0xc8d   :  { %1759 = vrot.lane.b32.xlu1 %v6681_v63, %s8176_s24 }
 0xc90   :  { %1698 = vrot.lane.b32.xlu0 %v6667_v43, %s8176_s24 }
 0xc91   :  { %5897 = vrot.lane.b32.xlu1 %v5896_v7, %s8186_s25 }
 0xc94   :  { %5892 = vrot.lane.b32.xlu0 %v5891_v10, %s8186_s25 }
 0xc95   :  { %5907 = vrot.lane.b32.xlu1 %v5906_v62, %s8184_s26 }
 0xc98   :  { %5902 = vrot.lane.b32.xlu0 %v5901_v3, %s8184_s26 }
 0xce9   :  { %v1660_v43 = vpop.xlane.xlu1 %1659 }
 0xced   :  { %v1663_v63 = vpop.xlane.xlu0 %1662  ;;  %v1654_v4 = vpop.xlane.xlu1 %1653 }
 0xcee   :  { %6192 = vrcp.f32 %v1654_v4  ;;  %v8194_v4 = vpack.i.bf16 %v6933_v20, %v6926_v31 }
 0xcf1   :  { %v1657_v56 = vpop.xlane.xlu0 %1656 }
 0xcf2   :  { %6194 = vrcp.f32 %v1657_v56 }
 0xcf3   :  { %6196 = vrcp.f32 %v1663_v63 }
 0xcf4   :  { %6198 = vrcp.f32 %v1660_v43 }
 0xcf8   :  { %v6193_v52 = vpop.eup %6192 }
 0xcf9   :  { %v1677_v7 = vmul.f32 %v6193_v52, %v6179_v60 }
 0xcfc   :  { %v6195_v42 = vpop.eup %6194 }
 0xcfd   :  { %v1679_v8 = vmul.f32 %v6195_v42, %v6183_v21  ;;  %v6197_v44 = vpop.eup %6196 }
 0xcfe   :  { %v6199_v1 = vpop.eup %6198  ;;  %v1683_v9 = vmul.f32 %v6197_v44, %v7053_v61 }
 0xcff   :  { %v1692_v10 = vpack.c.bf16 %v1679_v8, %v1677_v7  ;;  %v1681_v21 = vmul.f32 %v6199_v1, %v7049_v48  ;;  %v6030_v48 = vld [vmem:[%s8160_s7] sm:$0xff]   ;;  %v8195_v8 = vpack.i.bf16 %v7034_v46, %v7030_v58 }
 0xd01   :  { %v1672_v32 = vpop.xlane.xlu1 %1671  ;;  %5574 = vmatprep.mubr.msk.bf16.mxu0 %vm155_vm3, %v1692_v10  ;;  %v1693_v33 = vpack.c.bf16 %v1683_v9, %v1681_v21 }
 0xd03   :  { %v1675_v24 = vpop.xlane.xlu0 %1674 }
 0xd04   :  { %6200 = vrcp.f32 %v1675_v24 }
 0xd05   :  { %v1666_v17 = vpop.xlane.xlu1 %1665 }
 0xd06   :  { %6202 = vrcp.f32 %v1666_v17 }
 0xd07   :  { %6204 = vrcp.f32 %v1672_v32  ;;  %v1669_v62 = vpop.xlane.xlu0 %1668 }
 0xd08   :  { %6206 = vrcp.f32 %v1669_v62 }
 0xd09   :  { %v1758_v3 = vpop.permute.xlu1 %1757 }
 0xd0a   :  { %5578 = vmatprep.subr.bf16.mxu1 %v1758_v3 }
 0xd0b   :  { %v1699_v60 = vpop.permute.xlu0 %1698  ;;  %5579 = vmatpush3.bf16.msra.mxu1 %v1758_v3 }
 0xd0c   :  { %5572 = vmatprep.subr.bf16.mxu0 %v1699_v60 }
 0xd0d   :  { %5573 = vmatpush3.bf16.msra.mxu0 %v1699_v60  ;;  %v1760_v19 = vpop.permute.xlu1 %1759 }
 0xd0e   :  { %5580 = vmatprep.subr.bf16.mxu1 %v1760_v19  ;;  %v6201_v14 = vpop.eup %6200  ;;  %5586 = vmatprep.subr.bf16.mxu0 %v6030_v48 }
 0xd0f   :  { %5581 = vmatpush3.bf16.msra.mxu1 %v1760_v19  ;;  %v1691_v5 = vmul.f32 %v6201_v14, %v6189_v57  ;;  %v6031_v57 = vld [vmem:[%s8160_s7 + $0x8] sm:$0xff]   ;;  %v5893_v15 = vpop.permute.xlu0 %5892 }
 0xd10   :  { %v6203_v59 = vpop.eup %6202  ;;  %5575 = vmatmul.mubr.msk.bf16.vlgmr.msra.gmra.mrb[32].mxu0 %vm155_vm3, %v1693_v33  ;;  %v5895_v20 = vunpack.i.h.bf16 %v5893_v15  ;;  %v5894_v10 = vunpack.i.l.bf16 %v5893_v15 }
 0xd11   :  { %v6205_v16 = vpop.eup %6204  ;;  %v1685_v41 = vmul.f32 %v6203_v59, %v6187_v6  ;;  %5587 = vmatpush3.bf16.msra.mxu0 %v6030_v48  ;;  %v5898_v31 = vpop.permute.xlu1 %5897 }
 0xd12   :  { %v6207_v35 = vpop.eup %6206  ;;  %v1689_v39 = vmul.f32 %v6205_v16, %v7059_v49  ;;  %5588 = vmatprep.subr.bf16.mxu0 %v6031_v57  ;;  %v5900_v24 = vunpack.i.h.bf16 %v5898_v31  ;;  %v5899_v17 = vunpack.i.l.bf16 %v5898_v31  ;;  %v1915_v11 = vsel %vm415_vm4, %v6807_v27, %v5895_v20 }
 0xd13   :  { %v1687_v61 = vmul.f32 %v6207_v35, %v6191_v55  ;;  %v5903_v32 = vpop.permute.xlu0 %5902  ;;  %v1914_v45 = vsel %vm415_vm4, %v6803_v51, %v5894_v10 }
 0xd14   :  { %v1695_v54 = vpack.c.bf16 %v1691_v5, %v1689_v39  ;;  %v5905_v46 = vunpack.i.h.bf16 %v5903_v32  ;;  %v5904_v62 = vunpack.i.l.bf16 %v5903_v32  ;;  %v1917_v3 = vsel %vm415_vm4, %v6805_v26, %v5900_v24 }
 0xd15   :  { %v1694_v47 = vpack.c.bf16 %v1687_v61, %v1685_v41  ;;  %5589 = vmatpush3.bf16.msra.mxu0 %v6031_v57  ;;  %v1916_v9 = vsel %vm415_vm4, %v6801_v22, %v5899_v17 }
 0xd16   :  { %v1923_v16 = vsel %vm1922_vm5, %v1914_v45, %v5904_v62  ;;  %v1924_v51 = vsel %vm1922_vm5, %v1915_v11, %v5905_v46 }
 0xd17   :  { %5582 = vmatprep.mubr.msk.bf16.mxu1 %vm155_vm3, %v1694_v47 }
 0xd18   :  { %5583 = vmatmul.mubr.msk.bf16.vlgmr.msra.gmra.mrb[36].mxu1 %vm155_vm3, %v1695_v54 }
 0xde3   :  { %v5576_v6 = vpop.f32.mrb[32].mxu0 }
 0xde4   :  { %v1742_v49 = vpop.f32.mrb[33].mxu0 }
 0xde5   :  { %v5577_v50 = vpop.f32.mrb[34].mxu0 }
 0xde6   :  { %v5916_v55 = vpack.i.bf16 %v5577_v50, %v5576_v6  ;;  %v1745_v0 = vpop.f32.mrb[35].mxu0 }
 0xde7   :  { %v5911_v53 = vpack.i.bf16 %v1745_v0, %v1742_v49 }
 0xde8   :  { %5917 = vrot.lane.b32.xlu1 %v5916_v55, %s8182_s21 }
 0xde9   :  { %5912 = vrot.lane.b32.xlu0 %v5911_v53, %s8182_s21 }
 0xdeb   :  { %v5584_v43 = vpop.f32.mrb[36].mxu1 }
 0xdec   :  { %5927 = vrot.lane.b32.xlu1 %v5926_v2, %s8186_s25  ;;  %v1803_v63 = vpop.f32.mrb[37].mxu1  ;;  %v5908_v2 = vpop.permute.xlu1 %5907 }
 0xded   :  { %5922 = vrot.lane.b32.xlu0 %v8194_v4, %s8186_s25  ;;  %v5585_v56 = vpop.f32.mrb[38].mxu1  ;;  %v5910_v44 = vunpack.i.h.bf16 %v5908_v2  ;;  %v5909_v58 = vunpack.i.l.bf16 %v5908_v2  ;;  %s8203_s25 = smov 24  }
 0xdee   :  { %v5946_v52 = vpack.i.bf16 %v5585_v56, %v5584_v43  ;;  %v1806_v42 = vpop.f32.mrb[39].mxu1 }
 0xdef   :  { %v5941_v7 = vpack.i.bf16 %v1806_v42, %v1803_v63  ;;  %v1925_v33 = vsel %vm1922_vm5, %v1916_v9, %v5909_v58  ;;  %v1926_v14 = vsel %vm1922_vm5, %v1917_v3, %v5910_v44  ;;  %v5108_v58 = vld [vmem:[%s8161_s8] ss:$0 sm:$0xff] }
 0xdf0   :  { %5937 = vrot.lane.b32.xlu1 %v8195_v8, %s8184_s26 }
 0xdf1   :  { %5932 = vrot.lane.b32.xlu0 %v8196_v28, %s8184_s26 }
 0xdf4   :  { %5947 = vrot.lane.b32.xlu1 %v5946_v52, %s8182_s21 }
 0xdf5   :  { %5942 = vrot.lane.b32.xlu0 %v5941_v7, %s8182_s21 }
 0xe5a   :  { %v5918_v1 = vpop.permute.xlu1 %5917 }
 0xe5b   :  { %v5920_v60 = vunpack.i.h.bf16 %v5918_v1  ;;  %v5919_v21 = vunpack.i.l.bf16 %v5918_v1  ;;  %v5913_v19 = vpop.permute.xlu0 %5912 }
 0xe5c   :  { %v5915_v59 = vunpack.i.h.bf16 %v5913_v19  ;;  %v5914_v27 = vunpack.i.l.bf16 %v5913_v19 }
 0xe5d   :  { %v1933_v35 = vsel %vm72_vm2, %v1925_v33, %v5919_v21  ;;  %v1934_v26 = vsel %vm72_vm2, %v1926_v14, %v5920_v60 }
 0xe5e   :  { %v1940_v5 = vpack.c.bf16 %v1934_v26, %v1933_v35  ;;  %v1932_v22 = vsel %vm72_vm2, %v1924_v51, %v5915_v59  ;;  %v1931_v41 = vsel %vm72_vm2, %v1923_v16, %v5914_v27  ;;  %v5928_v61 = vpop.permute.xlu1 %5927 }
 0xe5f   :  { %v5923_v39 = vpop.permute.xlu0 %5922  ;;  %v1939_v47 = vpack.c.bf16 %v1932_v22, %v1931_v41  ;;  %v5930_v54 = vunpack.i.h.bf16 %v5928_v61  ;;  %v5929_v48 = vunpack.i.l.bf16 %v5928_v61 }
 0xe60   :  { %v5925_v6 = vunpack.i.h.bf16 %v5923_v39  ;;  %v5924_v49 = vunpack.i.l.bf16 %v5923_v39 }
 0xe61   :  { %5590 = vmatprep.mubr.msk.bf16.mxu0 %vm155_vm3, %v1939_v47  ;;  %v1921_v63 = vsel %vm415_vm4, %v6817_v38, %v5930_v54  ;;  %v1920_v4 = vsel %vm415_vm4, %v6812_v36, %v5929_v48 }
 0xe62   :  { %v5938_v57 = vpop.permute.xlu1 %5937  ;;  %5591 = vmatmul.mubr.msk.bf16.vlgmr.msra.gmra.mrb[36].mxu0 %vm155_vm3, %v1940_v5  ;;  %v1919_v52 = vsel %vm415_vm4, %v6819_v40, %v5925_v6  ;;  %v1918_v42 = vsel %vm415_vm4, %v6814_v37, %v5924_v49 }
 0xe63   :  { %v5933_v50 = vpop.permute.xlu0 %5932  ;;  %v5940_v55 = vunpack.i.h.bf16 %v5938_v57  ;;  %v5939_v0 = vunpack.i.l.bf16 %v5938_v57 }
 0xe64   :  { %v5935_v53 = vunpack.i.h.bf16 %v5933_v50  ;;  %v5934_v43 = vunpack.i.l.bf16 %v5933_v50 }
 0xe65   :  { %v1929_v31 = vsel %vm1922_vm5, %v1920_v4, %v5939_v0  ;;  %v1930_v15 = vsel %vm1922_vm5, %v1921_v63, %v5940_v55 }
 0xe66   :  { %v5948_v56 = vpop.permute.xlu1 %5947  ;;  %v1927_v38 = vsel %vm1922_vm5, %v1918_v42, %v5934_v43  ;;  %v1928_v36 = vsel %vm1922_vm5, %v1919_v52, %v5935_v53 }
 0xe67   :  { %v5950_v7 = vunpack.i.h.bf16 %v5948_v56  ;;  %v5949_v8 = vunpack.i.l.bf16 %v5948_v56  ;;  %v5943_v28 = vpop.permute.xlu0 %5942 }
 0xe68   :  { %v5945_v2 = vunpack.i.h.bf16 %v5943_v28  ;;  %v5944_v20 = vunpack.i.l.bf16 %v5943_v28 }
 0xe69   :  { %v1937_v10 = vsel %vm72_vm2, %v1929_v31, %v5949_v8  ;;  %v1938_v40 = vsel %vm72_vm2, %v1930_v15, %v5950_v7 }
 0xe6a   :  { %v1936_v32 = vsel %vm72_vm2, %v1928_v36, %v5945_v2  ;;  %v1935_v37 = vsel %vm72_vm2, %v1927_v38, %v5944_v20  ;;  %v1942_v24 = vpack.c.bf16 %v1938_v40, %v1937_v10 }
 0xe6b   :  { %v1941_v17 = vpack.c.bf16 %v1936_v32, %v1935_v37 }
 0xe6d   :  { %5594 = vmatprep.mubr.msk.bf16.mxu0 %vm155_vm3, %v1941_v17 }
 0xe6e   :  { %5595 = vmatmul.mubr.msk.bf16.gmra.mrb[40].mxu0 %vm155_vm3, %v1942_v24 }
 0xf35   :  { %v5592_v44 = vpop.f32.mrb[36].mxu0 }
 0xf36   :  { %v2005_v46 = vpop.f32.mrb[37].mxu0  ;;  %v2038_v62 = vadd.f32 %v5592_v44, %v6570_v23 }
 0xf37   :  { %v2036_v11 = vadd.f32 %v2005_v46, %v6553_v13  ;;  %v5593_v45 = vpop.f32.mrb[38].mxu0 }
 0xf38   :  { %v2008_v1 = vpop.f32.mrb[39].mxu0  ;;  %v7165_v60 = vadd.f32 %v5108_v58, %v2038_v62  ;;  %v2039_v21 = vadd.f32 %v5593_v45, %v6572_v25 }
 0xf39   :  { %v7162_v3 = vadd.f32 %v5108_v58, %v2036_v11  ;;  %v2037_v9 = vadd.f32 %v2008_v1, %v6560_v18 }
 0xf3a   :  { %v7174_v13 = vadd.f32 %v5108_v58, %v2039_v21  ;;  %v2067_v14 = vsel %vm155_vm3, %v7165_v60, 0.0 }
 0xf3b   :  { %v7168_v19 = vadd.f32 %v5108_v58, %v2037_v9  ;;  %v2061_v33 = vsel %vm155_vm3, %v7162_v3, 0.0 }
 0xf3c   :  { %2062 = vadd.xlane.f32.xlu0 %v2061_v33  ;;  %v2070_v51 = vsel %vm155_vm3, %v7174_v13, 0.0  ;;  %v6032_v33 = vld [vmem:[%s8162_s11] sm:$0xff]  }
 0xf3d   :  { %v2064_v23 = vsel %vm155_vm3, %v7168_v19, 0.0  ;;  %5598 = vmatprep.subr.bf16.mxu1 %v6032_v33 }
 0xf3e   :  { %2065 = vadd.xlane.f32.xlu1 %v2064_v23  ;;  %5599 = vmatpush3.bf16.msra.mxu1 %v6032_v33  ;;  %v6033_v23 = vld [vmem:[%s8162_s11 + $0x8] sm:$0xff]  }
 0xf3f   :  { %5600 = vmatprep.subr.bf16.mxu1 %v6033_v23 }
 0xf40   :  { %2068 = vadd.xlane.f32.xlu0 %v2067_v14 }
 0xf41   :  { %v5596_v18 = vpop.f32.mrb[40].mxu0 }
 0xf42   :  { %v2021_v59 = vpop.f32.mrb[41].mxu0  ;;  %v2042_v25 = vadd.f32 %v5596_v18, %v6578_v29  ;;  %5601 = vmatpush3.bf16.msra.mxu1 %v6033_v23 }
 0xf43   :  { %v2040_v27 = vadd.f32 %v2021_v59, %v6547_v12  ;;  %v5597_v16 = vpop.f32.mrb[42].mxu0 }
 0xf44   :  { %2071 = vadd.xlane.f32.xlu0 %v2070_v51  ;;  %v2024_v35 = vpop.f32.mrb[43].mxu0  ;;  %v2043_v5 = vadd.f32 %v5597_v16, %v6586_v34  ;;  %v7186_v41 = vadd.f32 %v5108_v58, %v2042_v25 }
 0xf45   :  { %v7182_v26 = vadd.f32 %v5108_v58, %v2040_v27  ;;  %v2041_v22 = vadd.f32 %v2024_v35, %v6580_v30 }
 0xf46   :  { %v7192_v12 = vadd.f32 %v5108_v58, %v2043_v5  ;;  %v2079_v47 = vsel %vm155_vm3, %v7186_v41, 0.0 }
 0xf47   :  { %v7188_v61 = vadd.f32 %v5108_v58, %v2041_v22  ;;  %v2073_v29 = vsel %vm155_vm3, %v7182_v26, 0.0 }
 0xf48   :  { %2074 = vadd.xlane.f32.xlu1 %v2073_v29  ;;  %v2082_v30 = vsel %vm155_vm3, %v7192_v12, 0.0 }
 0xf49   :  { %v2076_v39 = vsel %vm155_vm3, %v7188_v61, 0.0 }
 0xf4a   :  { %2077 = vadd.xlane.f32.xlu0 %v2076_v39 }
 0xf4c   :  { %2080 = vadd.xlane.f32.xlu1 %v2079_v47 }
 0xf4e   :  { %2083 = vadd.xlane.f32.xlu0 %v2082_v30 }
 0xfc9   :  { %v2063_v34 = vpop.xlane.xlu0 %2062 }
 0xfca   :  { %v2085_v54 = vmul.f32 0.03125, %v2063_v34 }
 0xfcb   :  { %v2066_v48 = vpop.xlane.xlu1 %2065 }
 0xfcc   :  { %v7201_v57 = vsub.f32 %v7162_v3, %v2085_v54  ;;  %v2086_v6 = vmul.f32 0.03125, %v2066_v48  ;;  %v5109_v48 = vld [vmem:[%s8163_s9] ss:$0 sm:$0xff] }
 0xfcd   :  { %v2069_v49 = vpop.xlane.xlu0 %2068 }
 0xfce   :  { %v7204_v50 = vsub.f32 %v7168_v19, %v2086_v6  ;;  %v2087_v55 = vmul.f32 0.03125, %v2069_v49  ;;  %v2101_v0 = vmul.f32 %v7201_v57, %v7201_v57 }
 0xfd0   :  { %v7209_v53 = vsub.f32 %v7165_v60, %v2087_v55  ;;  %v2109_v43 = vsel %vm155_vm3, %v2101_v0, 0.0  ;;  %v2102_v63 = vmul.f32 %v7204_v50, %v7204_v50 }
 0xfd1   :  { %v2072_v4 = vpop.xlane.xlu0 %2071  ;;  %2110 = vadd.xlane.f32.xlu1 %v2109_v43 }
 0xfd2   :  { %v2088_v56 = vmul.f32 0.03125, %v2072_v4  ;;  %v2112_v52 = vsel %vm155_vm3, %v2102_v63, 0.0  ;;  %v2103_v42 = vmul.f32 %v7209_v53, %v7209_v53 }
 0xfd3   :  { %2113 = vadd.xlane.f32.xlu0 %v2112_v52 }
 0xfd4   :  { %v7218_v7 = vsub.f32 %v7174_v13, %v2088_v56  ;;  %v2115_v8 = vsel %vm155_vm3, %v2103_v42, 0.0 }
 0xfd5   :  { %2116 = vadd.xlane.f32.xlu1 %v2115_v8  ;;  %v2075_v28 = vpop.xlane.xlu1 %2074 }
 0xfd6   :  { %v2089_v31 = vmul.f32 0.03125, %v2075_v28  ;;  %v2104_v15 = vmul.f32 %v7218_v7, %v7218_v7 }
 0xfd7   :  { %v2078_v2 = vpop.xlane.xlu0 %2077 }
 0xfd8   :  { %v7224_v20 = vsub.f32 %v7182_v26, %v2089_v31  ;;  %v2090_v38 = vmul.f32 0.03125, %v2078_v2  ;;  %v2118_v36 = vsel %vm155_vm3, %v2104_v15, 0.0  ;;  %v5110_v15 = vld [vmem:[%s8164_s10] ss:$0 sm:$0xff] }
 0xfd9   :  { %v2081_v10 = vpop.xlane.xlu1 %2080  ;;  %2119 = vadd.xlane.f32.xlu0 %v2118_v36 }
 0xfda   :  { %v7228_v40 = vsub.f32 %v7188_v61, %v2090_v38  ;;  %v2091_v32 = vmul.f32 0.03125, %v2081_v10  ;;  %v2105_v37 = vmul.f32 %v7224_v20, %v7224_v20 }
 0xfdb   :  { %v2084_v24 = vpop.xlane.xlu0 %2083 }
 0xfdc   :  { %v7233_v17 = vsub.f32 %v7186_v41, %v2091_v32  ;;  %v2092_v44 = vmul.f32 0.03125, %v2084_v24  ;;  %v2121_v58 = vsel %vm155_vm3, %v2105_v37, 0.0  ;;  %v2106_v46 = vmul.f32 %v7228_v40, %v7228_v40 }
 0xfdd   :  { %2122 = vadd.xlane.f32.xlu1 %v2121_v58 }
 0xfde   :  { %v7239_v62 = vsub.f32 %v7192_v12, %v2092_v44  ;;  %v2124_v11 = vsel %vm155_vm3, %v2106_v46, 0.0  ;;  %v2107_v45 = vmul.f32 %v7233_v17, %v7233_v17 }
 0xfdf   :  { %2125 = vadd.xlane.f32.xlu0 %v2124_v11 }
 0xfe0   :  { %v2127_v1 = vsel %vm155_vm3, %v2107_v45, 0.0  ;;  %v2108_v9 = vmul.f32 %v7239_v62, %v7239_v62 }
 0xfe1   :  { %2128 = vadd.xlane.f32.xlu1 %v2127_v1 }
 0xfe2   :  { %v2130_v21 = vsel %vm155_vm3, %v2108_v9, 0.0 }
 0xfe3   :  { %2131 = vadd.xlane.f32.xlu0 %v2130_v21 }
0x105e   :  { %v2111_v14 = vpop.xlane.xlu1 %2110 }
0x105f   :  { %v2133_v18 = vmul.f32 0.03125, %v2111_v14 }
0x1060   :  { %v2114_v59 = vpop.xlane.xlu0 %2113 }
0x1061   :  { %v2141_v25 = vadd.f32 1e-05, %v2133_v18  ;;  %v2134_v27 = vmul.f32 0.03125, %v2114_v59 }
0x1062   :  { %v2117_v16 = vpop.xlane.xlu1 %2116 }
0x1063   :  { %6208 = vrsqrt.f32 %v2141_v25  ;;  %v2142_v51 = vadd.f32 1e-05, %v2134_v27  ;;  %v2135_v35 = vmul.f32 0.03125, %v2117_v16 }
0x1065   :  { %6210 = vrsqrt.f32 %v2142_v51  ;;  %v2143_v5 = vadd.f32 1e-05, %v2135_v35 }
0x1066   :  { %v2120_v22 = vpop.xlane.xlu0 %2119 }
0x1067   :  { %6212 = vrsqrt.f32 %v2143_v5  ;;  %v2136_v29 = vmul.f32 0.03125, %v2120_v22  ;;  %v6034_v5 = vld [vmem:[%s8165_s13] sm:$0xff]   ;;  %v6037_v22 = vld [vmem:[%s8165_s13 + $0x18] sm:$0xff]  }
0x1068   :  { %5610 = vmatprep.subr.bf16.mxu0 %v6034_v5 }
0x1069   :  { %v2144_v39 = vadd.f32 1e-05, %v2136_v29  ;;  %5611 = vmatpush3.bf16.msra.mxu0 %v6034_v5  ;;  %v6038_v29 = vld [vmem:[%s8165_s13 + $0x20] sm:$0xff]  }
0x106a   :  { %v2123_v47 = vpop.xlane.xlu1 %2122 }
0x106b   :  { %6214 = vrsqrt.f32 %v2144_v39  ;;  %v2137_v30 = vmul.f32 0.03125, %v2123_v47  ;;  %v6039_v39 = vld [vmem:[%s8165_s13 + $0x28] sm:$0xff]   ;;  %v6040_v47 = vld [vmem:[%s8165_s13 + $0x30] sm:$0xff]  }
0x106c   :  { %v2126_v34 = vpop.xlane.xlu0 %2125 }
0x106d   :  { %v6209_v54 = vpop.eup %6208  ;;  %v2145_v6 = vadd.f32 1e-05, %v2137_v30  ;;  %v2138_v49 = vmul.f32 0.03125, %v2126_v34  ;;  %v6041_v30 = vld [vmem:[%s8165_s13 + $0x38] sm:$0xff]   ;;  %v5111_v34 = vld [vmem:[%s8166_s12] ss:$0 sm:$0xff] }
0x106e   :  { %v2129_v55 = vpop.xlane.xlu1 %2128  ;;  %v2157_v0 = vmul.f32 %v6209_v54, %v7201_v57 }
0x106f   :  { %v6211_v43 = vpop.eup %6210  ;;  %6216 = vrsqrt.f32 %v2145_v6  ;;  %v2146_v63 = vadd.f32 1e-05, %v2138_v49  ;;  %v2139_v4 = vmul.f32 0.03125, %v2129_v55 }
0x1070   :  { %v2132_v56 = vpop.xlane.xlu0 %2131  ;;  %v2158_v52 = vmul.f32 %v6211_v43, %v7204_v50  ;;  %v2171_v42 = vmul.f32 %v5109_v48, %v2157_v0 }
0x1071   :  { %v6213_v8 = vpop.eup %6212  ;;  %6218 = vrsqrt.f32 %v2146_v63  ;;  %v2147_v28 = vadd.f32 1e-05, %v2139_v4  ;;  %v2140_v31 = vmul.f32 0.03125, %v2132_v56 }
0x1072   :  { %v2159_v2 = vmul.f32 %v6213_v8, %v7209_v53  ;;  %v2172_v38 = vmul.f32 %v5109_v48, %v2158_v52  ;;  %v2185_v36 = vadd.f32 %v5110_v15, %v2171_v42 }
0x1073   :  { %6220 = vrsqrt.f32 %v2147_v28  ;;  %v2148_v57 = vadd.f32 1e-05, %v2140_v31 }
0x1074   :  { %v2186_v10 = vadd.f32 %v5110_v15, %v2172_v38  ;;  %v2173_v37 = vmul.f32 %v5109_v48, %v2159_v2 }
0x1075   :  { %v6215_v32 = vpop.eup %6214  ;;  %6222 = vrsqrt.f32 %v2148_v57 }
0x1076   :  { %v2160_v50 = vmul.f32 %v6215_v32, %v7218_v7  ;;  %v2193_v24 = vpack.c.bf16 %v2186_v10, %v2185_v36  ;;  %v2187_v46 = vadd.f32 %v5110_v15, %v2173_v37 }
0x1078   :  { %v2174_v44 = vmul.f32 %v5109_v48, %v2160_v50  ;;  %5602 = vmatprep.mubr.msk.bf16.mxu1 %vm155_vm3, %v2193_v24 }
0x1079   :  { %v6217_v58 = vpop.eup %6216 }
0x107a   :  { %v2188_v11 = vadd.f32 %v5110_v15, %v2174_v44  ;;  %v2161_v45 = vmul.f32 %v6217_v58, %v7224_v20 }
0x107b   :  { %v6219_v53 = vpop.eup %6218 }
0x107c   :  { %v2194_v1 = vpack.c.bf16 %v2188_v11, %v2187_v46  ;;  %v2162_v9 = vmul.f32 %v6219_v53, %v7228_v40  ;;  %v2175_v21 = vmul.f32 %v5109_v48, %v2161_v45 }
0x107d   :  { %v6221_v33 = vpop.eup %6220 }
0x107e   :  { %5603 = vmatmul.mubr.msk.bf16.vlgmr.msra.gmra.mrb[40].mxu1 %vm155_vm3, %v2194_v1  ;;  %v2176_v23 = vmul.f32 %v5109_v48, %v2162_v9  ;;  %v2163_v7 = vmul.f32 %v6221_v33, %v7233_v17  ;;  %v2189_v18 = vadd.f32 %v5110_v15, %v2175_v21  ;;  %v6035_v17 = vld [vmem:[%s8165_s13 + $0x8] sm:$0xff]  }
0x107f   :  { %v6223_v14 = vpop.eup %6222  ;;  %5612 = vmatprep.subr.bf16.mxu0 %v6035_v17 }
0x1080   :  { %v2190_v59 = vadd.f32 %v5110_v15, %v2176_v23  ;;  %v2164_v25 = vmul.f32 %v6223_v14, %v7239_v62  ;;  %v2177_v27 = vmul.f32 %v5109_v48, %v2163_v7  ;;  %5613 = vmatpush3.bf16.msra.mxu0 %v6035_v17  ;;  %v6036_v62 = vld [vmem:[%s8165_s13 + $0x10] sm:$0xff]  }
0x1081   :  { %5614 = vmatprep.subr.bf16.mxu0 %v6036_v62 }
0x1082   :  { %v2195_v16 = vpack.c.bf16 %v2190_v59, %v2189_v18  ;;  %v2178_v51 = vmul.f32 %v5109_v48, %v2164_v25  ;;  %v2191_v20 = vadd.f32 %v5110_v15, %v2177_v27 }
0x1084   :  { %5606 = vmatprep.mubr.msk.bf16.mxu1 %vm155_vm3, %v2195_v16  ;;  %v2192_v35 = vadd.f32 %v5110_v15, %v2178_v51  ;;  %5615 = vmatpush3.bf16.msra.mxu0 %v6036_v62 }
0x1085   :  { %5616 = vmatprep.subr.bf16.mxu0 %v6037_v22 }
0x1086   :  { %v2196_v40 = vpack.c.bf16 %v2192_v35, %v2191_v20 }
0x1088   :  { %5607 = vmatmul.mubr.msk.bf16.gmra.mrb[44].mxu1 %vm155_vm3, %v2196_v40  ;;  %5617 = vmatpush3.bf16.msra.mxu0 %v6037_v22 }
0x1089   :  { %5618 = vmatprep.subr.bf16.mxu0 %v6038_v29 }
0x108c   :  { %5619 = vmatpush3.bf16.msra.mxu0 %v6038_v29 }
0x108d   :  { %5620 = vmatprep.subr.bf16.mxu0 %v6039_v39 }
0x1090   :  { %5621 = vmatpush3.bf16.msra.mxu0 %v6039_v39 }
0x1091   :  { %5622 = vmatprep.subr.bf16.mxu0 %v6040_v47 }
0x1094   :  { %5623 = vmatpush3.bf16.msra.mxu0 %v6040_v47 }
0x1095   :  { %5624 = vmatprep.subr.bf16.mxu0 %v6041_v30 }
0x1098   :  { %5625 = vmatpush3.bf16.msra.mxu0 %v6041_v30 }
0x1151   :  { %v5604_v54 = vpop.f32.mrb[40].mxu1 }
0x1152   :  { %v7299_v48 = vadd.f32 %v5604_v54, %v5111_v34  ;;  %v2266_v6 = vpop.f32.mrb[41].mxu1 }
0x1153   :  { %v7301_v49 = vadd.f32 %v5111_v34, %v2266_v6  ;;  %v5605_v55 = vpop.f32.mrb[42].mxu1 }
0x1154   :  { %v2299_v0 = vmul.f32 %v7299_v48, %v7299_v48  ;;  %v7305_v43 = vadd.f32 %v5605_v55, %v5111_v34  ;;  %v2269_v63 = vpop.f32.mrb[43].mxu1 }
0x1155   :  { %v2297_v4 = vmul.f32 %v7301_v49, %v7301_v49  ;;  %v7309_v56 = vadd.f32 %v5111_v34, %v2269_v63 }
0x1156   :  { %v2307_v52 = vmul.f32 %v2299_v0, %v7299_v48  ;;  %v2300_v42 = vmul.f32 %v7305_v43, %v7305_v43 }
0x1157   :  { %v2305_v8 = vmul.f32 %v2297_v4, %v7301_v49  ;;  %v2298_v28 = vmul.f32 %v7309_v56, %v7309_v56 }
0x1158   :  { %v2315_v31 = vmul.f32 0.044715, %v2307_v52  ;;  %v2308_v15 = vmul.f32 %v2300_v42, %v7305_v43 }
0x1159   :  { %v2313_v2 = vmul.f32 0.044715, %v2305_v8  ;;  %v2306_v38 = vmul.f32 %v2298_v28, %v7309_v56 }
0x115a   :  { %v2323_v57 = vadd.f32 %v2315_v31, %v7299_v48  ;;  %v2316_v36 = vmul.f32 0.044715, %v2308_v15 }
0x115b   :  { %v2321_v10 = vadd.f32 %v2313_v2, %v7301_v49  ;;  %v2314_v32 = vmul.f32 0.044715, %v2306_v38  ;;  %v5608_v37 = vpop.f32.mrb[44].mxu1 }
0x115c   :  { %v2331_v50 = vmul.f32 0.7978846, %v2323_v57  ;;  %v2324_v24 = vadd.f32 %v2316_v36, %v7305_v43  ;;  %v7322_v44 = vadd.f32 %v5608_v37, %v5111_v34  ;;  %v2282_v58 = vpop.f32.mrb[45].mxu1 }
0x115d   :  { %v2329_v46 = vmul.f32 0.7978846, %v2321_v10  ;;  %v2322_v11 = vadd.f32 %v2314_v32, %v7309_v56  ;;  %v7325_v45 = vadd.f32 %v5111_v34, %v2282_v58  ;;  %v5609_v53 = vpop.f32.mrb[46].mxu1 }
0x115e   :  { %6224 = vtanh.f32 %v2331_v50  ;;  %v2332_v1 = vmul.f32 0.7978846, %v2324_v24  ;;  %v2303_v9 = vmul.f32 %v7322_v44, %v7322_v44  ;;  %v7329_v21 = vadd.f32 %v5609_v53, %v5111_v34  ;;  %v2285_v33 = vpop.f32.mrb[47].mxu1 }
0x115f   :  { %6226 = vtanh.f32 %v2329_v46  ;;  %v2330_v23 = vmul.f32 0.7978846, %v2322_v11  ;;  %v2301_v7 = vmul.f32 %v7325_v45, %v7325_v45  ;;  %v2286_v14 = vadd.f32 %v5111_v34, %v2285_v33 }
0x1160   :  { %6228 = vtanh.f32 %v2332_v1  ;;  %v2311_v18 = vmul.f32 %v2303_v9, %v7322_v44  ;;  %v2304_v59 = vmul.f32 %v7329_v21, %v7329_v21 }
0x1161   :  { %6230 = vtanh.f32 %v2330_v23  ;;  %v2309_v25 = vmul.f32 %v2301_v7, %v7325_v45  ;;  %v2302_v27 = vmul.f32 %v2286_v14, %v2286_v14 }
0x1162   :  { %v2319_v16 = vmul.f32 0.044715, %v2311_v18  ;;  %v2312_v51 = vmul.f32 %v2304_v59, %v7329_v21 }
0x1163   :  { %v2317_v20 = vmul.f32 0.044715, %v2309_v25  ;;  %v2310_v35 = vmul.f32 %v2302_v27, %v2286_v14  ;;  %v5126_v27 = vld [vmem:[%s8167_s14] ss:$0 sm:$0xff] }
0x1164   :  { %v2327_v40 = vadd.f32 %v2319_v16, %v7322_v44  ;;  %v2320_v5 = vmul.f32 0.044715, %v2312_v51 }
0x1165   :  { %v2325_v17 = vadd.f32 %v2317_v20, %v7325_v45  ;;  %v2318_v62 = vmul.f32 0.044715, %v2310_v35 }
0x1166   :  { %v2335_v22 = vmul.f32 0.7978846, %v2327_v40  ;;  %v2328_v29 = vadd.f32 %v2320_v5, %v7329_v21 }
0x1167   :  { %v2333_v39 = vmul.f32 0.7978846, %v2325_v17  ;;  %v2326_v47 = vadd.f32 %v2318_v62, %v2286_v14 }
0x1168   :  { %v6225_v30 = vpop.eup %6224  ;;  %6232 = vtanh.f32 %v2335_v22  ;;  %v2336_v34 = vmul.f32 0.7978846, %v2328_v29 }
0x1169   :  { %v6227_v54 = vpop.eup %6226  ;;  %v2347_v6 = vadd.f32 1.0, %v6225_v30  ;;  %6234 = vtanh.f32 %v2333_v39  ;;  %v2334_v55 = vmul.f32 0.7978846, %v2326_v47 }
0x116a   :  { %v6229_v0 = vpop.eup %6228  ;;  %6236 = vtanh.f32 %v2336_v34  ;;  %v2345_v63 = vadd.f32 1.0, %v6227_v54 }
0x116b   :  { %v6231_v4 = vpop.eup %6230  ;;  %v2355_v52 = vmul.f32 0.5, %v2347_v6  ;;  %v2348_v42 = vadd.f32 1.0, %v6229_v0  ;;  %6238 = vtanh.f32 %v2334_v55 }
0x116c   :  { %v2346_v8 = vadd.f32 1.0, %v6231_v4  ;;  %v2353_v28 = vmul.f32 0.5, %v2345_v63 }
0x116d   :  { %v2356_v31 = vmul.f32 0.5, %v2348_v42  ;;  %v2363_v2 = vmul.f32 %v2355_v52, %v7299_v48 }
0x116e   :  { %v2354_v15 = vmul.f32 0.5, %v2346_v8  ;;  %v2361_v57 = vmul.f32 %v2353_v28, %v7301_v49 }
0x116f   :  { %v2364_v38 = vmul.f32 %v2356_v31, %v7305_v43 }
0x1170   :  { %v2362_v36 = vmul.f32 %v2354_v15, %v7309_v56 }
0x1171   :  { %v2370_v10 = vpack.c.bf16 %v2364_v38, %v2363_v2 }
0x1172   :  { %v6233_v32 = vpop.eup %6232  ;;  %v2369_v37 = vpack.c.bf16 %v2362_v36, %v2361_v57 }
0x1173   :  { %v6235_v50 = vpop.eup %6234  ;;  %v2351_v24 = vadd.f32 1.0, %v6233_v32 }
0x1174   :  { %v6237_v58 = vpop.eup %6236  ;;  %5626 = vmatprep.mubr.bf16.mxu0 %v2369_v37  ;;  %v2349_v46 = vadd.f32 1.0, %v6235_v50 }
0x1175   :  { %v6239_v11 = vpop.eup %6238  ;;  %5627 = vmatmul.mubr.bf16.vlgmr.msra.gmra.mrb[44].mxu0 %v2370_v10  ;;  %v2352_v53 = vadd.f32 1.0, %v6237_v58  ;;  %v2359_v1 = vmul.f32 0.5, %v2351_v24 }
0x1176   :  { %v2350_v9 = vadd.f32 1.0, %v6239_v11  ;;  %v2357_v48 = vmul.f32 0.5, %v2349_v46 }
0x1177   :  { %v2360_v33 = vmul.f32 0.5, %v2352_v53  ;;  %v2367_v49 = vmul.f32 %v2359_v1, %v7322_v44 }
0x1178   :  { %v2358_v43 = vmul.f32 0.5, %v2350_v9  ;;  %v2365_v23 = vmul.f32 %v2357_v48, %v7325_v45 }
0x1179   :  { %v2368_v56 = vmul.f32 %v2360_v33, %v7329_v21 }
0x117a   :  { %v2366_v7 = vmul.f32 %v2358_v43, %v2286_v14 }
0x117b   :  { %v2372_v18 = vpack.c.bf16 %v2368_v56, %v2367_v49 }
0x117c   :  { %v2371_v59 = vpack.c.bf16 %v2366_v7, %v2365_v23 }
0x117e   :  { %5630 = vmatprep.mubr.bf16.mxu0 %v2371_v59 }
0x117f   :  { %5631 = vmatmul.mubr.bf16.gmra.mrb[48].mxu0 %v2372_v18 }
0x1248   :  { %v5628_v25 = vpop.f32.mrb[44].mxu0 }
0x1249   :  { %v2471_v16 = vpop.f32.mrb[45].mxu0  ;;  %v2504_v51 = vadd.f32 %v5628_v25, %v7165_v60 }
0x124a   :  { %v2502_v20 = vadd.f32 %v2471_v16, %v7162_v3  ;;  %v5629_v44 = vpop.f32.mrb[46].mxu0 }
0x124b   :  { %v2474_v35 = vpop.f32.mrb[47].mxu0  ;;  %v2505_v45 = vadd.f32 %v5629_v44, %v7174_v13  ;;  %v7357_v40 = vadd.f32 %v5126_v27, %v2504_v51 }
0x124c   :  { %v7353_v21 = vadd.f32 %v5126_v27, %v2502_v20  ;;  %v2503_v14 = vadd.f32 %v2474_v35, %v7168_v19 }
0x124d   :  { %v7363_v62 = vadd.f32 %v5126_v27, %v2505_v45  ;;  %v2535_v13 = vsel %vm155_vm3, %v7357_v40, 0.0 }
0x124e   :  { %v7359_v5 = vadd.f32 %v5126_v27, %v2503_v14  ;;  %v2529_v17 = vsel %vm155_vm3, %v7353_v21, 0.0 }
0x124f   :  { %2530 = vadd.xlane.f32.xlu1 %v2529_v17  ;;  %v2538_v47 = vsel %vm155_vm3, %v7363_v62, 0.0  ;;  %v6042_v17 = vld [vmem:[%s8156_s5 + $0x10] sm:$0xff]  }
0x1250   :  { %v2532_v3 = vsel %vm155_vm3, %v7359_v5, 0.0  ;;  %5634 = vmatprep.subr.bf16.mxu1 %v6042_v17 }
0x1251   :  { %2533 = vadd.xlane.f32.xlu0 %v2532_v3  ;;  %5635 = vmatpush3.bf16.msra.mxu1 %v6042_v17  ;;  %v6043_v3 = vld [vmem:[%s8156_s5 + $0x18] sm:$0xff]  }
0x1252   :  { %v5632_v60 = vpop.f32.mrb[48].mxu0  ;;  %5636 = vmatprep.subr.bf16.mxu1 %v6043_v3 }
0x1253   :  { %2536 = vadd.xlane.f32.xlu1 %v2535_v13  ;;  %v2487_v19 = vpop.f32.mrb[49].mxu0  ;;  %v2508_v22 = vadd.f32 %v5632_v60, %v7186_v41 }
0x1254   :  { %v2506_v29 = vadd.f32 %v2487_v19, %v7182_v26  ;;  %v5633_v39 = vpop.f32.mrb[50].mxu0 }
0x1255   :  { %2539 = vadd.xlane.f32.xlu0 %v2538_v47  ;;  %v2490_v30 = vpop.f32.mrb[51].mxu0  ;;  %v2509_v54 = vadd.f32 %v5633_v39, %v7192_v12  ;;  %v7377_v55 = vadd.f32 %v5126_v27, %v2508_v22  ;;  %5637 = vmatpush3.bf16.msra.mxu1 %v6043_v3 }
0x1256   :  { %v7373_v34 = vadd.f32 %v5126_v27, %v2506_v29  ;;  %v2507_v6 = vadd.f32 %v2490_v30, %v7188_v61 }
0x1257   :  { %v7383_v26 = vadd.f32 %v5126_v27, %v2509_v54  ;;  %v2547_v4 = vsel %vm155_vm3, %v7377_v55, 0.0 }
0x1258   :  { %v7379_v0 = vadd.f32 %v5126_v27, %v2507_v6  ;;  %v2541_v41 = vsel %vm155_vm3, %v7373_v34, 0.0 }
0x1259   :  { %2542 = vadd.xlane.f32.xlu1 %v2541_v41  ;;  %v2550_v61 = vsel %vm155_vm3, %v7383_v26, 0.0 }
0x125a   :  { %v2544_v63 = vsel %vm155_vm3, %v7379_v0, 0.0 }
0x125b   :  { %2545 = vadd.xlane.f32.xlu0 %v2544_v63 }
0x125d   :  { %2548 = vadd.xlane.f32.xlu1 %v2547_v4 }
0x125f   :  { %2551 = vadd.xlane.f32.xlu0 %v2550_v61 }
0x12dc   :  { %v2531_v12 = vpop.xlane.xlu1 %2530 }
0x12dd   :  { %v2553_v52 = vmul.f32 0.03125, %v2531_v12 }
0x12de   :  { %v2534_v42 = vpop.xlane.xlu0 %2533 }
0x12df   :  { %v7392_v8 = vsub.f32 %v7353_v21, %v2553_v52  ;;  %v2554_v28 = vmul.f32 0.03125, %v2534_v42 }
0x12e0   :  { %v2537_v31 = vpop.xlane.xlu1 %2536 }
0x12e1   :  { %v7395_v15 = vsub.f32 %v7359_v5, %v2554_v28  ;;  %v2555_v2 = vmul.f32 0.03125, %v2537_v31  ;;  %v2569_v38 = vmul.f32 %v7392_v8, %v7392_v8 }
0x12e2   :  { %v2540_v57 = vpop.xlane.xlu0 %2539 }
0x12e3   :  { %v7400_v36 = vsub.f32 %v7357_v40, %v2555_v2  ;;  %v2556_v10 = vmul.f32 0.03125, %v2540_v57  ;;  %v2577_v32 = vsel %vm155_vm3, %v2569_v38, 0.0  ;;  %v2570_v37 = vmul.f32 %v7395_v15, %v7395_v15  ;;  %v5129_v2 = vld [vmem:[%s8157_s3 + $0x1] ss:$0 sm:$0xff] }
0x12e4   :  { %2578 = vadd.xlane.f32.xlu1 %v2577_v32 }
0x12e5   :  { %v7406_v50 = vsub.f32 %v7363_v62, %v2556_v10  ;;  %v2580_v24 = vsel %vm155_vm3, %v2570_v37, 0.0  ;;  %v2571_v58 = vmul.f32 %v7400_v36, %v7400_v36 }
0x12e6   :  { %v2543_v46 = vpop.xlane.xlu1 %2542  ;;  %2581 = vadd.xlane.f32.xlu0 %v2580_v24 }
0x12e7   :  { %v2557_v11 = vmul.f32 0.03125, %v2543_v46  ;;  %v2583_v53 = vsel %vm155_vm3, %v2571_v58, 0.0  ;;  %v2572_v1 = vmul.f32 %v7406_v50, %v7406_v50 }
0x12e8   :  { %2584 = vadd.xlane.f32.xlu1 %v2583_v53  ;;  %v2546_v9 = vpop.xlane.xlu0 %2545 }
0x12e9   :  { %v7415_v48 = vsub.f32 %v7373_v34, %v2557_v11  ;;  %v2558_v33 = vmul.f32 0.03125, %v2546_v9  ;;  %v2586_v43 = vsel %vm155_vm3, %v2572_v1, 0.0  ;;  %v5130_v1 = vld [vmem:[%s8158_s4 + $0x1] ss:$0 sm:$0xff] }
0x12ea   :  { %v2549_v49 = vpop.xlane.xlu1 %2548  ;;  %2587 = vadd.xlane.f32.xlu0 %v2586_v43 }
0x12eb   :  { %v7419_v56 = vsub.f32 %v7379_v0, %v2558_v33  ;;  %v2559_v23 = vmul.f32 0.03125, %v2549_v49  ;;  %v2573_v7 = vmul.f32 %v7415_v48, %v7415_v48 }
0x12ec   :  { %v2552_v18 = vpop.xlane.xlu0 %2551 }
0x12ed   :  { %v7424_v59 = vsub.f32 %v7377_v55, %v2559_v23  ;;  %v2560_v25 = vmul.f32 0.03125, %v2552_v18  ;;  %v2589_v27 = vsel %vm155_vm3, %v2573_v7, 0.0  ;;  %v2574_v16 = vmul.f32 %v7419_v56, %v7419_v56 }
0x12ee   :  { %2590 = vadd.xlane.f32.xlu1 %v2589_v27 }
0x12ef   :  { %v7430_v51 = vsub.f32 %v7383_v26, %v2560_v25  ;;  %v2592_v20 = vsel %vm155_vm3, %v2574_v16, 0.0  ;;  %v2575_v44 = vmul.f32 %v7424_v59, %v7424_v59 }
0x12f0   :  { %2593 = vadd.xlane.f32.xlu0 %v2592_v20 }
0x12f1   :  { %v2595_v35 = vsel %vm155_vm3, %v2575_v44, 0.0  ;;  %v2576_v45 = vmul.f32 %v7430_v51, %v7430_v51 }
0x12f2   :  { %2596 = vadd.xlane.f32.xlu1 %v2595_v35 }
0x12f3   :  { %v2598_v14 = vsel %vm155_vm3, %v2576_v45, 0.0 }
0x12f4   :  { %2599 = vadd.xlane.f32.xlu0 %v2598_v14 }
0x1371   :  { %v2579_v60 = vpop.xlane.xlu1 %2578 }
0x1372   :  { %v2601_v13 = vmul.f32 0.03125, %v2579_v60 }
0x1373   :  { %v2582_v19 = vpop.xlane.xlu0 %2581 }
0x1374   :  { %v2609_v22 = vadd.f32 1e-05, %v2601_v13  ;;  %v2602_v29 = vmul.f32 0.03125, %v2582_v19 }
0x1375   :  { %v2585_v39 = vpop.xlane.xlu1 %2584 }
0x1376   :  { %6240 = vrsqrt.f32 %v2609_v22  ;;  %v2610_v47 = vadd.f32 1e-05, %v2602_v29  ;;  %v2603_v30 = vmul.f32 0.03125, %v2585_v39 }
0x1377   :  { %v2588_v54 = vpop.xlane.xlu0 %2587 }
0x1378   :  { %6242 = vrsqrt.f32 %v2610_v47  ;;  %v2611_v6 = vadd.f32 1e-05, %v2603_v30  ;;  %v2604_v41 = vmul.f32 0.03125, %v2588_v54  ;;  %v5136_v54 = vld [vmem:[%s8159_s6 + $0x1] ss:$0 sm:$0xff]  ;;  %s8197_s6 = smov 48  }
0x137a   :  { %6244 = vrsqrt.f32 %v2611_v6  ;;  %v2612_v63 = vadd.f32 1e-05, %v2604_v41 }
0x137b   :  { %v2591_v4 = vpop.xlane.xlu1 %2590 }
0x137c   :  { %6246 = vrsqrt.f32 %v2612_v63  ;;  %v2605_v61 = vmul.f32 0.03125, %v2591_v4 }
0x137d   :  { %v2594_v12 = vpop.xlane.xlu0 %2593 }
0x137e   :  { %v2613_v52 = vadd.f32 1e-05, %v2605_v61  ;;  %v2606_v42 = vmul.f32 0.03125, %v2594_v12 }
0x137f   :  { %v2597_v28 = vpop.xlane.xlu1 %2596 }
0x1380   :  { %v6241_v31 = vpop.eup %6240  ;;  %6248 = vrsqrt.f32 %v2613_v52  ;;  %v2614_v38 = vadd.f32 1e-05, %v2606_v42  ;;  %v2607_v57 = vmul.f32 0.03125, %v2597_v28 }
0x1381   :  { %v2600_v10 = vpop.xlane.xlu0 %2599  ;;  %v2625_v32 = vmul.f32 %v6241_v31, %v7392_v8 }
0x1382   :  { %v6243_v37 = vpop.eup %6242  ;;  %6250 = vrsqrt.f32 %v2614_v38  ;;  %v2615_v24 = vadd.f32 1e-05, %v2607_v57  ;;  %v2608_v58 = vmul.f32 0.03125, %v2600_v10 }
0x1383   :  { %v2626_v46 = vmul.f32 %v6243_v37, %v7395_v15  ;;  %v2639_v11 = vmul.f32 %v5129_v2, %v2625_v32 }
0x1384   :  { %v6245_v53 = vpop.eup %6244  ;;  %6252 = vrsqrt.f32 %v2615_v24  ;;  %v2616_v9 = vadd.f32 1e-05, %v2608_v58 }
0x1385   :  { %v2627_v33 = vmul.f32 %v6245_v53, %v7400_v36  ;;  %v2640_v43 = vmul.f32 %v5129_v2, %v2626_v46  ;;  %v2653_v7 = vadd.f32 %v5130_v1, %v2639_v11 }
0x1386   :  { %v6247_v49 = vpop.eup %6246  ;;  %6254 = vrsqrt.f32 %v2616_v9 }
0x1387   :  { %v2641_v8 = vmul.f32 %v5129_v2, %v2627_v33  ;;  %v2628_v23 = vmul.f32 %v6247_v49, %v7406_v50  ;;  %v2654_v18 = vadd.f32 %v5130_v1, %v2640_v43 }
0x1389   :  { %v2642_v25 = vmul.f32 %v5129_v2, %v2628_v23  ;;  %v2661_v15 = vpack.c.bf16 %v2654_v18, %v2653_v7  ;;  %v2655_v16 = vadd.f32 %v5130_v1, %v2641_v8 }
0x138a   :  { %v6249_v27 = vpop.eup %6248 }
0x138b   :  { %v2656_v20 = vadd.f32 %v5130_v1, %v2642_v25  ;;  %5638 = vmatprep.mubr.msk.bf16.mxu1 %vm155_vm3, %v2661_v15  ;;  %v2629_v44 = vmul.f32 %v6249_v27, %v7415_v48 }
0x138c   :  { %v6251_v35 = vpop.eup %6250 }
0x138d   :  { %v2662_v45 = vpack.c.bf16 %v2656_v20, %v2655_v16  ;;  %v2630_v36 = vmul.f32 %v6251_v35, %v7419_v56  ;;  %v2643_v14 = vmul.f32 %v5129_v2, %v2629_v44 }
0x138e   :  { %v6253_v17 = vpop.eup %6252 }
0x138f   :  { %5639 = vmatmul.mubr.msk.bf16.vlgmr.msra.gmra.mrb[48].mxu1 %vm155_vm3, %v2662_v45  ;;  %v2644_v50 = vmul.f32 %v5129_v2, %v2630_v36  ;;  %v2631_v3 = vmul.f32 %v6253_v17, %v7424_v59  ;;  %v2657_v13 = vadd.f32 %v5130_v1, %v2643_v14 }
0x1390   :  { %v6255_v60 = vpop.eup %6254 }
0x1391   :  { %v2658_v19 = vadd.f32 %v5130_v1, %v2644_v50  ;;  %v2632_v22 = vmul.f32 %v6255_v60, %v7430_v51  ;;  %v2645_v29 = vmul.f32 %v5129_v2, %v2631_v3 }
0x1393   :  { %v2663_v39 = vpack.c.bf16 %v2658_v19, %v2657_v13  ;;  %v2646_v47 = vmul.f32 %v5129_v2, %v2632_v22  ;;  %v2659_v48 = vadd.f32 %v5130_v1, %v2645_v29 }
0x1395   :  { %5642 = vmatprep.mubr.msk.bf16.mxu1 %vm155_vm3, %v2663_v39  ;;  %v2660_v30 = vadd.f32 %v5130_v1, %v2646_v47 }
0x1397   :  { %v2664_v56 = vpack.c.bf16 %v2660_v30, %v2659_v48 }
0x1399   :  { %5643 = vmatmul.mubr.msk.bf16.gmra.mrb[52].mxu1 %vm155_vm3, %v2664_v56 }
0x1462   :  { %v5640_v59 = vpop.f32.mrb[48].mxu1 }
0x1463   :  { %v2745_v6 = vadd.f32 %v5640_v59, %v5136_v54  ;;  %v2736_v41 = vpop.f32.mrb[49].mxu1 }
0x1464   :  { %v2737_v63 = vadd.f32 %v5136_v54, %v2736_v41  ;;  %v5641_v4 = vpop.f32.mrb[50].mxu1 }
0x1465   :  { %v2748_v51 = vadd.f32 %v5641_v4, %v5136_v54  ;;  %v2739_v61 = vpop.f32.mrb[51].mxu1  ;;  %v2769_v52 = vmul.f32 0.35355338, %v2745_v6 }
0x1466   :  { %v2740_v12 = vadd.f32 %v5136_v54, %v2739_v61  ;;  %v2767_v31 = vmul.f32 0.35355338, %v2737_v63 }
0x1467   :  { %v2770_v42 = vmul.f32 0.35355338, %v2748_v51  ;;  %v7466_v28 = vpack.c.bf16 %v2748_v51, %v2745_v6 }
0x1468   :  { %v2768_v2 = vmul.f32 0.35355338, %v2740_v12  ;;  %v7468_v38 = vpack.c.bf16 %v2740_v12, %v2737_v63 }
0x1469   :  { %v7470_v57 = vpack.c.bf16 %v2770_v42, %v2769_v52  ;;  %2787 = vrot.lane.b32.xlu0 %v7466_v28, %s6421_s20 }
0x146a   :  { %v7474_v10 = vpack.c.bf16 %v2768_v2, %v2767_v31  ;;  %2785 = vrot.lane.b32.xlu1 %v7468_v38, %s6421_s20 }
0x146c   :  { %v5644_v32 = vpop.f32.mrb[52].mxu1  ;;  %5650 = vmatprep.mubr.msk.bf16.mxu1 %vm415_vm4, %v7474_v10 }
0x146d   :  { %v2761_v37 = vadd.f32 %v5644_v32, %v5136_v54  ;;  %v2752_v24 = vpop.f32.mrb[53].mxu1 }
0x146e   :  { %v2753_v58 = vadd.f32 %v5136_v54, %v2752_v24  ;;  %v5645_v46 = vpop.f32.mrb[54].mxu1 }
0x146f   :  { %v2764_v11 = vadd.f32 %v5645_v46, %v5136_v54  ;;  %v2755_v53 = vpop.f32.mrb[55].mxu1  ;;  %v2773_v9 = vmul.f32 0.35355338, %v2761_v37 }
0x1470   :  { %v2756_v1 = vadd.f32 %v5136_v54, %v2755_v53  ;;  %v2771_v49 = vmul.f32 0.35355338, %v2753_v58 }
0x1471   :  { %v2774_v33 = vmul.f32 0.35355338, %v2764_v11  ;;  %v7480_v43 = vpack.c.bf16 %v2764_v11, %v2761_v37 }
0x1472   :  { %v2772_v8 = vmul.f32 0.35355338, %v2756_v1  ;;  %v7482_v23 = vpack.c.bf16 %v2756_v1, %v2753_v58 }
0x1473   :  { %v7484_v7 = vpack.c.bf16 %v2774_v33, %v2773_v9 }
0x1474   :  { %v7486_v18 = vpack.c.bf16 %v2772_v8, %v2771_v49  ;;  %2852 = vrot.lane.b32.xlu1 %v7482_v23, %s6421_s20 }
0x1476   :  { %5658 = vmatprep.mubr.msk.bf16.mxu0 %vm415_vm4, %v7486_v18 }
0x1478   :  { %2854 = vrot.lane.b32.xlu1 %v7480_v43, %s6421_s20 }
0x147c   :  { %3009 = vrot.lane.b32.xlu1 %v7468_v38, %s6422_s23 }
0x14db   :  { %v2788_v27 = vpop.permute.xlu0 %2787 }
0x14dc   :  { %v2786_v25 = vpop.permute.xlu1 %2785  ;;  %v2799_v16 = vsel %vm415_vm4, %v2788_v27, 0 }
0x14dd   :  { %5858 = vmatprep.subr.msk.bf16.mxu1 %vm415_vm4, %v2786_v25  ;;  %v2796_v15 = vsel %vm415_vm4, %v2786_v25, 0 }
0x14de   :  { %5647 = vmatpush3.bf16.xpose.msra.mxu1 %v2796_v15 }
0x14df   :  { %5859 = vmatprep.subr.msk.bf16.mxu1 %vm415_vm4, %v2788_v27 }
0x14e6   :  { %v2853_v20 = vpop.permute.xlu1 %2852  ;;  %5649 = vmatpush3.bf16.xpose.msra.mxu1 %v2799_v16 }
0x14e7   :  { %5860 = vmatprep.subr.msk.bf16.mxu0 %vm415_vm4, %v2853_v20  ;;  %v2863_v44 = vsel %vm415_vm4, %v2853_v20, 0 }
0x14e8   :  { %5655 = vmatpush3.bf16.xpose.msra.mxu0 %v2863_v44 }
0x14ea   :  { %v2855_v35 = vpop.permute.xlu1 %2854 }
0x14eb   :  { %5861 = vmatprep.subr.msk.bf16.mxu0 %vm415_vm4, %v2855_v35  ;;  %v2866_v36 = vsel %vm415_vm4, %v2855_v35, 0 }
0x14ed   :  { %5651 = vmatmul.mubr.msk.bf16.vlgmr.msra.gmra.mrb[56].mxu1 %vm415_vm4, %v7470_v57 }
0x14ee   :  { %v3010_v45 = vpop.permute.xlu1 %3009 }
0x14ef   :  { %5662 = vmatprep.subr.bf16.mxu1 %v3010_v45 }
0x14f0   :  { %5657 = vmatpush3.bf16.xpose.msra.mxu0 %v2866_v36  ;;  %5663 = vmatpush3.bf16.msra.mxu1 %v3010_v45 }
0x14f7   :  { %5659 = vmatmul.mubr.msk.bf16.vlgmr.msra.gmra.mrb[52].mxu0 %vm415_vm4, %v7484_v7 }
0x15c0   :  { %v5652_v14 = vpop.f32.mrb[56].mxu1 }
0x15c1   :  { %v2835_v17 = vpop.f32.mrb[57].mxu1  ;;  %v2923_v50 = vsel %vm155_vm3, %v5652_v14, -inf }
0x15c2   :  { %2924 = vmax.xlane.f32.xlu0 %v2923_v50  ;;  %v5653_v3 = vpop.f32.mrb[58].mxu1  ;;  %v2917_v19 = vsel %vm155_vm3, %v2835_v17, -inf }
0x15c3   :  { %v2838_v60 = vpop.f32.mrb[59].mxu1  ;;  %v2926_v22 = vsel %vm155_vm3, %v5653_v3, -inf }
0x15c4   :  { %v2920_v13 = vsel %vm155_vm3, %v2838_v60, -inf }
0x15c5   :  { %2921 = vmax.xlane.f32.xlu1 %v2920_v13 }
0x15c6   :  { %2918 = vmax.xlane.f32.xlu0 %v2917_v19 }
0x15ca   :  { %v5660_v29 = vpop.f32.mrb[52].mxu0  ;;  %2927 = vmax.xlane.f32.xlu0 %v2926_v22 }
0x15cb   :  { %v2902_v39 = vpop.f32.mrb[53].mxu0  ;;  %v2935_v47 = vsel %vm155_vm3, %v5660_v29, -inf }
0x15cc   :  { %v5661_v48 = vpop.f32.mrb[54].mxu0  ;;  %2936 = vmax.xlane.f32.xlu1 %v2935_v47  ;;  %v2929_v54 = vsel %vm155_vm3, %v2902_v39, -inf }
0x15cd   :  { %v2905_v30 = vpop.f32.mrb[55].mxu0  ;;  %v2938_v56 = vsel %vm155_vm3, %v5661_v48, -inf }
0x15ce   :  { %2939 = vmax.xlane.f32.xlu0 %v2938_v56  ;;  %v2932_v59 = vsel %vm155_vm3, %v2905_v30, -inf }
0x15d0   :  { %2930 = vmax.xlane.f32.xlu1 %v2929_v54 }
0x15d2   :  { %2933 = vmax.xlane.f32.xlu0 %v2932_v59 }
0x15e1   :  { %3070 = vrot.lane.b32.xlu1 %v7482_v23, %s6422_s23 }
0x15e5   :  { %3072 = vrot.lane.b32.xlu1 %v7480_v43, %s6422_s23 }
0x15e8   :  { %3011 = vrot.lane.b32.xlu0 %v7466_v28, %s6422_s23 }
0x164f   :  { %v2925_v6 = vpop.xlane.xlu0 %2924 }
0x1650   :  { %v2943_v41 = vsub.f32 %v5652_v14, %v2925_v6 }
0x1652   :  { %v2953_v63 = vmul.f32 1.442695, %v2943_v41  ;;  %v2922_v4 = vpop.xlane.xlu1 %2921 }
0x1653   :  { %v2919_v51 = vpop.xlane.xlu0 %2918  ;;  %v2942_v12 = vsub.f32 %v2838_v60, %v2922_v4 }
0x1654   :  { %6256 = vpow2.f32 %v2953_v63  ;;  %v2941_v61 = vsub.f32 %v2835_v17, %v2919_v51 }
0x1655   :  { %v2951_v32 = vmul.f32 1.442695, %v2942_v12 }
0x1656   :  { %v2949_v52 = vmul.f32 1.442695, %v2941_v61 }
0x1657   :  { %v2928_v42 = vpop.xlane.xlu0 %2927 }
0x1658   :  { %6258 = vpow2.f32 %v2949_v52  ;;  %v2944_v31 = vsub.f32 %v5653_v3, %v2928_v42 }
0x1659   :  { %v2937_v2 = vpop.xlane.xlu1 %2936 }
0x165a   :  { %v2955_v37 = vmul.f32 1.442695, %v2944_v31  ;;  %v2947_v16 = vsub.f32 %v5660_v29, %v2937_v2 }
0x165b   :  { %v2940_v24 = vpop.xlane.xlu0 %2939 }
0x165c   :  { %6260 = vpow2.f32 %v2955_v37  ;;  %v2961_v20 = vmul.f32 1.442695, %v2947_v16  ;;  %v2948_v35 = vsub.f32 %v5661_v48, %v2940_v24 }
0x165d   :  { %6262 = vpow2.f32 %v2951_v32  ;;  %v2931_v46 = vpop.xlane.xlu1 %2930 }
0x165e   :  { %v7522_v58 = vpop.eup %6256  ;;  %v2945_v44 = vsub.f32 %v2902_v39, %v2931_v46  ;;  %6264 = vpow2.f32 %v2961_v20  ;;  %v2963_v36 = vmul.f32 1.442695, %v2948_v35 }
0x165f   :  { %v2934_v11 = vpop.xlane.xlu0 %2933  ;;  %v2971_v53 = vsel %vm155_vm3, %v7522_v58, 0.0 }
0x1660   :  { %2972 = vadd.xlane.f32.xlu1 %v2971_v53  ;;  %v2957_v45 = vmul.f32 1.442695, %v2945_v44  ;;  %v2946_v14 = vsub.f32 %v2905_v30, %v2934_v11 }
0x1661   :  { %v7530_v49 = vpop.permute.xlu1 %3070 }
0x1662   :  { %v7526_v1 = vpop.eup %6258  ;;  %6266 = vpow2.f32 %v2957_v45  ;;  %v2959_v17 = vmul.f32 1.442695, %v2946_v14 }
0x1663   :  { %v3012_v9 = vpop.permute.xlu0 %3011  ;;  %v2965_v33 = vsel %vm155_vm3, %v7526_v1, 0.0  ;;  %6268 = vpow2.f32 %v2963_v36 }
0x1664   :  { %5664 = vmatprep.subr.bf16.mxu1 %v3012_v9  ;;  %2966 = vadd.xlane.f32.xlu1 %v2965_v33  ;;  %6270 = vpow2.f32 %v2959_v17 }
0x1665   :  { %5665 = vmatpush3.bf16.msra.mxu1 %v3012_v9  ;;  %v3073_v47 = vpop.permute.xlu1 %3072 }
0x1666   :  { %v6261_v8 = vpop.eup %6260  ;;  %5670 = vmatprep.subr.bf16.mxu1 %v7530_v49 }
0x1667   :  { %v2974_v25 = vsel %vm155_vm3, %v6261_v8, 0.0  ;;  %v6263_v15 = vpop.eup %6262 }
0x1668   :  { %2975 = vadd.xlane.f32.xlu0 %v2974_v25  ;;  %v2968_v27 = vsel %vm155_vm3, %v6263_v15, 0.0  ;;  %v7539_v50 = vpop.eup %6264 }
0x1669   :  { %v2983_v3 = vsel %vm155_vm3, %v7539_v50, 0.0 }
0x166c   :  { %2969 = vadd.xlane.f32.xlu0 %v2968_v27  ;;  %v7543_v60 = vpop.eup %6266 }
0x166d   :  { %v2977_v13 = vsel %vm155_vm3, %v7543_v60, 0.0  ;;  %v7547_v19 = vpop.eup %6268 }
0x166e   :  { %v2986_v22 = vsel %vm155_vm3, %v7547_v19, 0.0  ;;  %v6271_v29 = vpop.eup %6270 }
0x166f   :  { %v2980_v39 = vsel %vm155_vm3, %v6271_v29, 0.0 }
0x1675   :  { %3139 = vrot.lane.b32.xlu1 %v7466_v28, %s6423_s28 }
0x1682   :  { %3137 = vrot.lane.b32.xlu0 %v7468_v38, %s6423_s28 }
0x1699   :  { %2984 = vadd.xlane.f32.xlu1 %v2983_v3 }
0x169d   :  { %2978 = vadd.xlane.f32.xlu1 %v2977_v13 }
0x16a1   :  { %2987 = vadd.xlane.f32.xlu0 %v2986_v22 }
0x16a5   :  { %2981 = vadd.xlane.f32.xlu0 %v2980_v39 }
0x16ae   :  { %3133 = vrot.lane.b32.xlu1 %v7474_v10, %s6424_s29 }
0x16b2   :  { %3210 = vrot.lane.b32.xlu1 %v7480_v43, %s6423_s28 }
0x16b6   :  { %3206 = vrot.lane.b32.xlu1 %v7484_v7, %s6424_s29 }
0x16bb   :  { %3208 = vrot.lane.b32.xlu0 %v7482_v23, %s6423_s28  ;;  %s8198_s28 = smov 72  }
0x16bf   :  { %3135 = vrot.lane.b32.xlu0 %v7470_v57, %s6424_s29 }
0x16c3   :  { %3204 = vrot.lane.b32.xlu0 %v7486_v18, %s6424_s29  ;;  %s8199_s29 = smov 104  }
0x16ed   :  { %v2973_v48 = vpop.xlane.xlu1 %2972 }
0x16f1   :  { %v2967_v30 = vpop.xlane.xlu1 %2966 }
0x16f5   :  { %v2976_v56 = vpop.xlane.xlu0 %2975  ;;  %v3140_v41 = vpop.permute.xlu1 %3139 }
0x16f6   :  { %6272 = vrcp.f32 %v2976_v56  ;;  %v3151_v2 = vsel %vm415_vm4, %v3140_v41, 0 }
0x16f7   :  { %6274 = vrcp.f32 %v2967_v30 }
0x16f8   :  { %6276 = vrcp.f32 %v2973_v48 }
0x16f9   :  { %v2970_v54 = vpop.xlane.xlu0 %2969 }
0x16fa   :  { %6278 = vrcp.f32 %v2970_v54 }
0x16fd   :  { %v3138_v59 = vpop.permute.xlu0 %3137 }
0x16fe   :  { %5862 = vmatprep.subr.msk.bf16.mxu0 %vm415_vm4, %v3138_v59  ;;  %v3148_v6 = vsel %vm415_vm4, %v3138_v59, 0 }
0x16ff   :  { %5679 = vmatpush3.bf16.xpose.msra.mxu0 %v3148_v6 }
0x1700   :  { %5863 = vmatprep.subr.msk.bf16.mxu0 %vm415_vm4, %v3140_v41  ;;  %v6273_v63 = vpop.eup %6272 }
0x1701   :  { %v6275_v4 = vpop.eup %6274  ;;  %v2996_v12 = vmul.f32 %v6273_v63, %v6261_v8 }
0x1702   :  { %v6277_v51 = vpop.eup %6276  ;;  %v2990_v52 = vmul.f32 %v6275_v4, %v7526_v1 }
0x1703   :  { %v2994_v31 = vmul.f32 %v6277_v51, %v7522_v58 }
0x1704   :  { %v6279_v61 = vpop.eup %6278 }
0x1705   :  { %v2992_v42 = vmul.f32 %v6279_v61, %v6263_v15  ;;  %v3006_v37 = vpack.c.bf16 %v2996_v12, %v2994_v31 }
0x1707   :  { %5681 = vmatpush3.bf16.xpose.msra.mxu0 %v3151_v2  ;;  %v3005_v32 = vpack.c.bf16 %v2992_v42, %v2990_v52 }
0x1709   :  { %5666 = vmatprep.mubr.msk.bf16.mxu1 %vm155_vm3, %v3005_v32 }
0x170a   :  { %5667 = vmatmul.mubr.msk.bf16.vlgmr.msra.gmra.mrb[60].mxu1 %vm155_vm3, %v3006_v37 }
0x170b   :  { %5671 = vmatpush3.bf16.msra.mxu1 %v7530_v49 }
0x170c   :  { %5672 = vmatprep.subr.bf16.mxu1 %v3073_v47 }
0x170f   :  { %5673 = vmatpush3.bf16.msra.mxu1 %v3073_v47 }
0x1726   :  { %v2985_v24 = vpop.xlane.xlu1 %2984 }
0x172a   :  { %v2979_v46 = vpop.xlane.xlu1 %2978 }
0x172e   :  { %v2988_v11 = vpop.xlane.xlu0 %2987  ;;  %v3134_v53 = vpop.permute.xlu1 %3133 }
0x172f   :  { %5682 = vmatprep.mubr.msk.bf16.mxu0 %vm415_vm4, %v3134_v53  ;;  %6280 = vrcp.f32 %v2988_v11 }
0x1730   :  { %6282 = vrcp.f32 %v2979_v46 }
0x1731   :  { %6284 = vrcp.f32 %v2985_v24 }
0x1732   :  { %v2982_v58 = vpop.xlane.xlu0 %2981  ;;  %v3211_v14 = vpop.permute.xlu1 %3210 }
0x1733   :  { %6286 = vrcp.f32 %v2982_v58  ;;  %v3222_v17 = vsel %vm415_vm4, %v3211_v14, 0 }
0x1736   :  { %v3209_v1 = vpop.permute.xlu0 %3208  ;;  %v3207_v3 = vpop.permute.xlu1 %3206 }
0x1737   :  { %5864 = vmatprep.subr.msk.bf16.mxu1 %vm415_vm4, %v3209_v1  ;;  %v3219_v36 = vsel %vm415_vm4, %v3209_v1, 0 }
0x1739   :  { %v6281_v9 = vpop.eup %6280 }
0x173a   :  { %v3136_v33 = vpop.permute.xlu0 %3135  ;;  %v6283_v8 = vpop.eup %6282  ;;  %v3004_v15 = vmul.f32 %v6281_v9, %v7547_v19 }
0x173b   :  { %5683 = vmatmul.mubr.msk.bf16.vlgmr.msra.gmra.mrb[56].mxu0 %vm415_vm4, %v3136_v33  ;;  %v6285_v49 = vpop.eup %6284  ;;  %v2998_v27 = vmul.f32 %v6283_v8, %v7543_v60 }
0x173c   :  { %v3002_v20 = vmul.f32 %v6285_v49, %v7539_v50 }
0x173d   :  { %v6287_v25 = vpop.eup %6286 }
0x173e   :  { %v3000_v16 = vmul.f32 %v6287_v25, %v6271_v29  ;;  %v3008_v35 = vpack.c.bf16 %v3004_v15, %v3002_v20  ;;  %v3205_v45 = vpop.permute.xlu0 %3204 }
0x1740   :  { %v3007_v44 = vpack.c.bf16 %v3000_v16, %v2998_v27 }
0x1742   :  { %5674 = vmatprep.mubr.msk.bf16.mxu1 %vm155_vm3, %v3007_v44 }
0x1743   :  { %5675 = vmatmul.mubr.msk.bf16.vlgmr.msra.gmra.mrb[64].mxu1 %vm155_vm3, %v3008_v35 }
0x1744   :  { %5687 = vmatpush3.bf16.xpose.msra.mxu1 %v3219_v36  ;;  %5690 = vmatprep.mubr.msk.bf16.mxu1 %vm415_vm4, %v3205_v45 }
0x1745   :  { %5865 = vmatprep.subr.msk.bf16.mxu1 %vm415_vm4, %v3211_v14 }
0x174c   :  { %5689 = vmatpush3.bf16.xpose.msra.mxu1 %v3222_v17 }
0x1753   :  { %5691 = vmatmul.mubr.msk.bf16.vlgmr.msra.gmra.mrb[68].mxu1 %vm415_vm4, %v3207_v3 }
0x17dd   :  { %v7586_v50 = vpop.f32.mrb[60].mxu1 }
0x17de   :  { %v7588_v60 = vpop.f32.mrb[61].mxu1 }
0x17df   :  { %v7590_v13 = vpop.f32.mrb[62].mxu1 }
0x17e0   :  { %v7592_v19 = vpop.f32.mrb[63].mxu1 }
0x180e   :  { %v5684_v22 = vpop.f32.mrb[56].mxu0 }
0x180f   :  { %v3187_v29 = vpop.f32.mrb[57].mxu0  ;;  %v3279_v56 = vsel %vm155_vm3, %v5684_v22, -inf }
0x1810   :  { %v5685_v39 = vpop.f32.mrb[58].mxu0  ;;  %v3273_v47 = vsel %vm155_vm3, %v3187_v29, -inf }
0x1811   :  { %3274 = vmax.xlane.f32.xlu0 %v3273_v47  ;;  %v3190_v48 = vpop.f32.mrb[59].mxu0  ;;  %v3282_v41 = vsel %vm155_vm3, %v5685_v39, -inf }
0x1812   :  { %v3276_v30 = vsel %vm155_vm3, %v3190_v48, -inf }
0x1813   :  { %3277 = vmax.xlane.f32.xlu1 %v3276_v30 }
0x1815   :  { %3280 = vmax.xlane.f32.xlu0 %v3279_v56 }
0x1816   :  { %v7597_v54 = vpop.f32.mrb[64].mxu1 }
0x1817   :  { %v7599_v59 = vpop.f32.mrb[65].mxu1 }
0x1818   :  { %v7601_v6 = vpop.f32.mrb[66].mxu1 }
0x1819   :  { %v7604_v63 = vpop.f32.mrb[67].mxu1  ;;  %3283 = vmax.xlane.f32.xlu0 %v3282_v41 }
0x1826   :  { %v5692_v4 = vpop.f32.mrb[68].mxu1 }
0x1827   :  { %v3258_v51 = vpop.f32.mrb[69].mxu1  ;;  %v3291_v31 = vsel %vm155_vm3, %v5692_v4, -inf }
0x1828   :  { %v5693_v61 = vpop.f32.mrb[70].mxu1  ;;  %v3285_v12 = vsel %vm155_vm3, %v3258_v51, -inf }
0x1829   :  { %3286 = vmax.xlane.f32.xlu1 %v3285_v12  ;;  %v3261_v52 = vpop.f32.mrb[71].mxu1  ;;  %v3294_v2 = vsel %vm155_vm3, %v5693_v61, -inf }
0x182a   :  { %v3288_v42 = vsel %vm155_vm3, %v3261_v52, -inf }
0x182b   :  { %3289 = vmax.xlane.f32.xlu0 %v3288_v42 }
0x182d   :  { %3292 = vmax.xlane.f32.xlu1 %v3291_v31 }
0x182f   :  { %3295 = vmax.xlane.f32.xlu0 %v3294_v2 }
0x189e   :  { %v3275_v32 = vpop.xlane.xlu0 %3274 }
0x189f   :  { %v3297_v37 = vsub.f32 %v3187_v29, %v3275_v32 }
0x18a0   :  { %v3278_v24 = vpop.xlane.xlu1 %3277 }
0x18a1   :  { %v3305_v46 = vmul.f32 1.442695, %v3297_v37  ;;  %v3298_v11 = vsub.f32 %v3190_v48, %v3278_v24 }
0x18a2   :  { %v3281_v53 = vpop.xlane.xlu0 %3280 }
0x18a3   :  { %6288 = vpow2.f32 %v3305_v46  ;;  %v3307_v58 = vmul.f32 1.442695, %v3298_v11  ;;  %v3299_v1 = vsub.f32 %v5684_v22, %v3281_v53 }
0x18a5   :  { %6290 = vpow2.f32 %v3307_v58  ;;  %v3309_v9 = vmul.f32 1.442695, %v3299_v1 }
0x18a6   :  { %v3284_v33 = vpop.xlane.xlu0 %3283 }
0x18a7   :  { %6292 = vpow2.f32 %v3309_v9  ;;  %v3300_v8 = vsub.f32 %v5685_v39, %v3284_v33 }
0x18a9   :  { %v3311_v49 = vmul.f32 1.442695, %v3300_v8 }
0x18ab   :  { %6294 = vpow2.f32 %v3311_v49 }
0x18ad   :  { %v7610_v25 = vpop.eup %6288 }
0x18ae   :  { %v3321_v15 = vsel %vm155_vm3, %v7610_v25, 0.0 }
0x18af   :  { %v7614_v27 = vpop.eup %6290  ;;  %3322 = vadd.xlane.f32.xlu1 %v3321_v15 }
0x18b0   :  { %v3324_v16 = vsel %vm155_vm3, %v7614_v27, 0.0 }
0x18b1   :  { %v7618_v20 = vpop.eup %6292  ;;  %3325 = vadd.xlane.f32.xlu0 %v3324_v16 }
0x18b2   :  { %v3327_v44 = vsel %vm155_vm3, %v7618_v20, 0.0 }
0x18b3   :  { %3328 = vadd.xlane.f32.xlu1 %v3327_v44 }
0x18b5   :  { %v7622_v35 = vpop.eup %6294 }
0x18b6   :  { %v3330_v45 = vsel %vm155_vm3, %v7622_v35, 0.0  ;;  %v3287_v14 = vpop.xlane.xlu1 %3286 }
0x18b7   :  { %3331 = vadd.xlane.f32.xlu0 %v3330_v45  ;;  %v3301_v30 = vsub.f32 %v3258_v51, %v3287_v14 }
0x18b8   :  { %v3290_v36 = vpop.xlane.xlu0 %3289 }
0x18b9   :  { %v3302_v29 = vsub.f32 %v3261_v52, %v3290_v36  ;;  %v3313_v41 = vmul.f32 1.442695, %v3301_v30 }
0x18ba   :  { %v3293_v22 = vpop.xlane.xlu1 %3292 }
0x18bb   :  { %v3303_v39 = vsub.f32 %v5692_v4, %v3293_v22  ;;  %v3315_v48 = vmul.f32 1.442695, %v3302_v29 }
0x18bc   :  { %v3296_v17 = vpop.xlane.xlu0 %3295 }
0x18bd   :  { %v3304_v3 = vsub.f32 %v5693_v61, %v3296_v17  ;;  %v3317_v56 = vmul.f32 1.442695, %v3303_v39 }
0x18bf   :  { %v3319_v47 = vmul.f32 1.442695, %v3304_v3 }
0x18c1   :  { %6296 = vpow2.f32 %v3319_v47 }
0x18c2   :  { %6298 = vpow2.f32 %v3315_v48 }
0x18c3   :  { %6300 = vpow2.f32 %v3317_v56 }
0x18c4   :  { %3365 = vrot.lane.b32.xlu1 %v7468_v38, %s6425_s2  ;;  %6302 = vpow2.f32 %v3313_v41 }
0x18c8   :  { %3426 = vrot.lane.b32.xlu1 %v7482_v23, %s6425_s2 }
0x18cb   :  { %v7638_v12 = vpop.eup %6296 }
0x18cc   :  { %3428 = vrot.lane.b32.xlu1 %v7480_v43, %s6425_s2  ;;  %v7640_v42 = vpop.eup %6298  ;;  %v3342_v31 = vsel %vm155_vm3, %v7638_v12, 0.0 }
0x18cd   :  { %3367 = vrot.lane.b32.xlu0 %v7466_v28, %s6425_s2  ;;  %v7644_v61 = vpop.eup %6300  ;;  %v3336_v4 = vsel %vm155_vm3, %v7640_v42, 0.0  ;;  %s8200_s2 = smov 40  }
0x18ce   :  { %v3339_v51 = vsel %vm155_vm3, %v7644_v61, 0.0  ;;  %v7650_v52 = vpop.eup %6302 }
0x18cf   :  { %v3333_v2 = vsel %vm155_vm3, %v7650_v52, 0.0 }
0x18d0   :  { %3493 = vrot.lane.b32.xlu1 %v7466_v28, %s6426_s1 }
0x18d1   :  { %3491 = vrot.lane.b32.xlu0 %v7468_v38, %s6426_s1 }
0x18f0   :  { %3343 = vadd.xlane.f32.xlu0 %v3342_v31 }
0x18f4   :  { %3337 = vadd.xlane.f32.xlu0 %v3336_v4  ;;  %3340 = vadd.xlane.f32.xlu1 %v3339_v51 }
0x18f8   :  { %3334 = vadd.xlane.f32.xlu1 %v3333_v2 }
0x1909   :  { %3487 = vrot.lane.b32.xlu1 %v7474_v10, %s6427_s18 }
0x190a   :  { %3560 = vrot.lane.b32.xlu0 %v7482_v23, %s6426_s1 }
0x190d   :  { %3562 = vrot.lane.b32.xlu1 %v7480_v43, %s6426_s1  ;;  %s8201_s1 = smov 8  }
0x190e   :  { %3489 = vrot.lane.b32.xlu0 %v7470_v57, %s6427_s18 }
0x1911   :  { %3558 = vrot.lane.b32.xlu1 %v7484_v7, %s6427_s18 }
0x1912   :  { %3556 = vrot.lane.b32.xlu0 %v7486_v18, %s6427_s18  ;;  %s8202_s18 = smov 16  }
0x193c   :  { %v3323_v32 = vpop.xlane.xlu1 %3322 }
0x193d   :  { %6304 = vrcp.f32 %v3323_v32 }
0x193e   :  { %v3326_v37 = vpop.xlane.xlu0 %3325 }
0x193f   :  { %6306 = vrcp.f32 %v3326_v37 }
0x1940   :  { %v3329_v24 = vpop.xlane.xlu1 %3328 }
0x1941   :  { %6308 = vrcp.f32 %v3329_v24 }
0x1944   :  { %v3332_v46 = vpop.xlane.xlu0 %3331  ;;  %v3366_v11 = vpop.permute.xlu1 %3365 }
0x1945   :  { %6310 = vrcp.f32 %v3332_v46  ;;  %5694 = vmatprep.subr.bf16.mxu0 %v3366_v11 }
0x1946   :  { %5695 = vmatpush3.bf16.msra.mxu0 %v3366_v11 }
0x1947   :  { %v6305_v53 = vpop.eup %6304 }
0x1948   :  { %v3368_v58 = vpop.permute.xlu0 %3367  ;;  %v3427_v1 = vpop.permute.xlu1 %3426  ;;  %v3346_v33 = vmul.f32 %v6305_v53, %v7610_v25 }
0x1949   :  { %v6307_v9 = vpop.eup %6306  ;;  %5696 = vmatprep.subr.bf16.mxu0 %v3368_v58  ;;  %5702 = vmatprep.subr.bf16.mxu1 %v3427_v1 }
0x194a   :  { %5697 = vmatpush3.bf16.msra.mxu0 %v3368_v58  ;;  %5703 = vmatpush3.bf16.msra.mxu1 %v3427_v1  ;;  %v3348_v8 = vmul.f32 %v6307_v9, %v7614_v27 }
0x194b   :  { %v6309_v44 = vpop.eup %6308 }
0x194c   :  { %v3492_v49 = vpop.permute.xlu0 %3491  ;;  %v3429_v15 = vpop.permute.xlu1 %3428  ;;  %v3361_v16 = vpack.c.bf16 %v3348_v8, %v3346_v33  ;;  %v3350_v36 = vmul.f32 %v6309_v44, %v7618_v20 }
0x194d   :  { %5704 = vmatprep.subr.bf16.mxu1 %v3429_v15  ;;  %5866 = vmatprep.subr.msk.bf16.mxu0 %vm415_vm4, %v3492_v49  ;;  %v3502_v25 = vsel %vm415_vm4, %v3492_v49, 0 }
0x194e   :  { %5698 = vmatprep.mubr.msk.bf16.mxu0 %vm155_vm3, %v3361_v16  ;;  %5705 = vmatpush3.bf16.msra.mxu1 %v3429_v15 }
0x194f   :  { %v6311_v45 = vpop.eup %6310 }
0x1950   :  { %v3352_v14 = vmul.f32 %v6311_v45, %v7622_v35  ;;  %v3494_v27 = vpop.permute.xlu1 %3493 }
0x1951   :  { %v3505_v3 = vsel %vm415_vm4, %v3494_v27, 0 }
0x1952   :  { %v3362_v17 = vpack.c.bf16 %v3352_v14, %v3350_v36 }
0x1954   :  { %5699 = vmatmul.mubr.msk.bf16.vlgmr.msra.gmra.mrb[60].mxu0 %vm155_vm3, %v3362_v17 }
0x1955   :  { %5711 = vmatpush3.bf16.xpose.msra.mxu0 %v3502_v25 }
0x1956   :  { %5867 = vmatprep.subr.msk.bf16.mxu0 %vm415_vm4, %v3494_v27 }
0x195d   :  { %5713 = vmatpush3.bf16.xpose.msra.mxu0 %v3505_v3 }
0x197d   :  { %v3344_v22 = vpop.xlane.xlu0 %3343 }
0x1981   :  { %v3338_v29 = vpop.xlane.xlu0 %3337  ;;  %v3341_v39 = vpop.xlane.xlu1 %3340 }
0x1982   :  { %6312 = vrcp.f32 %v3341_v39 }
0x1983   :  { %6314 = vrcp.f32 %v3338_v29 }
0x1984   :  { %6316 = vrcp.f32 %v3344_v22 }
0x1985   :  { %v3561_v20 = vpop.permute.xlu0 %3560  ;;  %v3335_v35 = vpop.xlane.xlu1 %3334 }
0x1986   :  { %6318 = vrcp.f32 %v3335_v35  ;;  %5868 = vmatprep.subr.msk.bf16.mxu1 %vm415_vm4, %v3561_v20  ;;  %v3571_v46 = vsel %vm415_vm4, %v3561_v20, 0 }
0x1989   :  { %v3490_v47 = vpop.permute.xlu0 %3489  ;;  %v3488_v48 = vpop.permute.xlu1 %3487 }
0x198a   :  { %5714 = vmatprep.mubr.msk.bf16.mxu0 %vm415_vm4, %v3488_v48 }
0x198b   :  { %5715 = vmatmul.mubr.msk.bf16.vlgmr.msra.gmra.mrb[64].mxu0 %vm415_vm4, %v3490_v47 }
0x198c   :  { %v6313_v30 = vpop.eup %6312 }
0x198d   :  { %v6315_v56 = vpop.eup %6314  ;;  %v3358_v4 = vmul.f32 %v6313_v30, %v7644_v61  ;;  %v3557_v11 = vpop.permute.xlu0 %3556 }
0x198e   :  { %v6317_v41 = vpop.eup %6316  ;;  %v3356_v2 = vmul.f32 %v6315_v56, %v7640_v42  ;;  %v3563_v53 = vpop.permute.xlu1 %3562 }
0x198f   :  { %v3360_v32 = vmul.f32 %v6317_v41, %v7638_v12  ;;  %v3574_v61 = vsel %vm415_vm4, %v3563_v53, 0 }
0x1990   :  { %v6319_v31 = vpop.eup %6318 }
0x1991   :  { %v3354_v51 = vmul.f32 %v6319_v31, %v7650_v52  ;;  %v3364_v24 = vpack.c.bf16 %v3360_v32, %v3358_v4 }
0x1992   :  { %v3559_v42 = vpop.permute.xlu1 %3558 }
0x1993   :  { %v3363_v37 = vpack.c.bf16 %v3356_v2, %v3354_v51 }
0x1995   :  { %5706 = vmatprep.mubr.msk.bf16.mxu1 %vm155_vm3, %v3363_v37 }
0x1996   :  { %5707 = vmatmul.mubr.msk.bf16.vlgmr.msra.gmra.mrb[72].mxu1 %vm155_vm3, %v3364_v24 }
0x1997   :  { %5719 = vmatpush3.bf16.xpose.msra.mxu1 %v3571_v46  ;;  %5722 = vmatprep.mubr.msk.bf16.mxu1 %vm415_vm4, %v3557_v11 }
0x1998   :  { %5869 = vmatprep.subr.msk.bf16.mxu1 %vm415_vm4, %v3563_v53 }
0x199f   :  { %5721 = vmatpush3.bf16.xpose.msra.mxu1 %v3574_v61 }
0x19a6   :  { %5723 = vmatmul.mubr.msk.bf16.vlgmr.msra.gmra.mrb[76].mxu1 %vm415_vm4, %v3559_v42 }
0x1a27   :  { %v7690_v12 = vpop.f32.mrb[60].mxu0 }
0x1a28   :  { %v7692_v52 = vpop.f32.mrb[61].mxu0 }
0x1a29   :  { %v7694_v58 = vpop.f32.mrb[62].mxu0 }
0x1a2a   :  { %v5956_v1 = vpack.i.bf16 %v7694_v58, %v7690_v12  ;;  %v7698_v9 = vpop.f32.mrb[63].mxu0 }
0x1a2b   :  { %v5951_v33 = vpack.i.bf16 %v7698_v9, %v7692_v52 }
0x1a5e   :  { %v5716_v8 = vpop.f32.mrb[64].mxu0 }
0x1a5f   :  { %v3541_v49 = vpop.f32.mrb[65].mxu0  ;;  %v3631_v36 = vsel %vm155_vm3, %v5716_v8, -inf }
0x1a60   :  { %v5717_v15 = vpop.f32.mrb[66].mxu0  ;;  %v3625_v16 = vsel %vm155_vm3, %v3541_v49, -inf }
0x1a61   :  { %3626 = vmax.xlane.f32.xlu0 %v3625_v16  ;;  %v3544_v44 = vpop.f32.mrb[67].mxu0  ;;  %v3634_v14 = vsel %vm155_vm3, %v5717_v15, -inf }
0x1a62   :  { %v3628_v45 = vsel %vm155_vm3, %v3544_v44, -inf }
0x1a63   :  { %3629 = vmax.xlane.f32.xlu1 %v3628_v45 }
0x1a65   :  { %3632 = vmax.xlane.f32.xlu0 %v3631_v36 }
0x1a69   :  { %v7706_v17 = vpop.f32.mrb[72].mxu1  ;;  %3635 = vmax.xlane.f32.xlu0 %v3634_v14 }
0x1a6a   :  { %v7708_v25 = vpop.f32.mrb[73].mxu1 }
0x1a6b   :  { %v7710_v27 = vpop.f32.mrb[74].mxu1 }
0x1a6c   :  { %v5986_v3 = vpack.i.bf16 %v7710_v27, %v7706_v17  ;;  %v7714_v22 = vpop.f32.mrb[75].mxu1 }
0x1a79   :  { %v5724_v39 = vpop.f32.mrb[76].mxu1 }
0x1a7a   :  { %v3610_v20 = vpop.f32.mrb[77].mxu1  ;;  %v3643_v56 = vsel %vm155_vm3, %v5724_v39, -inf }
0x1a7b   :  { %v5725_v35 = vpop.f32.mrb[78].mxu1  ;;  %v3637_v47 = vsel %vm155_vm3, %v3610_v20, -inf }
0x1a7c   :  { %3638 = vmax.xlane.f32.xlu1 %v3637_v47  ;;  %v3613_v48 = vpop.f32.mrb[79].mxu1  ;;  %v3646_v41 = vsel %vm155_vm3, %v5725_v35, -inf }
0x1a7d   :  { %v3640_v30 = vsel %vm155_vm3, %v3613_v48, -inf }
0x1a7e   :  { %3641 = vmax.xlane.f32.xlu0 %v3640_v30 }
0x1a80   :  { %3644 = vmax.xlane.f32.xlu1 %v3643_v56 }
0x1a82   :  { %3647 = vmax.xlane.f32.xlu0 %v3646_v41 }
0x1aee   :  { %v3627_v31 = vpop.xlane.xlu0 %3626 }
0x1aef   :  { %v3649_v4 = vsub.f32 %v3541_v49, %v3627_v31 }
0x1af0   :  { %v3630_v51 = vpop.xlane.xlu1 %3629 }
0x1af1   :  { %v3657_v2 = vmul.f32 1.442695, %v3649_v4  ;;  %v3650_v32 = vsub.f32 %v3544_v44, %v3630_v51 }
0x1af2   :  { %v3633_v37 = vpop.xlane.xlu0 %3632 }
0x1af3   :  { %6320 = vpow2.f32 %v3657_v2  ;;  %v3659_v24 = vmul.f32 1.442695, %v3650_v32  ;;  %v3651_v46 = vsub.f32 %v5716_v8, %v3633_v37 }
0x1af5   :  { %6322 = vpow2.f32 %v3659_v24  ;;  %v3661_v11 = vmul.f32 1.442695, %v3651_v46 }
0x1af6   :  { %v3636_v53 = vpop.xlane.xlu0 %3635 }
0x1af7   :  { %6324 = vpow2.f32 %v3661_v11  ;;  %v3652_v61 = vsub.f32 %v5717_v15, %v3636_v53 }
0x1af9   :  { %v3663_v42 = vmul.f32 1.442695, %v3652_v61 }
0x1afb   :  { %6326 = vpow2.f32 %v3663_v42 }
0x1afd   :  { %v7722_v16 = vpop.eup %6320 }
0x1afe   :  { %v3673_v45 = vsel %vm155_vm3, %v7722_v16, 0.0 }
0x1aff   :  { %v7726_v49 = vpop.eup %6322  ;;  %3674 = vadd.xlane.f32.xlu1 %v3673_v45 }
0x1b00   :  { %v3676_v44 = vsel %vm155_vm3, %v7726_v49, 0.0 }
0x1b01   :  { %v7730_v36 = vpop.eup %6324  ;;  %3677 = vadd.xlane.f32.xlu0 %v3676_v44 }
0x1b02   :  { %v3679_v8 = vsel %vm155_vm3, %v7730_v36, 0.0 }
0x1b03   :  { %3680 = vadd.xlane.f32.xlu1 %v3679_v8 }
0x1b05   :  { %v7734_v15 = vpop.eup %6326 }
0x1b06   :  { %v3682_v14 = vsel %vm155_vm3, %v7734_v15, 0.0 }
0x1b07   :  { %3683 = vadd.xlane.f32.xlu0 %v3682_v14 }
0x1b09   :  { %v3639_v30 = vpop.xlane.xlu1 %3638 }
0x1b0a   :  { %v3653_v37 = vsub.f32 %v3610_v20, %v3639_v30 }
0x1b0b   :  { %v3642_v47 = vpop.xlane.xlu0 %3641 }
0x1b0c   :  { %v3654_v4 = vsub.f32 %v3613_v48, %v3642_v47  ;;  %v3665_v46 = vmul.f32 1.442695, %v3653_v37 }
0x1b0d   :  { %v3645_v31 = vpop.xlane.xlu1 %3644 }
0x1b0e   :  { %v3655_v51 = vsub.f32 %v5724_v39, %v3645_v31  ;;  %v3667_v32 = vmul.f32 1.442695, %v3654_v4 }
0x1b0f   :  { %v3648_v56 = vpop.xlane.xlu0 %3647 }
0x1b10   :  { %v3656_v41 = vsub.f32 %v5725_v35, %v3648_v56  ;;  %v3669_v24 = vmul.f32 1.442695, %v3655_v51 }
0x1b12   :  { %v3671_v2 = vmul.f32 1.442695, %v3656_v41 }
0x1b14   :  { %3717 = vrot.lane.b32.xlu1 %v7468_v38, %s8197_s6  ;;  %6328 = vpow2.f32 %v3671_v2 }
0x1b15   :  { %6330 = vpow2.f32 %v3667_v32 }
0x1b16   :  { %6332 = vpow2.f32 %v3669_v24 }
0x1b17   :  { %6334 = vpow2.f32 %v3665_v46 }
0x1b18   :  { %3778 = vrot.lane.b32.xlu1 %v7482_v23, %s8197_s6 }
0x1b1c   :  { %3780 = vrot.lane.b32.xlu1 %v7480_v43, %s8197_s6 }
0x1b1d   :  { %3719 = vrot.lane.b32.xlu0 %v7466_v28, %s8197_s6 }
0x1b1e   :  { %v7750_v11 = vpop.eup %6328 }
0x1b1f   :  { %v7752_v53 = vpop.eup %6330  ;;  %v3694_v61 = vsel %vm155_vm3, %v7750_v11, 0.0 }
0x1b20   :  { %3845 = vrot.lane.b32.xlu1 %v7466_v28, %s8198_s28  ;;  %v7756_v35 = vpop.eup %6332  ;;  %v3688_v39 = vsel %vm155_vm3, %v7752_v53, 0.0 }
0x1b21   :  { %3843 = vrot.lane.b32.xlu0 %v7468_v38, %s8198_s28  ;;  %v3691_v20 = vsel %vm155_vm3, %v7756_v35, 0.0  ;;  %v7762_v48 = vpop.eup %6334 }
0x1b22   :  { %v3685_v42 = vsel %vm155_vm3, %v7762_v48, 0.0 }
0x1b40   :  { %3695 = vadd.xlane.f32.xlu0 %v3694_v61 }
0x1b44   :  { %3689 = vadd.xlane.f32.xlu0 %v3688_v39  ;;  %3692 = vadd.xlane.f32.xlu1 %v3691_v20 }
0x1b48   :  { %3686 = vadd.xlane.f32.xlu1 %v3685_v42 }
0x1b59   :  { %3839 = vrot.lane.b32.xlu1 %v7474_v10, %s8199_s29 }
0x1b5a   :  { %3912 = vrot.lane.b32.xlu0 %v7482_v23, %s8198_s28 }
0x1b5d   :  { %3914 = vrot.lane.b32.xlu1 %v7480_v43, %s8198_s28 }
0x1b5e   :  { %3841 = vrot.lane.b32.xlu0 %v7470_v57, %s8199_s29 }
0x1b61   :  { %3910 = vrot.lane.b32.xlu1 %v7484_v7, %s8199_s29 }
0x1b62   :  { %3908 = vrot.lane.b32.xlu0 %v7486_v18, %s8199_s29 }
0x1b8c   :  { %v3675_v45 = vpop.xlane.xlu1 %3674 }
0x1b8d   :  { %6336 = vrcp.f32 %v3675_v45 }
0x1b8e   :  { %v3678_v44 = vpop.xlane.xlu0 %3677 }
0x1b8f   :  { %6338 = vrcp.f32 %v3678_v44 }
0x1b90   :  { %v3681_v10 = vpop.xlane.xlu1 %3680 }
0x1b91   :  { %6340 = vrcp.f32 %v3681_v10 }
0x1b94   :  { %v3684_v8 = vpop.xlane.xlu0 %3683  ;;  %v3718_v14 = vpop.permute.xlu1 %3717 }
0x1b95   :  { %6342 = vrcp.f32 %v3684_v8  ;;  %5726 = vmatprep.subr.bf16.mxu0 %v3718_v14 }
0x1b96   :  { %5727 = vmatpush3.bf16.msra.mxu0 %v3718_v14 }
0x1b97   :  { %v6337_v47 = vpop.eup %6336 }
0x1b98   :  { %v3720_v30 = vpop.permute.xlu0 %3719  ;;  %v3779_v57 = vpop.permute.xlu1 %3778  ;;  %v3698_v7 = vmul.f32 %v6337_v47, %v7722_v16 }
0x1b99   :  { %v6339_v56 = vpop.eup %6338  ;;  %5728 = vmatprep.subr.bf16.mxu0 %v3720_v30  ;;  %5734 = vmatprep.subr.bf16.mxu1 %v3779_v57 }
0x1b9a   :  { %5729 = vmatpush3.bf16.msra.mxu0 %v3720_v30  ;;  %5735 = vmatpush3.bf16.msra.mxu1 %v3779_v57  ;;  %v3700_v18 = vmul.f32 %v6339_v56, %v7726_v49 }
0x1b9b   :  { %v6341_v51 = vpop.eup %6340 }
0x1b9c   :  { %v3844_v41 = vpop.permute.xlu0 %3843  ;;  %v3781_v31 = vpop.permute.xlu1 %3780  ;;  %v3713_v4 = vpack.c.bf16 %v3700_v18, %v3698_v7  ;;  %v3702_v32 = vmul.f32 %v6341_v51, %v7730_v36 }
0x1b9d   :  { %5736 = vmatprep.subr.bf16.mxu1 %v3781_v31  ;;  %5870 = vmatprep.subr.msk.bf16.mxu0 %vm415_vm4, %v3844_v41  ;;  %v3854_v16 = vsel %vm415_vm4, %v3844_v41, 0 }
0x1b9e   :  { %5730 = vmatprep.mubr.msk.bf16.mxu0 %vm155_vm3, %v3713_v4  ;;  %5737 = vmatpush3.bf16.msra.mxu1 %v3781_v31 }
0x1b9f   :  { %v6343_v2 = vpop.eup %6342 }
0x1ba0   :  { %v3704_v37 = vmul.f32 %v6343_v2, %v7734_v15  ;;  %v3846_v49 = vpop.permute.xlu1 %3845 }
0x1ba1   :  { %v3857_v46 = vsel %vm415_vm4, %v3846_v49, 0 }
0x1ba2   :  { %v3714_v24 = vpack.c.bf16 %v3704_v37, %v3702_v32 }
0x1ba4   :  { %5731 = vmatmul.mubr.msk.bf16.vlgmr.msra.gmra.mrb[68].mxu0 %vm155_vm3, %v3714_v24 }
0x1ba5   :  { %5743 = vmatpush3.bf16.xpose.msra.mxu0 %v3854_v16 }
0x1ba6   :  { %5871 = vmatprep.subr.msk.bf16.mxu0 %vm415_vm4, %v3846_v49 }
0x1bad   :  { %5745 = vmatpush3.bf16.xpose.msra.mxu0 %v3857_v46 }
0x1bcd   :  { %v3696_v61 = vpop.xlane.xlu0 %3695 }
0x1bd1   :  { %v3690_v39 = vpop.xlane.xlu0 %3689  ;;  %v3693_v20 = vpop.xlane.xlu1 %3692 }
0x1bd2   :  { %6344 = vrcp.f32 %v3693_v20 }
0x1bd3   :  { %6346 = vrcp.f32 %v3690_v39 }
0x1bd4   :  { %6348 = vrcp.f32 %v3696_v61 }
0x1bd5   :  { %v3913_v36 = vpop.permute.xlu0 %3912  ;;  %v3687_v15 = vpop.xlane.xlu1 %3686 }
0x1bd6   :  { %6350 = vrcp.f32 %v3687_v15  ;;  %5872 = vmatprep.subr.msk.bf16.mxu1 %vm415_vm4, %v3913_v36  ;;  %v3923_v41 = vsel %vm415_vm4, %v3913_v36, 0 }
0x1bd9   :  { %v3842_v42 = vpop.permute.xlu0 %3841  ;;  %v3840_v45 = vpop.permute.xlu1 %3839 }
0x1bda   :  { %5746 = vmatprep.mubr.msk.bf16.mxu0 %vm415_vm4, %v3840_v45 }
0x1bdb   :  { %5747 = vmatmul.mubr.msk.bf16.vlgmr.msra.gmra.mrb[72].mxu0 %vm415_vm4, %v3842_v42 }
0x1bdc   :  { %v6345_v44 = vpop.eup %6344 }
0x1bdd   :  { %v6347_v10 = vpop.eup %6346  ;;  %v3710_v47 = vmul.f32 %v6345_v44, %v7756_v35  ;;  %v3909_v31 = vpop.permute.xlu0 %3908 }
0x1bde   :  { %v6349_v8 = vpop.eup %6348  ;;  %v3708_v57 = vmul.f32 %v6347_v10, %v7752_v53  ;;  %v3915_v4 = vpop.permute.xlu1 %3914 }
0x1bdf   :  { %v3712_v56 = vmul.f32 %v6349_v8, %v7750_v11  ;;  %v3926_v35 = vsel %vm415_vm4, %v3915_v4, 0 }
0x1be0   :  { %v6351_v14 = vpop.eup %6350 }
0x1be1   :  { %v3706_v30 = vmul.f32 %v6351_v14, %v7762_v48  ;;  %v3716_v18 = vpack.c.bf16 %v3712_v56, %v3710_v47 }
0x1be2   :  { %v3911_v53 = vpop.permute.xlu1 %3910 }
0x1be3   :  { %v3715_v7 = vpack.c.bf16 %v3708_v57, %v3706_v30 }
0x1be5   :  { %5738 = vmatprep.mubr.msk.bf16.mxu1 %vm155_vm3, %v3715_v7 }
0x1be6   :  { %5739 = vmatmul.mubr.msk.bf16.vlgmr.msra.gmra.mrb[80].mxu1 %vm155_vm3, %v3716_v18 }
0x1be7   :  { %5751 = vmatpush3.bf16.xpose.msra.mxu1 %v3923_v41  ;;  %5754 = vmatprep.mubr.msk.bf16.mxu1 %vm415_vm4, %v3909_v31 }
0x1be8   :  { %5873 = vmatprep.subr.msk.bf16.mxu1 %vm415_vm4, %v3915_v4 }
0x1bef   :  { %5753 = vmatpush3.bf16.xpose.msra.mxu1 %v3926_v35 }
0x1bf6   :  { %5755 = vmatmul.mubr.msk.bf16.vlgmr.msra.gmra.mrb[84].mxu1 %vm415_vm4, %v3911_v53 }
0x1c77   :  { %v7802_v11 = vpop.f32.mrb[68].mxu0 }
0x1c78   :  { %v7804_v48 = vpop.f32.mrb[69].mxu0 }
0x1c79   :  { %v7806_v51 = vpop.f32.mrb[70].mxu0 }
0x1c7a   :  { %v5966_v2 = vpack.i.bf16 %v7806_v51, %v7802_v11  ;;  %v7810_v32 = vpop.f32.mrb[71].mxu0 }
0x1c7b   :  { %v5961_v37 = vpack.i.bf16 %v7810_v32, %v7804_v48 }
0x1cae   :  { %v5748_v24 = vpop.f32.mrb[72].mxu0 }
0x1caf   :  { %v3893_v16 = vpop.f32.mrb[73].mxu0  ;;  %v3983_v20 = vsel %vm155_vm3, %v5748_v24, -inf }
0x1cb0   :  { %v5749_v49 = vpop.f32.mrb[74].mxu0  ;;  %v3977_v46 = vsel %vm155_vm3, %v3893_v16, -inf }
0x1cb1   :  { %3978 = vmax.xlane.f32.xlu0 %v3977_v46  ;;  %v3896_v61 = vpop.f32.mrb[75].mxu0  ;;  %v3986_v36 = vsel %vm155_vm3, %v5749_v49, -inf }
0x1cb2   :  { %v3980_v39 = vsel %vm155_vm3, %v3896_v61, -inf }
0x1cb3   :  { %3981 = vmax.xlane.f32.xlu1 %v3980_v39 }
0x1cb5   :  { %3984 = vmax.xlane.f32.xlu0 %v3983_v20 }
0x1cb9   :  { %v7818_v15 = vpop.f32.mrb[80].mxu1  ;;  %3987 = vmax.xlane.f32.xlu0 %v3986_v36 }
0x1cba   :  { %v7820_v42 = vpop.f32.mrb[81].mxu1 }
0x1cbb   :  { %v7822_v45 = vpop.f32.mrb[82].mxu1 }
0x1cbc   :  { %v7826_v10 = vpop.f32.mrb[83].mxu1 }
0x1cc9   :  { %v5756_v14 = vpop.f32.mrb[84].mxu1 }
0x1cca   :  { %v3962_v47 = vpop.f32.mrb[85].mxu1  ;;  %v3995_v18 = vsel %vm155_vm3, %v5756_v14, -inf }
0x1ccb   :  { %v5757_v30 = vpop.f32.mrb[86].mxu1  ;;  %v3989_v57 = vsel %vm155_vm3, %v3962_v47, -inf }
0x1ccc   :  { %3990 = vmax.xlane.f32.xlu1 %v3989_v57  ;;  %v3965_v56 = vpop.f32.mrb[87].mxu1  ;;  %v3998_v41 = vsel %vm155_vm3, %v5757_v30, -inf }
0x1ccd   :  { %v3992_v7 = vsel %vm155_vm3, %v3965_v56, -inf }
0x1cce   :  { %3993 = vmax.xlane.f32.xlu0 %v3992_v7 }
0x1cd0   :  { %3996 = vmax.xlane.f32.xlu1 %v3995_v18 }
0x1cd2   :  { %3999 = vmax.xlane.f32.xlu0 %v3998_v41 }
0x1d3e   :  { %v3979_v31 = vpop.xlane.xlu0 %3978 }
0x1d3f   :  { %v4001_v4 = vsub.f32 %v3893_v16, %v3979_v31 }
0x1d40   :  { %v3982_v35 = vpop.xlane.xlu1 %3981 }
0x1d41   :  { %v4009_v53 = vmul.f32 1.442695, %v4001_v4  ;;  %v4002_v46 = vsub.f32 %v3896_v61, %v3982_v35 }
0x1d42   :  { %v3985_v39 = vpop.xlane.xlu0 %3984 }
0x1d43   :  { %6352 = vpow2.f32 %v4009_v53  ;;  %v4011_v20 = vmul.f32 1.442695, %v4002_v46  ;;  %v4003_v36 = vsub.f32 %v5748_v24, %v3985_v39 }
0x1d45   :  { %6354 = vpow2.f32 %v4011_v20  ;;  %v4013_v57 = vmul.f32 1.442695, %v4003_v36 }
0x1d46   :  { %v3988_v8 = vpop.xlane.xlu0 %3987 }
0x1d47   :  { %6356 = vpow2.f32 %v4013_v57  ;;  %v4004_v7 = vsub.f32 %v5749_v49, %v3988_v8 }
0x1d49   :  { %v4015_v44 = vmul.f32 1.442695, %v4004_v7 }
0x1d4b   :  { %6358 = vpow2.f32 %v4015_v44 }
0x1d4d   :  { %v6353_v18 = vpop.eup %6352 }
0x1d4e   :  { %v4025_v29 = vsel %vm155_vm3, %v6353_v18, 0.0 }
0x1d4f   :  { %v6355_v41 = vpop.eup %6354  ;;  %4026 = vadd.xlane.f32.xlu1 %v4025_v29 }
0x1d50   :  { %v4028_v16 = vsel %vm155_vm3, %v6355_v41, 0.0 }
0x1d51   :  { %v7836_v31 = vpop.eup %6356  ;;  %4029 = vadd.xlane.f32.xlu0 %v4028_v16 }
0x1d52   :  { %v4031_v24 = vsel %vm155_vm3, %v7836_v31, 0.0 }
0x1d53   :  { %4032 = vadd.xlane.f32.xlu1 %v4031_v24 }
0x1d55   :  { %v6359_v61 = vpop.eup %6358 }
0x1d56   :  { %v4034_v4 = vsel %vm155_vm3, %v6359_v61, 0.0 }
0x1d57   :  { %4035 = vadd.xlane.f32.xlu0 %v4034_v4 }
0x1d59   :  { %v3991_v29 = vpop.xlane.xlu1 %3990 }
0x1d5a   :  { %v4005_v7 = vsub.f32 %v3962_v47, %v3991_v29 }
0x1d5b   :  { %v3994_v49 = vpop.xlane.xlu0 %3993 }
0x1d5c   :  { %v4006_v44 = vsub.f32 %v3965_v56, %v3994_v49  ;;  %v4017_v24 = vmul.f32 1.442695, %v4005_v7 }
0x1d5d   :  { %v3997_v20 = vpop.xlane.xlu1 %3996 }
0x1d5e   :  { %v4019_v53 = vmul.f32 1.442695, %v4006_v44  ;;  %v4007_v56 = vsub.f32 %v5756_v14, %v3997_v20 }
0x1d5f   :  { %v4000_v8 = vpop.xlane.xlu0 %3999 }
0x1d60   :  { %v4008_v35 = vsub.f32 %v5757_v30, %v4000_v8  ;;  %v4021_v16 = vmul.f32 1.442695, %v4007_v56 }
0x1d62   :  { %v4023_v46 = vmul.f32 1.442695, %v4008_v35 }
0x1d64   :  { %6360 = vpow2.f32 %v4023_v46  ;;  %4069 = vrot.lane.b32.xlu1 %v7468_v38, %s8200_s2 }
0x1d65   :  { %6362 = vpow2.f32 %v4019_v53 }
0x1d66   :  { %6364 = vpow2.f32 %v4021_v16 }
0x1d67   :  { %6366 = vpow2.f32 %v4017_v24  ;;  %v6044_v24 = vld [vmem:[%s8160_s7 + $0x10] sm:$0xff]  }
0x1d6e   :  { %v7843_v39 = vpop.eup %6360 }
0x1d6f   :  { %v4046_v36 = vsel %vm155_vm3, %v7843_v39, 0.0  ;;  %v7847_v57 = vpop.eup %6362 }
0x1d70   :  { %4047 = vadd.xlane.f32.xlu0 %v4046_v36  ;;  %v4040_v30 = vsel %vm155_vm3, %v7847_v57, 0.0  ;;  %v6365_v38 = vpop.eup %6364 }
0x1d71   :  { %v4043_v4 = vsel %vm155_vm3, %v6365_v38, 0.0  ;;  %v6367_v49 = vpop.eup %6366 }
0x1d72   :  { %v4037_v44 = vsel %vm155_vm3, %v6367_v49, 0.0 }
0x1d74   :  { %4041 = vadd.xlane.f32.xlu0 %v4040_v30 }
0x1d88   :  { %4044 = vadd.xlane.f32.xlu1 %v4043_v4 }
0x1d8a   :  { %4071 = vrot.lane.b32.xlu0 %v7466_v28, %s8200_s2 }
0x1d8c   :  { %4038 = vadd.xlane.f32.xlu1 %v4037_v44 }
0x1d8e   :  { %5952 = vrot.lane.b32.xlu0 %v5951_v33, %s8201_s1 }
0x1d92   :  { %5962 = vrot.lane.b32.xlu0 %v5961_v37, %s8202_s18 }
0x1d9d   :  { %4130 = vrot.lane.b32.xlu1 %v7482_v23, %s8200_s2 }
0x1da1   :  { %4132 = vrot.lane.b32.xlu1 %v7480_v43, %s8200_s2 }
0x1da5   :  { %5957 = vrot.lane.b32.xlu1 %v5956_v1, %s8201_s1 }
0x1da9   :  { %5967 = vrot.lane.b32.xlu1 %v5966_v2, %s8202_s18 }
0x1ddc   :  { %v4027_v28 = vpop.xlane.xlu1 %4026 }
0x1ddd   :  { %6368 = vrcp.f32 %v4027_v28 }
0x1dde   :  { %v4030_v52 = vpop.xlane.xlu0 %4029 }
0x1ddf   :  { %6370 = vrcp.f32 %v4030_v52  ;;  %v8204_v52 = vpack.i.bf16 %v7714_v22, %v7708_v25 }
0x1de0   :  { %v4033_v9 = vpop.xlane.xlu1 %4032 }
0x1de4   :  { %v4070_v33 = vpop.permute.xlu1 %4069  ;;  %v4036_v12 = vpop.xlane.xlu0 %4035 }
0x1de5   :  { %5758 = vmatprep.subr.bf16.mxu0 %v4070_v33  ;;  %6372 = vrcp.f32 %v4036_v12 }
0x1de6   :  { %5759 = vmatpush3.bf16.msra.mxu0 %v4070_v33  ;;  %6374 = vrcp.f32 %v4033_v9  ;;  %v8205_v9 = vpack.i.bf16 %v7822_v45, %v7818_v15  ;;  %v8206_v33 = vpack.i.bf16 %v7826_v10, %v7820_v42 }
0x1de7   :  { %v6369_v23 = vpop.eup %6368 }
0x1de8   :  { %v4050_v48 = vmul.f32 %v6369_v23, %v6353_v18 }
0x1de9   :  { %v6371_v43 = vpop.eup %6370 }
0x1dea   :  { %v4052_v32 = vmul.f32 %v6371_v43, %v6355_v41 }
0x1dec   :  { %v4065_v37 = vpack.c.bf16 %v4052_v32, %v4050_v48 }
0x1dee   :  { %5762 = vmatprep.mubr.msk.bf16.mxu0 %vm155_vm3, %v4065_v37 }
0x1def   :  { %v6373_v1 = vpop.eup %6372 }
0x1df0   :  { %v6375_v51 = vpop.eup %6374  ;;  %v4056_v2 = vmul.f32 %v6373_v1, %v6359_v61 }
0x1df1   :  { %v4054_v47 = vmul.f32 %v6375_v51, %v7836_v31 }
0x1df3   :  { %v4066_v8 = vpack.c.bf16 %v4056_v2, %v4054_v47 }
0x1dfd   :  { %v4048_v58 = vpop.xlane.xlu0 %4047 }
0x1e01   :  { %v4042_v11 = vpop.xlane.xlu0 %4041 }
0x1e05   :  { %v4072_v14 = vpop.permute.xlu0 %4071 }
0x1e06   :  { %5760 = vmatprep.subr.bf16.mxu0 %v4072_v14 }
0x1e07   :  { %5761 = vmatpush3.bf16.msra.mxu0 %v4072_v14 }
0x1e08   :  { %5774 = vmatprep.subr.bf16.mxu0 %v6044_v24 }
0x1e09   :  { %v5953_v22 = vpop.permute.xlu0 %5952 }
0x1e0a   :  { %5763 = vmatmul.mubr.msk.bf16.vlgmr.msra.gmra.mrb[76].mxu0 %vm155_vm3, %v4066_v8  ;;  %v5955_v15 = vunpack.i.h.bf16 %v5953_v22  ;;  %v5954_v45 = vunpack.i.l.bf16 %v5953_v22 }
0x1e0b   :  { %5775 = vmatpush3.bf16.msra.mxu0 %v6044_v24 }
0x1e0c   :  { %v4288_v51 = vsel %vm415_vm4, %v7592_v19, %v5955_v15  ;;  %v4287_v2 = vsel %vm415_vm4, %v7588_v60, %v5954_v45 }
0x1e0d   :  { %v5963_v37 = vpop.permute.xlu0 %5962 }
0x1e0e   :  { %v5965_v1 = vunpack.i.h.bf16 %v5963_v37 }
0x1e10   :  { %v4296_v60 = vsel %vm1922_vm5, %v4288_v51, %v5965_v1 }
0x1e15   :  { %v4045_v18 = vpop.xlane.xlu1 %4044 }
0x1e16   :  { %6376 = vrcp.f32 %v4045_v18 }
0x1e17   :  { %6378 = vrcp.f32 %v4042_v11  ;;  %v5964_v11 = vunpack.i.l.bf16 %v5963_v37 }
0x1e18   :  { %6380 = vrcp.f32 %v4048_v58 }
0x1e19   :  { %v4039_v41 = vpop.xlane.xlu1 %4038  ;;  %v4295_v19 = vsel %vm1922_vm5, %v4287_v2, %v5964_v11 }
0x1e1a   :  { %6382 = vrcp.f32 %v4039_v41 }
0x1e1d   :  { %v4131_v35 = vpop.permute.xlu1 %4130 }
0x1e1e   :  { %5766 = vmatprep.subr.bf16.mxu1 %v4131_v35 }
0x1e1f   :  { %5767 = vmatpush3.bf16.msra.mxu1 %v4131_v35 }
0x1e20   :  { %v6377_v53 = vpop.eup %6376 }
0x1e21   :  { %v4133_v46 = vpop.permute.xlu1 %4132  ;;  %v6379_v61 = vpop.eup %6378  ;;  %v4062_v20 = vmul.f32 %v6377_v53, %v6365_v38  ;;  %v6045_v38 = vld [vmem:[%s8160_s7 + $0x18] sm:$0xff]  }
0x1e22   :  { %5768 = vmatprep.subr.bf16.mxu1 %v4133_v46  ;;  %v6381_v29 = vpop.eup %6380  ;;  %v4060_v56 = vmul.f32 %v6379_v61, %v7847_v57  ;;  %5776 = vmatprep.subr.bf16.mxu0 %v6045_v38 }
0x1e23   :  { %5769 = vmatpush3.bf16.msra.mxu1 %v4133_v46  ;;  %v4064_v30 = vmul.f32 %v6381_v29, %v7843_v39  ;;  %5777 = vmatpush3.bf16.msra.mxu0 %v6045_v38 }
0x1e24   :  { %v6383_v31 = vpop.eup %6382 }
0x1e25   :  { %v4058_v36 = vmul.f32 %v6383_v31, %v6367_v49  ;;  %v4068_v16 = vpack.c.bf16 %v4064_v30, %v4062_v20  ;;  %v5958_v25 = vpop.permute.xlu1 %5957 }
0x1e26   :  { %v5960_v12 = vunpack.i.h.bf16 %v5958_v25  ;;  %v5959_v58 = vunpack.i.l.bf16 %v5958_v25 }
0x1e27   :  { %v4067_v7 = vpack.c.bf16 %v4060_v56, %v4058_v36 }
0x1e28   :  { %v4290_v47 = vsel %vm415_vm4, %v7590_v13, %v5960_v12  ;;  %v4289_v8 = vsel %vm415_vm4, %v7586_v50, %v5959_v58 }
0x1e29   :  { %5770 = vmatprep.mubr.msk.bf16.mxu1 %vm155_vm3, %v4067_v7  ;;  %v5968_v32 = vpop.permute.xlu1 %5967 }
0x1e2a   :  { %5771 = vmatmul.mubr.msk.bf16.vlgmr.msra.gmra.mrb[88].mxu1 %vm155_vm3, %v4068_v16  ;;  %v5970_v42 = vunpack.i.h.bf16 %v5968_v32  ;;  %v5969_v10 = vunpack.i.l.bf16 %v5968_v32 }
0x1e2c   :  { %v4297_v53 = vsel %vm1922_vm5, %v4289_v8, %v5969_v10  ;;  %v4298_v46 = vsel %vm1922_vm5, %v4290_v47, %v5970_v42  ;;  %v5186_v10 = vld [vmem:[%s8161_s8 + $0x1] ss:$0 sm:$0xff] }
0x1edd   :  { %v5764_v57 = vpop.f32.mrb[76].mxu0 }
0x1ede   :  { %v4115_v39 = vpop.f32.mrb[77].mxu0 }
0x1edf   :  { %v5765_v4 = vpop.f32.mrb[78].mxu0 }
0x1ee0   :  { %v5976_v49 = vpack.i.bf16 %v5765_v4, %v5764_v57  ;;  %v4118_v44 = vpop.f32.mrb[79].mxu0 }
0x1ee1   :  { %v5971_v28 = vpack.i.bf16 %v4118_v44, %v4115_v39 }
0x1ee2   :  { %5977 = vrot.lane.b32.xlu1 %v5976_v49, %s8203_s25 }
0x1ee3   :  { %5972 = vrot.lane.b32.xlu0 %v5971_v28, %s8203_s25 }
0x1ee6   :  { %5987 = vrot.lane.b32.xlu1 %v5986_v3, %s8201_s1 }
0x1ee7   :  { %5982 = vrot.lane.b32.xlu0 %v8204_v52, %s8201_s1 }
0x1eea   :  { %5997 = vrot.lane.b32.xlu1 %v8205_v9, %s8202_s18 }
0x1eeb   :  { %5992 = vrot.lane.b32.xlu0 %v8206_v33, %s8202_s18 }
0x1efd   :  { %v5772_v23 = vpop.f32.mrb[88].mxu1 }
0x1efe   :  { %v4176_v43 = vpop.f32.mrb[89].mxu1 }
0x1eff   :  { %v5773_v48 = vpop.f32.mrb[90].mxu1 }
0x1f00   :  { %v6006_v17 = vpack.i.bf16 %v5773_v48, %v5772_v23  ;;  %v4179_v27 = vpop.f32.mrb[91].mxu1 }
0x1f01   :  { %v6001_v3 = vpack.i.bf16 %v4179_v27, %v4176_v43 }
0x1f02   :  { %6007 = vrot.lane.b32.xlu1 %v6006_v17, %s8203_s25 }
0x1f03   :  { %6002 = vrot.lane.b32.xlu0 %v6001_v3, %s8203_s25  ;;  %s8208_s25 = smov 32  }
0x1f54   :  { %v5978_v14 = vpop.permute.xlu1 %5977 }
0x1f55   :  { %v5980_v18 = vunpack.i.h.bf16 %v5978_v14  ;;  %v5979_v41 = vunpack.i.l.bf16 %v5978_v14  ;;  %v5973_v35 = vpop.permute.xlu0 %5972 }
0x1f56   :  { %v5975_v61 = vunpack.i.h.bf16 %v5973_v35  ;;  %v5974_v29 = vunpack.i.l.bf16 %v5973_v35 }
0x1f57   :  { %v4305_v31 = vsel %vm72_vm2, %v4297_v53, %v5979_v41  ;;  %v4306_v13 = vsel %vm72_vm2, %v4298_v46, %v5980_v18 }
0x1f58   :  { %v4312_v20 = vpack.c.bf16 %v4306_v13, %v4305_v31  ;;  %v4304_v50 = vsel %vm72_vm2, %v4296_v60, %v5975_v61  ;;  %v4303_v36 = vsel %vm72_vm2, %v4295_v19, %v5974_v29  ;;  %v5988_v30 = vpop.permute.xlu1 %5987 }
0x1f59   :  { %v4311_v56 = vpack.c.bf16 %v4304_v50, %v4303_v36  ;;  %v5983_v7 = vpop.permute.xlu0 %5982  ;;  %v5990_v24 = vunpack.i.h.bf16 %v5988_v30  ;;  %v5989_v38 = vunpack.i.l.bf16 %v5988_v30 }
0x1f5a   :  { %v5985_v39 = vunpack.i.h.bf16 %v5983_v7  ;;  %v5984_v4 = vunpack.i.l.bf16 %v5983_v7 }
0x1f5b   :  { %5778 = vmatprep.mubr.msk.bf16.mxu0 %vm155_vm3, %v4311_v56  ;;  %v4294_v9 = vsel %vm415_vm4, %v7601_v6, %v5990_v24  ;;  %v4293_v33 = vsel %vm415_vm4, %v7597_v54, %v5989_v38 }
0x1f5c   :  { %5779 = vmatmul.mubr.msk.bf16.vlgmr.msra.gmra.mrb[80].mxu0 %vm155_vm3, %v4312_v20  ;;  %v5998_v16 = vpop.permute.xlu1 %5997  ;;  %v4292_v43 = vsel %vm415_vm4, %v7604_v63, %v5985_v39  ;;  %v4291_v48 = vsel %vm415_vm4, %v7599_v59, %v5984_v4 }
0x1f5d   :  { %v5993_v57 = vpop.permute.xlu0 %5992  ;;  %v6000_v49 = vunpack.i.h.bf16 %v5998_v16  ;;  %v5999_v44 = vunpack.i.l.bf16 %v5998_v16 }
0x1f5e   :  { %v5995_v28 = vunpack.i.h.bf16 %v5993_v57  ;;  %v5994_v52 = vunpack.i.l.bf16 %v5993_v57 }
0x1f5f   :  { %v4301_v25 = vsel %vm1922_vm5, %v4293_v33, %v5999_v44  ;;  %v4302_v22 = vsel %vm1922_vm5, %v4294_v9, %v6000_v49 }
0x1f60   :  { %v4299_v6 = vsel %vm1922_vm5, %v4291_v48, %v5994_v52  ;;  %v4300_v54 = vsel %vm1922_vm5, %v4292_v43, %v5995_v28 }
0x1f74   :  { %v6008_v23 = vpop.permute.xlu1 %6007 }
0x1f75   :  { %v6010_v17 = vunpack.i.h.bf16 %v6008_v23  ;;  %v6009_v27 = vunpack.i.l.bf16 %v6008_v23  ;;  %v6003_v3 = vpop.permute.xlu0 %6002 }
0x1f76   :  { %v6005_v32 = vunpack.i.h.bf16 %v6003_v3  ;;  %v6004_v15 = vunpack.i.l.bf16 %v6003_v3 }
0x1f77   :  { %v4309_v45 = vsel %vm72_vm2, %v4301_v25, %v6009_v27  ;;  %v4310_v63 = vsel %vm72_vm2, %v4302_v22, %v6010_v17 }
0x1f78   :  { %v4314_v37 = vpack.c.bf16 %v4310_v63, %v4309_v45  ;;  %v4308_v59 = vsel %vm72_vm2, %v4300_v54, %v6005_v32  ;;  %v4307_v12 = vsel %vm72_vm2, %v4299_v6, %v6004_v15 }
0x1f79   :  { %v4313_v58 = vpack.c.bf16 %v4308_v59, %v4307_v12 }
0x1f7b   :  { %5782 = vmatprep.mubr.msk.bf16.mxu0 %vm155_vm3, %v4313_v58 }
0x1f7c   :  { %5783 = vmatmul.mubr.msk.bf16.gmra.mrb[84].mxu0 %vm155_vm3, %v4314_v37 }
0x202f   :  { %v5780_v42 = vpop.f32.mrb[80].mxu0 }
0x2030   :  { %v4378_v1 = vpop.f32.mrb[81].mxu0  ;;  %v4411_v11 = vadd.f32 %v5780_v42, %v7357_v40 }
0x2031   :  { %v4409_v51 = vadd.f32 %v4378_v1, %v7353_v21  ;;  %v5781_v2 = vpop.f32.mrb[82].mxu0 }
0x2032   :  { %v4381_v14 = vpop.f32.mrb[83].mxu0  ;;  %v7952_v18 = vadd.f32 %v5186_v10, %v4411_v11  ;;  %v4412_v41 = vadd.f32 %v5781_v2, %v7363_v62 }
0x2033   :  { %v7949_v47 = vadd.f32 %v5186_v10, %v4409_v51  ;;  %v4410_v8 = vadd.f32 %v4381_v14, %v7359_v5 }
0x2034   :  { %v7961_v21 = vadd.f32 %v5186_v10, %v4412_v41  ;;  %v4443_v46 = vsel %vm155_vm3, %v7952_v18, 0.0  ;;  %v6046_v41 = vld [vmem:[%s8162_s11 + $0x10] sm:$0xff]  }
0x2035   :  { %v7955_v35 = vadd.f32 %v5186_v10, %v4410_v8  ;;  %v4437_v53 = vsel %vm155_vm3, %v7949_v47, 0.0  ;;  %5786 = vmatprep.subr.bf16.mxu1 %v6046_v41 }
0x2036   :  { %4438 = vadd.xlane.f32.xlu0 %v4437_v53  ;;  %v4446_v5 = vsel %vm155_vm3, %v7961_v21, 0.0  ;;  %5787 = vmatpush3.bf16.msra.mxu1 %v6046_v41 }
0x2037   :  { %v4440_v40 = vsel %vm155_vm3, %v7955_v35, 0.0 }
0x2038   :  { %4441 = vadd.xlane.f32.xlu1 %v4440_v40  ;;  %v6047_v40 = vld [vmem:[%s8162_s11 + $0x18] sm:$0xff]  }
0x2039   :  { %5788 = vmatprep.subr.bf16.mxu1 %v6047_v40 }
0x203a   :  { %4444 = vadd.xlane.f32.xlu0 %v4443_v46  ;;  %5789 = vmatpush3.bf16.msra.mxu1 %v6047_v40  ;;  %v8207_v46 = vmov 0.0  }
0x203b   :  { %5822 = vmatprep.subr.bf16.mxu1 %v8207_v46 }
0x203e   :  { %4447 = vadd.xlane.f32.xlu0 %v4446_v5 }
0x204f   :  { %v5784_v62 = vpop.f32.mrb[84].mxu0 }
0x2050   :  { %v4394_v61 = vpop.f32.mrb[85].mxu0  ;;  %v4415_v29 = vadd.f32 %v5784_v62, %v7377_v55 }
0x2051   :  { %v4413_v19 = vadd.f32 %v4394_v61, %v7373_v34  ;;  %v5785_v60 = vpop.f32.mrb[86].mxu0 }
0x2052   :  { %v4397_v31 = vpop.f32.mrb[87].mxu0  ;;  %v4416_v20 = vadd.f32 %v5785_v60, %v7383_v26  ;;  %v7973_v36 = vadd.f32 %v5186_v10, %v4415_v29 }
0x2053   :  { %v7969_v13 = vadd.f32 %v5186_v10, %v4413_v19  ;;  %v4414_v50 = vadd.f32 %v4397_v31, %v7379_v0 }
0x2054   :  { %v7979_v7 = vadd.f32 %v5186_v10, %v4416_v20  ;;  %v4455_v55 = vsel %vm155_vm3, %v7973_v36, 0.0 }
0x2055   :  { %v7975_v56 = vadd.f32 %v5186_v10, %v4414_v50  ;;  %v4449_v30 = vsel %vm155_vm3, %v7969_v13, 0.0 }
0x2056   :  { %4450 = vadd.xlane.f32.xlu1 %v4449_v30  ;;  %v4458_v0 = vsel %vm155_vm3, %v7979_v7, 0.0 }
0x2057   :  { %v4452_v34 = vsel %vm155_vm3, %v7975_v56, 0.0 }
0x2058   :  { %4453 = vadd.xlane.f32.xlu0 %v4452_v34 }
0x205a   :  { %4456 = vadd.xlane.f32.xlu1 %v4455_v55 }
0x205c   :  { %4459 = vadd.xlane.f32.xlu0 %v4458_v0 }
0x20c3   :  { %v4439_v26 = vpop.xlane.xlu0 %4438 }
0x20c4   :  { %v4461_v16 = vmul.f32 0.03125, %v4439_v26  ;;  %v5189_v26 = vld [vmem:[%s8163_s9 + $0x1] ss:$0 sm:$0xff] }
0x20c5   :  { %v4442_v24 = vpop.xlane.xlu1 %4441 }
0x20c6   :  { %v7988_v38 = vsub.f32 %v7949_v47, %v4461_v16  ;;  %v4462_v57 = vmul.f32 0.03125, %v4442_v24 }
0x20c7   :  { %v4445_v39 = vpop.xlane.xlu0 %4444 }
0x20c8   :  { %v7991_v4 = vsub.f32 %v7955_v35, %v4462_v57  ;;  %v4463_v49 = vmul.f32 0.03125, %v4445_v39  ;;  %v4477_v44 = vmul.f32 %v7988_v38, %v7988_v38 }
0x20ca   :  { %v7996_v28 = vsub.f32 %v7952_v18, %v4463_v49  ;;  %v4485_v52 = vsel %vm155_vm3, %v4477_v44, 0.0  ;;  %v4478_v9 = vmul.f32 %v7991_v4, %v7991_v4  ;;  %v5190_v44 = vld [vmem:[%s8164_s10 + $0x1] ss:$0 sm:$0xff] }
0x20cb   :  { %v4448_v33 = vpop.xlane.xlu0 %4447  ;;  %4486 = vadd.xlane.f32.xlu1 %v4485_v52 }
0x20cc   :  { %v4464_v23 = vmul.f32 0.03125, %v4448_v33  ;;  %v4488_v43 = vsel %vm155_vm3, %v4478_v9, 0.0  ;;  %v4479_v48 = vmul.f32 %v7996_v28, %v7996_v28 }
0x20cd   :  { %4489 = vadd.xlane.f32.xlu0 %v4488_v43 }
0x20ce   :  { %v8005_v17 = vsub.f32 %v7961_v21, %v4464_v23  ;;  %v4491_v27 = vsel %vm155_vm3, %v4479_v48, 0.0 }
0x20cf   :  { %4492 = vadd.xlane.f32.xlu1 %v4491_v27 }
0x20d0   :  { %v4480_v3 = vmul.f32 %v8005_v17, %v8005_v17 }
0x20d2   :  { %v4494_v25 = vsel %vm155_vm3, %v4480_v3, 0.0 }
0x20d3   :  { %4495 = vadd.xlane.f32.xlu0 %v4494_v25 }
0x20e3   :  { %v4451_v22 = vpop.xlane.xlu1 %4450 }
0x20e4   :  { %v4465_v32 = vmul.f32 0.03125, %v4451_v22 }
0x20e5   :  { %v4454_v15 = vpop.xlane.xlu0 %4453 }
0x20e6   :  { %v8012_v6 = vsub.f32 %v7969_v13, %v4465_v32  ;;  %v4466_v54 = vmul.f32 0.03125, %v4454_v15 }
0x20e7   :  { %v4457_v45 = vpop.xlane.xlu1 %4456 }
0x20e8   :  { %v8015_v63 = vsub.f32 %v7975_v56, %v4466_v54  ;;  %v4467_v37 = vmul.f32 0.03125, %v4457_v45  ;;  %v4481_v59 = vmul.f32 %v8012_v6, %v8012_v6 }
0x20e9   :  { %v4460_v12 = vpop.xlane.xlu0 %4459 }
0x20ea   :  { %v8020_v58 = vsub.f32 %v7973_v36, %v4467_v37  ;;  %v4468_v42 = vmul.f32 0.03125, %v4460_v12  ;;  %v4497_v10 = vsel %vm155_vm3, %v4481_v59, 0.0  ;;  %v4482_v1 = vmul.f32 %v8015_v63, %v8015_v63 }
0x20eb   :  { %4498 = vadd.xlane.f32.xlu1 %v4497_v10 }
0x20ec   :  { %v8026_v11 = vsub.f32 %v7979_v7, %v4468_v42  ;;  %v4500_v51 = vsel %vm155_vm3, %v4482_v1, 0.0  ;;  %v4483_v2 = vmul.f32 %v8020_v58, %v8020_v58 }
0x20ed   :  { %4501 = vadd.xlane.f32.xlu0 %v4500_v51 }
0x20ee   :  { %v4503_v14 = vsel %vm155_vm3, %v4483_v2, 0.0  ;;  %v4484_v8 = vmul.f32 %v8026_v11, %v8026_v11 }
0x20ef   :  { %4504 = vadd.xlane.f32.xlu1 %v4503_v14 }
0x20f0   :  { %v4506_v53 = vsel %vm155_vm3, %v4484_v8, 0.0 }
0x20f1   :  { %4507 = vadd.xlane.f32.xlu0 %v4506_v53 }
0x2158   :  { %v4487_v5 = vpop.xlane.xlu1 %4486 }
0x2159   :  { %v4509_v62 = vmul.f32 0.03125, %v4487_v5 }
0x215a   :  { %v4490_v61 = vpop.xlane.xlu0 %4489 }
0x215b   :  { %v4517_v29 = vadd.f32 1e-05, %v4509_v62  ;;  %v4510_v19 = vmul.f32 0.03125, %v4490_v61 }
0x215c   :  { %v4493_v60 = vpop.xlane.xlu1 %4492 }
0x215d   :  { %6384 = vrsqrt.f32 %v4517_v29  ;;  %v4518_v31 = vadd.f32 1e-05, %v4510_v19  ;;  %v4511_v20 = vmul.f32 0.03125, %v4493_v60 }
0x215f   :  { %6386 = vrsqrt.f32 %v4518_v31  ;;  %v4519_v50 = vadd.f32 1e-05, %v4511_v20 }
0x2160   :  { %v4496_v30 = vpop.xlane.xlu0 %4495 }
0x2161   :  { %6388 = vrsqrt.f32 %v4519_v50  ;;  %v4512_v34 = vmul.f32 0.03125, %v4496_v30 }
0x2163   :  { %v4520_v55 = vadd.f32 1e-05, %v4512_v34  ;;  %v6051_v34 = vld [vmem:[%s8165_s13 + $0x58] sm:$0xff]  }
0x2165   :  { %6390 = vrsqrt.f32 %v4520_v55  ;;  %v6052_v55 = vld [vmem:[%s8165_s13 + $0x60] sm:$0xff]  }
0x2167   :  { %v6385_v0 = vpop.eup %6384 }
0x2168   :  { %v4533_v16 = vmul.f32 %v6385_v0, %v7988_v38  ;;  %v6053_v0 = vld [vmem:[%s8165_s13 + $0x68] sm:$0xff]  }
0x2169   :  { %v6387_v24 = vpop.eup %6386 }
0x216a   :  { %v4534_v57 = vmul.f32 %v6387_v24, %v7991_v4  ;;  %v4547_v39 = vmul.f32 %v5189_v26, %v4533_v16  ;;  %v6055_v16 = vld [vmem:[%s8165_s13 + $0x78] sm:$0xff]   ;;  %v5196_v24 = vld [vmem:[%s8166_s12 + $0x1] ss:$0 sm:$0xff] }
0x216b   :  { %v6389_v49 = vpop.eup %6388 }
0x216c   :  { %v4535_v52 = vmul.f32 %v6389_v49, %v7996_v28  ;;  %v4548_v9 = vmul.f32 %v5189_v26, %v4534_v57  ;;  %v4561_v33 = vadd.f32 %v5190_v44, %v4547_v39 }
0x216e   :  { %v4562_v23 = vadd.f32 %v5190_v44, %v4548_v9  ;;  %v4549_v48 = vmul.f32 %v5189_v26, %v4535_v52 }
0x216f   :  { %v6391_v43 = vpop.eup %6390 }
0x2170   :  { %v4536_v27 = vmul.f32 %v6391_v43, %v8005_v17  ;;  %v4569_v3 = vpack.c.bf16 %v4562_v23, %v4561_v33  ;;  %v4563_v4 = vadd.f32 %v5190_v44, %v4549_v48 }
0x2172   :  { %v4550_v38 = vmul.f32 %v5189_v26, %v4536_v27  ;;  %5790 = vmatprep.mubr.msk.bf16.mxu1 %vm155_vm3, %v4569_v3 }
0x2174   :  { %v4564_v25 = vadd.f32 %v5190_v44, %v4550_v38 }
0x2176   :  { %v4570_v22 = vpack.c.bf16 %v4564_v25, %v4563_v4 }
0x2178   :  { %5791 = vmatmul.mubr.msk.bf16.vlgmr.msra.gmra.mrb[92].mxu1 %vm155_vm3, %v4570_v22  ;;  %v4499_v32 = vpop.xlane.xlu1 %4498 }
0x2179   :  { %v4513_v15 = vmul.f32 0.03125, %v4499_v32 }
0x217a   :  { %v4502_v54 = vpop.xlane.xlu0 %4501 }
0x217b   :  { %v4521_v28 = vadd.f32 1e-05, %v4513_v15  ;;  %v4514_v45 = vmul.f32 0.03125, %v4502_v54 }
0x217c   :  { %v4505_v37 = vpop.xlane.xlu1 %4504 }
0x217d   :  { %6392 = vrsqrt.f32 %v4521_v28  ;;  %v4522_v59 = vadd.f32 1e-05, %v4514_v45  ;;  %v4515_v12 = vmul.f32 0.03125, %v4505_v37 }
0x217e   :  { %v4508_v42 = vpop.xlane.xlu0 %4507 }
0x217f   :  { %6394 = vrsqrt.f32 %v4522_v59  ;;  %v4523_v17 = vadd.f32 1e-05, %v4515_v12  ;;  %v4516_v10 = vmul.f32 0.03125, %v4508_v42 }
0x2181   :  { %6396 = vrsqrt.f32 %v4523_v17  ;;  %v4524_v1 = vadd.f32 1e-05, %v4516_v10 }
0x2183   :  { %6398 = vrsqrt.f32 %v4524_v1 }
0x2187   :  { %v6393_v51 = vpop.eup %6392 }
0x2188   :  { %v4537_v2 = vmul.f32 %v6393_v51, %v8012_v6 }
0x2189   :  { %v6395_v14 = vpop.eup %6394 }
0x218a   :  { %v4538_v8 = vmul.f32 %v6395_v14, %v8015_v63  ;;  %v4551_v41 = vmul.f32 %v5189_v26, %v4537_v2  ;;  %v6048_v63 = vld [vmem:[%s8165_s13 + $0x40] sm:$0xff]  }
0x218b   :  { %v6397_v53 = vpop.eup %6396  ;;  %5798 = vmatprep.subr.bf16.mxu0 %v6048_v63 }
0x218c   :  { %v4539_v40 = vmul.f32 %v6397_v53, %v8020_v58  ;;  %v4552_v5 = vmul.f32 %v5189_v26, %v4538_v8  ;;  %v4565_v29 = vadd.f32 %v5190_v44, %v4551_v41  ;;  %5799 = vmatpush3.bf16.msra.mxu0 %v6048_v63  ;;  %v6049_v58 = vld [vmem:[%s8165_s13 + $0x48] sm:$0xff]  }
0x218d   :  { %v6399_v62 = vpop.eup %6398  ;;  %5800 = vmatprep.subr.bf16.mxu0 %v6049_v58 }
0x218e   :  { %v4540_v61 = vmul.f32 %v6399_v62, %v8026_v11  ;;  %v4566_v19 = vadd.f32 %v5190_v44, %v4552_v5  ;;  %v4553_v60 = vmul.f32 %v5189_v26, %v4539_v40  ;;  %v6050_v11 = vld [vmem:[%s8165_s13 + $0x50] sm:$0xff]  }
0x2190   :  { %v4571_v31 = vpack.c.bf16 %v4566_v19, %v4565_v29  ;;  %v4554_v20 = vmul.f32 %v5189_v26, %v4540_v61  ;;  %v4567_v50 = vadd.f32 %v5190_v44, %v4553_v60  ;;  %5801 = vmatpush3.bf16.msra.mxu0 %v6049_v58  ;;  %v6054_v26 = vld [vmem:[%s8165_s13 + $0x70] sm:$0xff]  }
0x2191   :  { %5802 = vmatprep.subr.bf16.mxu0 %v6050_v11 }
0x2192   :  { %5794 = vmatprep.mubr.msk.bf16.mxu1 %vm155_vm3, %v4571_v31  ;;  %v4568_v6 = vadd.f32 %v5190_v44, %v4554_v20 }
0x2194   :  { %v4572_v30 = vpack.c.bf16 %v4568_v6, %v4567_v50  ;;  %5803 = vmatpush3.bf16.msra.mxu0 %v6050_v11 }
0x2195   :  { %5804 = vmatprep.subr.bf16.mxu0 %v6051_v34 }
0x2196   :  { %5795 = vmatmul.mubr.msk.bf16.gmra.mrb[96].mxu1 %vm155_vm3, %v4572_v30 }
0x2197   :  { %5838 = vmatprep.mubr.msk.bf16.mxu1 %vm6419_vm1, %v8207_v46 }
0x2198   :  { %5805 = vmatpush3.bf16.msra.mxu0 %v6051_v34 }
0x2199   :  { %5806 = vmatprep.subr.bf16.mxu0 %v6052_v55 }
0x219c   :  { %5807 = vmatpush3.bf16.msra.mxu0 %v6052_v55 }
0x219d   :  { %5808 = vmatprep.subr.bf16.mxu0 %v6053_v0 }
0x21a0   :  { %5809 = vmatpush3.bf16.msra.mxu0 %v6053_v0 }
0x21a1   :  { %5810 = vmatprep.subr.bf16.mxu0 %v6054_v26 }
0x21a4   :  { %5811 = vmatpush3.bf16.msra.mxu0 %v6054_v26 }
0x21a5   :  { %5812 = vmatprep.subr.bf16.mxu0 %v6055_v16 }
0x21a8   :  { %5813 = vmatpush3.bf16.msra.mxu0 %v6055_v16 }
0x224b   :  { %v5792_v57 = vpop.f32.mrb[92].mxu1 }
0x224c   :  { %v4653_v39 = vadd.f32 %v5792_v57, %v5196_v24  ;;  %v4644_v49 = vpop.f32.mrb[93].mxu1 }
0x224d   :  { %v4645_v44 = vadd.f32 %v5196_v24, %v4644_v49  ;;  %v5793_v52 = vpop.f32.mrb[94].mxu1 }
0x224e   :  { %v4677_v9 = vmul.f32 %v4653_v39, %v4653_v39  ;;  %v4656_v33 = vadd.f32 %v5793_v52, %v5196_v24  ;;  %v4647_v23 = vpop.f32.mrb[95].mxu1 }
0x224f   :  { %v4675_v43 = vmul.f32 %v4645_v44, %v4645_v44  ;;  %v4648_v48 = vadd.f32 %v5196_v24, %v4647_v23 }
0x2250   :  { %v4685_v27 = vmul.f32 %v4677_v9, %v4653_v39  ;;  %v4678_v3 = vmul.f32 %v4656_v33, %v4656_v33 }
0x2251   :  { %v4683_v38 = vmul.f32 %v4675_v43, %v4645_v44  ;;  %v4676_v4 = vmul.f32 %v4648_v48, %v4648_v48 }
0x2252   :  { %v4693_v25 = vmul.f32 0.044715, %v4685_v27  ;;  %v4686_v22 = vmul.f32 %v4678_v3, %v4656_v33 }
0x2253   :  { %v4691_v32 = vmul.f32 0.044715, %v4683_v38  ;;  %v4684_v15 = vmul.f32 %v4676_v4, %v4648_v48 }
0x2254   :  { %v4701_v54 = vadd.f32 %v4693_v25, %v4653_v39  ;;  %v4694_v28 = vmul.f32 0.044715, %v4686_v22 }
0x2255   :  { %v4699_v45 = vadd.f32 %v4691_v32, %v4645_v44  ;;  %v4692_v37 = vmul.f32 0.044715, %v4684_v15 }
0x2256   :  { %v4709_v59 = vmul.f32 0.7978846, %v4701_v54  ;;  %v4702_v12 = vadd.f32 %v4694_v28, %v4656_v33 }
0x2257   :  { %v4707_v42 = vmul.f32 0.7978846, %v4699_v45  ;;  %v4700_v17 = vadd.f32 %v4692_v37, %v4648_v48 }
0x2258   :  { %6400 = vtanh.f32 %v4709_v59  ;;  %v4710_v10 = vmul.f32 0.7978846, %v4702_v12 }
0x2259   :  { %6402 = vtanh.f32 %v4707_v42  ;;  %v4708_v1 = vmul.f32 0.7978846, %v4700_v17 }
0x225a   :  { %6404 = vtanh.f32 %v4710_v10 }
0x225b   :  { %6406 = vtanh.f32 %v4708_v1 }
0x2262   :  { %v6401_v51 = vpop.eup %6400 }
0x2263   :  { %v6403_v2 = vpop.eup %6402  ;;  %v4725_v14 = vadd.f32 1.0, %v6401_v51 }
0x2264   :  { %v6405_v8 = vpop.eup %6404  ;;  %v4723_v41 = vadd.f32 1.0, %v6403_v2 }
0x2265   :  { %v6407_v53 = vpop.eup %6406  ;;  %v4733_v40 = vmul.f32 0.5, %v4725_v14  ;;  %v4726_v5 = vadd.f32 1.0, %v6405_v8 }
0x2266   :  { %v4724_v62 = vadd.f32 1.0, %v6407_v53  ;;  %v4731_v61 = vmul.f32 0.5, %v4723_v41 }
0x2267   :  { %v4734_v29 = vmul.f32 0.5, %v4726_v5  ;;  %v4741_v60 = vmul.f32 %v4733_v40, %v4653_v39 }
0x2268   :  { %v4732_v19 = vmul.f32 0.5, %v4724_v62  ;;  %v4739_v30 = vmul.f32 %v4731_v61, %v4645_v44  ;;  %v6056_v61 = vld [vmem:[%s8168_s15] sm:$0xff]  }
0x2269   :  { %v4742_v31 = vmul.f32 %v4734_v29, %v4656_v33  ;;  %v5796_v20 = vpop.f32.mrb[96].mxu1  ;;  %5823 = vmatpush3.bf16.msra.mxu1 %v6056_v61  ;;  %v6057_v29 = vld [vmem:[%s8168_s15 + $0x8] sm:$0xff]  }
0x226a   :  { %v4669_v50 = vadd.f32 %v5796_v20, %v5196_v24  ;;  %v4660_v6 = vpop.f32.mrb[97].mxu1  ;;  %v4740_v63 = vmul.f32 %v4732_v19, %v4648_v48  ;;  %5824 = vmatprep.subr.bf16.mxu1 %v8207_v46  ;;  %v6058_v19 = vld [vmem:[%s8168_s15 + $0x10] sm:$0xff]  }
0x226b   :  { %v4748_v58 = vpack.c.bf16 %v4742_v31, %v4741_v60  ;;  %v4661_v11 = vadd.f32 %v5196_v24, %v4660_v6  ;;  %v5797_v34 = vpop.f32.mrb[98].mxu1  ;;  %v6059_v60 = vld [vmem:[%s8168_s15 + $0x18] sm:$0xff]   ;;  %v6060_v31 = vld [vmem:[%s8168_s15 + $0x20] sm:$0xff]  }
0x226c   :  { %v4681_v55 = vmul.f32 %v4669_v50, %v4669_v50  ;;  %v4672_v0 = vadd.f32 %v5797_v34, %v5196_v24  ;;  %v4663_v26 = vpop.f32.mrb[99].mxu1  ;;  %v4747_v16 = vpack.c.bf16 %v4740_v63, %v4739_v30  ;;  %v6061_v34 = vld [vmem:[%s8168_s15 + $0x28] sm:$0xff]  }
0x226d   :  { %v4679_v57 = vmul.f32 %v4661_v11, %v4661_v11  ;;  %v4664_v49 = vadd.f32 %v5196_v24, %v4663_v26  ;;  %5825 = vmatpush3.bf16.msra.mxu1 %v6057_v29 }
0x226e   :  { %v4689_v52 = vmul.f32 %v4681_v55, %v4669_v50  ;;  %v4682_v9 = vmul.f32 %v4672_v0, %v4672_v0  ;;  %5814 = vmatprep.mubr.bf16.mxu0 %v4747_v16  ;;  %5826 = vmatprep.subr.bf16.mxu1 %v8207_v46  ;;  %v6062_v55 = vld [vmem:[%s8168_s15 + $0x30] sm:$0xff]  }
0x226f   :  { %v4687_v23 = vmul.f32 %v4679_v57, %v4661_v11  ;;  %v4680_v39 = vmul.f32 %v4664_v49, %v4664_v49  ;;  %5815 = vmatmul.mubr.bf16.vlgmr.msra.gmra.mrb[88].mxu0 %v4748_v58 }
0x2270   :  { %v4697_v33 = vmul.f32 0.044715, %v4689_v52  ;;  %v4690_v43 = vmul.f32 %v4682_v9, %v4672_v0 }
0x2271   :  { %v4695_v27 = vmul.f32 0.044715, %v4687_v23  ;;  %v4688_v44 = vmul.f32 %v4680_v39, %v4664_v49  ;;  %5827 = vmatpush3.bf16.msra.mxu1 %v6058_v19  ;;  %v6063_v23 = vld [vmem:[%s8168_s15 + $0x38] sm:$0xff]  }
0x2272   :  { %v4705_v48 = vadd.f32 %v4697_v33, %v4669_v50  ;;  %v4698_v3 = vmul.f32 0.044715, %v4690_v43  ;;  %5828 = vmatprep.subr.bf16.mxu1 %v8207_v46 }
0x2273   :  { %v4703_v38 = vadd.f32 %v4695_v27, %v4661_v11  ;;  %v4696_v4 = vmul.f32 0.044715, %v4688_v44 }
0x2274   :  { %v4713_v25 = vmul.f32 0.7978846, %v4705_v48  ;;  %v4706_v22 = vadd.f32 %v4698_v3, %v4672_v0 }
0x2275   :  { %v4711_v32 = vmul.f32 0.7978846, %v4703_v38  ;;  %v4704_v15 = vadd.f32 %v4696_v4, %v4664_v49  ;;  %5829 = vmatpush3.bf16.msra.mxu1 %v6059_v60 }
0x2276   :  { %6408 = vtanh.f32 %v4713_v25  ;;  %v4714_v24 = vmul.f32 0.7978846, %v4706_v22  ;;  %5830 = vmatprep.subr.bf16.mxu1 %v8207_v46 }
0x2277   :  { %6410 = vtanh.f32 %v4711_v32  ;;  %v4712_v54 = vmul.f32 0.7978846, %v4704_v15 }
0x2278   :  { %6412 = vtanh.f32 %v4714_v24 }
0x2279   :  { %6414 = vtanh.f32 %v4712_v54  ;;  %5831 = vmatpush3.bf16.msra.mxu1 %v6060_v31 }
0x227a   :  { %5832 = vmatprep.subr.bf16.mxu1 %v8207_v46 }
0x227d   :  { %5833 = vmatpush3.bf16.msra.mxu1 %v6061_v34 }
0x227e   :  { %5834 = vmatprep.subr.bf16.mxu1 %v8207_v46 }
0x2280   :  { %v6409_v28 = vpop.eup %6408 }
0x2281   :  { %v6411_v45 = vpop.eup %6410  ;;  %v4729_v37 = vadd.f32 1.0, %v6409_v28  ;;  %5835 = vmatpush3.bf16.msra.mxu1 %v6062_v55 }
0x2282   :  { %v6413_v59 = vpop.eup %6412  ;;  %v4727_v12 = vadd.f32 1.0, %v6411_v45  ;;  %5836 = vmatprep.subr.bf16.mxu1 %v8207_v46 }
0x2283   :  { %v6415_v42 = vpop.eup %6414  ;;  %v4730_v17 = vadd.f32 1.0, %v6413_v59  ;;  %v4737_v10 = vmul.f32 0.5, %v4729_v37 }
0x2284   :  { %v4728_v1 = vadd.f32 1.0, %v6415_v42  ;;  %v4735_v51 = vmul.f32 0.5, %v4727_v12 }
0x2285   :  { %v4738_v2 = vmul.f32 0.5, %v4730_v17  ;;  %v4745_v8 = vmul.f32 %v4737_v10, %v4669_v50  ;;  %v5228_v50 = vld [vmem:[%s8167_s14 + $0x1] ss:$0 sm:$0xff]  ;;  %5837 = vmatpush3.bf16.msra.mxu1 %v6063_v23  ;;  %v5229_v17 = vld [vmem:[%s8169_s16] ss:$0 sm:$0xff] }
0x2286   :  { %v4736_v14 = vmul.f32 0.5, %v4728_v1  ;;  %v4743_v53 = vmul.f32 %v4735_v51, %v4661_v11 }
0x2287   :  { %v4746_v41 = vmul.f32 %v4738_v2, %v4672_v0 }
0x2288   :  { %v4744_v40 = vmul.f32 %v4736_v14, %v4664_v49  ;;  %v6416_v14 = vld [vmem:[%s8193_s30] sm:$0xff] }
0x2289   :  { %v4750_v5 = vpack.c.bf16 %v4746_v41, %v4745_v8 }
0x228a   :  { %v4749_v62 = vpack.c.bf16 %v4744_v40, %v4743_v53  ;;  %v6417_v40 = vld [vmem:[%s8193_s30 + $0x8] sm:$0xff] }
0x228c   :  { %5818 = vmatprep.mubr.bf16.mxu0 %v4749_v62 }
0x228d   :  { %5819 = vmatmul.mubr.bf16.gmra.mrb[92].mxu0 %v4750_v5 }
0x2342   :  { %v5816_v20 = vpop.f32.mrb[88].mxu0 }
0x2343   :  { %v4850_v6 = vpop.f32.mrb[89].mxu0  ;;  %v4883_v0 = vadd.f32 %v5816_v20, %v7952_v18 }
0x2344   :  { %v4881_v30 = vadd.f32 %v4850_v6, %v7949_v47  ;;  %v5817_v63 = vpop.f32.mrb[90].mxu0 }
0x2345   :  { %v4853_v58 = vpop.f32.mrb[91].mxu0  ;;  %v4884_v47 = vadd.f32 %v5817_v63, %v7961_v21  ;;  %v4899_v39 = vadd.f32 %v5228_v50, %v4883_v0 }
0x2346   :  { %v4897_v11 = vadd.f32 %v5228_v50, %v4881_v30  ;;  %v4882_v49 = vadd.f32 %v4853_v58, %v7955_v35 }
0x2347   :  { %v4900_v27 = vadd.f32 %v5228_v50, %v4884_v47 }
0x2348   :  { %v4898_v35 = vadd.f32 %v5228_v50, %v4882_v49 }
0x2360   :  { %v5820_v26 = vpop.f32.mrb[92].mxu0 }
0x2361   :  { %v4887_v16 = vadd.f32 %v5820_v26, %v7973_v36  ;;  %v4866_v57 = vpop.f32.mrb[93].mxu0 }
0x2362   :  { %v4885_v52 = vadd.f32 %v4866_v57, %v7969_v13  ;;  %v5821_v9 = vpop.f32.mrb[94].mxu0 }
0x2363   :  { %v4903_v18 = vadd.f32 %v5228_v50, %v4887_v16  ;;  %v4888_v33 = vadd.f32 %v5821_v9, %v7979_v7  ;;  %v4869_v43 = vpop.f32.mrb[95].mxu0 }
0x2364   :  { %v4901_v21 = vadd.f32 %v5228_v50, %v4885_v52  ;;  %v4886_v36 = vadd.f32 %v4869_v43, %v7975_v56 }
0x2365   :  { %v6016_v46 = vpack.i.bf16 %v4903_v18, %v4899_v39  ;;  %v4904_v44 = vadd.f32 %v5228_v50, %v4888_v33 }
0x2366   :  { %v4902_v48 = vadd.f32 %v5228_v50, %v4886_v36 }
0x2367   :  { %v6021_v13 = vpack.i.bf16 %v4904_v44, %v4900_v27  ;;  %6017 = vrot.lane.b32.xlu0 %v6016_v46, %s6422_s23 }
0x2368   :  { %v6011_v3 = vpack.i.bf16 %v4902_v48, %v4898_v35 }
0x236a   :  { %6012 = vrot.lane.b32.xlu1 %v6011_v3, %s8208_s25 }
0x236e   :  { %6022 = vrot.lane.b32.xlu1 %v6021_v13, %s6421_s20 }
0x23d9   :  { %v6018_v7 = vpop.permute.xlu0 %6017 }
0x23da   :  { %v6020_v32 = vunpack.i.h.bf16 %v6018_v7  ;;  %v6019_v15 = vunpack.i.l.bf16 %v6018_v7 }
0x23dc   :  { %v6013_v38 = vpop.permute.xlu1 %6012 }
0x23dd   :  { %v6015_v4 = vunpack.i.h.bf16 %v6013_v38  ;;  %v6014_v25 = vunpack.i.l.bf16 %v6013_v38 }
0x23df   :  { %v4930_v56 = vsel %vm155_vm3, %v4901_v21, %v6015_v4  ;;  %v4929_v22 = vsel %vm155_vm3, %v4897_v11, %v6014_v25 }
0x23e0   :  { %v6023_v24 = vpop.permute.xlu1 %6022  ;;  %v4932_v45 = vsel %vm4931_vm6, %v4929_v22, %v6019_v15  ;;  %v4933_v37 = vsel %vm4931_vm6, %v4930_v56, %v6020_v32 }
0x23e1   :  { %v6025_v54 = vunpack.i.h.bf16 %v6023_v24  ;;  %v6024_v28 = vunpack.i.l.bf16 %v6023_v24 }
0x23e3   :  { %v4935_v59 = vsel %vm4934_vm7, %v4932_v45, %v6024_v28  ;;  %v4936_v12 = vsel %vm4934_vm7, %v4933_v37, %v6025_v54 }
0x23e4   :  { %v4937_v42 = vpack.c.bf16 %v4936_v12, %v4935_v59 }
0x23e6   :  { %5839 = vmatmul.mubr.bf16.vlgmr.msra.gmra.mrb[100].mxu1 %v4937_v42 }
0x24b9   :  { %v5043_v10 = vpop.f32.mrb[100].mxu1 }
0x24ba   :  { %v5044_v1 = vadd.f32 %v5229_v17, %v5043_v10  ;;  %v5840_v51 = vpop.f32.mrb[101].mxu1 }
0x24bb   :  { %v5046_v2 = vpop.f32.mrb[102].mxu1 }
0x24bc   :  { %v5050_v8 = vadd.f32 %v6416_v14, %v5044_v1  ;;  %v5047_v41 = vadd.f32 %v5229_v17, %v5046_v2  ;;  %v5841_v53 = vpop.f32.mrb[103].mxu1 }
0x24be   :  { %5052 = vst.msk [vmem:[%s8170_s17] sm:$0xff] %vm72_vm2, %v5050_v8  ;;  %v5051_v5 = vadd.f32 %v6417_v40, %v5047_v41 }
0x24c0   :  { %5053 = vst.msk [vmem:[%s8170_s17 + $0x8] sm:$0xff] %vm72_vm2, %v5051_v5 }

</bundles_post_ra>
